<compile_context>
chip_gen: v5e
topology: v5e:2x2
jax: 0.10.0
libtpu: 0.0.40
codegen_flags: <defaults>
</compile_context>

<pallas_src>
import functools
import math

import numpy as np
import jax
import jax.numpy as jnp
from jax import lax
from jax.experimental import pallas as pl
from jax.experimental.pallas import tpu as pltpu

SQRT2 = math.sqrt(2.0)
NEG_SLOPE = 0.2

# make_kernel([1,3,3,1]): outer product normalized to sum 1. The torch code convolves with
# flip(kernel); the kernel is symmetric so plain correlation is identical.
_B1D = np.array([1.0, 3.0, 3.0, 1.0], dtype=np.float32)
BLUR_K = np.outer(_B1D, _B1D)
BLUR_K = BLUR_K / BLUR_K.sum()  # (4, 4)


# -----------------------------------------------------------------------------
# Fused kernel: conv1(3x3,s1,'same') + lrelu  ->  [blur * conv2](6x6,s2) + lrelu
# -----------------------------------------------------------------------------
def conv_block_kernel(xph_ref, w1_ref, b1_ref, w2_ref, b2_ref, o_ref, xp_s, y1p_s):
    # xph_ref : (1, 4, Hh, Wh, Cin)  2x2 polyphase-split input, phase idx = 2*(row%2)+(col%2)
    # w1_ref  : (9*Cin, Cin)   conv1 weights * scale1 * sqrt(2), tap-major (ky*3+kx)
    # b1_ref  : (1, Cin)       conv1 bias * sqrt(2)   (f32)
    # w2_ref  : (36*Cin, Cout) blur-folded 6x6/stride-2 weights * scale2 * sqrt(2), tap-major (u*6+v)
    # b2_ref  : (1, Cout)      conv2 bias * sqrt(2)   (f32)
    # o_ref   : (1, Hh, Wh, Cout)
    # xp_s    : VMEM (4, Hh+1, Wh+1, Cin)  polyphase planes of zero-pad(x, 1)
    # y1p_s   : VMEM (4, Hh+2, Wh+2, Cin)  polyphase planes of zero-pad(conv1_out, 2)
    _, _, Hh, Wh, Cin = xph_ref.shape
    Cout = o_ref.shape[-1]
    M = Hh * Wh

    # ---- stage 0: polyphase planes of the 1-padded input (zero halo, unstrided writes) ----
    # Plane (p,q)[m,n] = pad1(x)[2m+p, 2n+q]; the pad shifts phases, so plane (p,q) holds
    # input phase (1-p, 1-q) at an offset of (1-p, 1-q).
    xp_s[...] = jnp.zeros_like(xp_s)
    xp_s[0, 1:Hh + 1, 1:Wh + 1, :] = xph_ref[0, 3]   # plane (0,0) <- x phase (1,1)
    xp_s[1, 1:Hh + 1, 0:Wh, :] = xph_ref[0, 2]       # plane (0,1) <- x phase (1,0)
    xp_s[2, 0:Hh, 1:Wh + 1, :] = xph_ref[0, 1]       # plane (1,0) <- x phase (0,1)
    xp_s[3, 0:Hh, 0:Wh, :] = xph_ref[0, 0]           # plane (1,1) <- x phase (0,0)

    # ---- stage 1: conv1 as ONE MXU matmul, M = H*W, K = 9*Cin ----
    # Rows are grouped by output phase so the result drops straight into the phase planes
    # needed by the stride-2 stage below.
    phase_cols = []
    for a in range(2):
        for b in range(2):
            taps = []
            for ky in range(3):
                for kx in range(3):
                    p, q = (a + ky) % 2, (b + kx) % 2
                    mo, no = (a + ky) // 2, (b + kx) // 2
                    taps.append(
                        xp_s[2 * p + q, mo:mo + Hh, no:no + Wh, :].reshape(M, Cin))
            phase_cols.append(jnp.concatenate(taps, axis=-1))     # (M, 9*Cin)
    cols1 = jnp.concatenate(phase_cols, axis=0)                   # (4*M, 9*Cin)
    z1 = jnp.dot(cols1, w1_ref[...], preferred_element_type=jnp.float32)
    z1 = z1 + b1_ref[...]
    y1 = jnp.maximum(z1, NEG_SLOPE * z1)     # fused leaky-relu; sqrt(2) folded into w/b
    y1 = y1.astype(y1p_s.dtype)

    # ---- stage 2: polyphase planes of the 2-padded conv1 output ----
    # pad=2 keeps phases aligned: plane (p,q) = conv1 output phase (p,q) at offset (1,1).
    y1p_s[...] = jnp.zeros_like(y1p_s)
    for ph in range(4):
        y1p_s[ph, 1:Hh + 1, 1:Wh + 1, :] = y1[ph * M:(ph + 1) * M].reshape(Hh, Wh, Cin)

    # ---- stage 3: blur * conv2 == dense 6x6/stride-2 conv, as ONE MXU matmul (K = 36*Cin) ----
    taps2 = []
    for u in range(6):
        for v in range(6):
            p, q = u % 2, v % 2
            mo, no = u // 2, v // 2
            taps2.append(
                y1p_s[2 * p + q, mo:mo + Hh, no:no + Wh, :].reshape(M, Cin))
    cols2 = jnp.concatenate(taps2, axis=-1)                        # (M, 36*Cin)
    z2 = jnp.dot(cols2, w2_ref[...], preferred_element_type=jnp.float32)
    z2 = z2 + b2_ref[...]
    y2 = jnp.maximum(z2, NEG_SLOPE * z2)
    o_ref[...] = y2.reshape(1, Hh, Wh, Cout).astype(o_ref.dtype)


# -----------------------------------------------------------------------------
# Wrapper: full ConvBlock forward (NCHW in / NCHW out, PyTorch convention)
# -----------------------------------------------------------------------------
def conv_block_forward(x_nchw, w1, b1, w2, b2, *, compute_dtype=jnp.bfloat16):
    N, Cin, H, W = x_nchw.shape
    Cout = w2.shape[0]
    assert H % 2 == 0 and W % 2 == 0, "stride-2 block assumes even spatial dims"
    Hh, Wh = H // 2, W // 2

    # ---- trace-time weight prep (tiny tensors) ------------------------------
    scale1 = 1.0 / math.sqrt(Cin * 9)        # EqualConv2d equalized-lr scale (k=3)
    scale2 = 1.0 / math.sqrt(Cin * 9)
    w1_eff = (jnp.transpose(w1, (2, 3, 1, 0)).reshape(9 * Cin, Cin)
              * (scale1 * SQRT2)).astype(compute_dtype)
    b1_eff = (b1.reshape(1, Cin) * SQRT2).astype(jnp.float32)

    # Fold the depthwise [1,3,3,1] FIR into conv2: composite = dense 6x6/stride-2 conv with
    # w_eff[co, ci] = conv2d_full(w2[co, ci], BLUR_K).
    blur = jnp.asarray(BLUR_K, jnp.float32)
    w2b = jnp.zeros((Cout, Cin, 6, 6), jnp.float32)
    for ky in range(3):
        for kx in range(3):
            w2b = w2b.at[:, :, ky:ky + 4, kx:kx + 4].add(
                w2[:, :, ky:ky + 1, kx:kx + 1] * blur)
    w2_eff = (jnp.transpose(w2b, (2, 3, 1, 0)).reshape(36 * Cin, Cout)
              * (scale2 * SQRT2)).astype(compute_dtype)
    b2_eff = (b2.reshape(1, Cout) * SQRT2).astype(jnp.float32)

    # ---- layout glue: NCHW -> NHWC + 2x2 polyphase split of the input (single pass) ----
    x = jnp.transpose(x_nchw, (0, 2, 3, 1)).astype(compute_dtype)
    xph = (x.reshape(N, Hh, 2, Wh, 2, Cin)
             .transpose(0, 2, 4, 1, 3, 5)
             .reshape(N, 4, Hh, Wh, Cin))          # phase idx = 2*(row%2) + (col%2)

    out_nhwc = pl.pallas_call(
        conv_block_kernel,
        out_shape=jax.ShapeDtypeStruct((N, Hh, Wh, Cout), x_nchw.dtype),
        grid=(N,),
        in_specs=[
            pl.BlockSpec((1, 4, Hh, Wh, Cin), lambda n: (n, 0, 0, 0, 0)),
            pl.BlockSpec((9 * Cin, Cin), lambda n: (0, 0)),
            pl.BlockSpec((1, Cin), lambda n: (0, 0)),
            pl.BlockSpec((36 * Cin, Cout), lambda n: (0, 0)),
            pl.BlockSpec((1, Cout), lambda n: (0, 0)),
        ],
        out_specs=pl.BlockSpec((1, Hh, Wh, Cout), lambda n: (n, 0, 0, 0)),
        scratch_shapes=[
            pltpu.VMEM((4, Hh + 1, Wh + 1, Cin), compute_dtype),
            pltpu.VMEM((4, Hh + 2, Wh + 2, Cin), compute_dtype),
        ],
        compiler_params=pltpu.CompilerParams(
            dimension_semantics=("parallel",),
            vmem_limit_bytes=32 * 1024 * 1024,
        ),
    )(xph, w1_eff, b1_eff, w2_eff, b2_eff)

    return jnp.transpose(out_nhwc, (0, 3, 1, 2))   # NHWC -> NCHW


# -----------------------------------------------------------------------------
# Pure-JAX reference (same math, via lax.conv) for verification
# -----------------------------------------------------------------------------
def ref_forward(x_nchw, w1, b1, w2, b2):
    Cin = w1.shape[1]
    dn = ("NCHW", "OIHW", "NCHW")
    prec = lax.Precision.HIGHEST

    def fused_lrelu(y, b):
        y = y + b.reshape(1, -1, 1, 1)
        return jnp.where(y >= 0.0, y, NEG_SLOPE * y) * SQRT2

    scale1 = 1.0 / math.sqrt(Cin * 9)
    y = lax.conv_general_dilated(x_nchw, w1 * scale1, (1, 1), ((1, 1), (1, 1)),
                                 dimension_numbers=dn, precision=prec)
    y = fused_lrelu(y, b1)
    blur_w = jnp.broadcast_to(jnp.asarray(BLUR_K, jnp.float32)[None, None],
                              (Cin, 1, 4, 4))
    y = lax.conv_general_dilated(y, blur_w, (1, 1), ((2, 2), (2, 2)),
                                 feature_group_count=Cin, dimension_numbers=dn,
                                 precision=prec)
    scale2 = 1.0 / math.sqrt(Cin * 9)
    y = lax.conv_general_dilated(y, w2 * scale2, (2, 2), ((0, 0), (0, 0)),
                                 dimension_numbers=dn, precision=prec)
    y = fused_lrelu(y, b2)
    return y


if __name__ == "__main__":
    N, Cin, Cout, H, W = 2, 4, 8, 16, 16
    key = jax.random.PRNGKey(0)
    k1, k2, k3, k4, k5 = jax.random.split(key, 5)

    # Parameter shapes follow the module __init__ (torch.randn weights). FusedLeakyReLU
    # biases are zero-init in torch; small random values here so the bias path is exercised.
    w1 = jax.random.normal(k1, (Cin, Cin, 3, 3), jnp.float32)
    b1 = 0.1 * jax.random.normal(k2, (Cin,), jnp.float32)
    w2 = jax.random.normal(k3, (Cout, Cin, 3, 3), jnp.float32)
    b2 = 0.1 * jax.random.normal(k4, (Cout,), jnp.float32)
    x = jax.random.normal(k5, (N, Cin, H, W), jnp.float32)

    ref = jax.block_until_ready(ref_forward(x, w1, b1, w2, b2))

    # f32 compute path: verifies the restructured math (blur fold, scale/gain fold,
    # polyphase stride-2 im2col) tightly against the lax.conv reference.
    f32_fwd = jax.jit(functools.partial(conv_block_forward, compute_dtype=jnp.float32))
    out_f32 = jax.block_until_ready(f32_fwd(x, w1, b1, w2, b2))
    assert out_f32.shape == (N, Cout, H // 2, W // 2), out_f32.shape
    np.testing.assert_allclose(np.asarray(out_f32), np.asarray(ref),
                               rtol=2e-3, atol=2e-3)

    # bf16 MXU path (default): bf16 operands/intermediates, f32 accumulation + epilogue.
    bf16_fwd = jax.jit(conv_block_forward)
    out_bf16 = jax.block_until_ready(bf16_fwd(x, w1, b1, w2, b2))
    np.testing.assert_allclose(np.asarray(out_bf16), np.asarray(ref),
                               rtol=5e-2, atol=5e-2)

    print("KERNEL_OK")
</pallas_src>

<mosaic_0001>
module attributes {stable_mosaic.version = 11 : i64} {
  func.func @conv_block_kernel(%arg0: i32, %arg1: memref<1x4x8x8x4xf32, #tpu.memory_space<vmem>>, %arg2: memref<36x4xf32, #tpu.memory_space<vmem>>, %arg3: memref<1x4xf32, #tpu.memory_space<vmem>>, %arg4: memref<144x8xf32, #tpu.memory_space<vmem>>, %arg5: memref<1x8xf32, #tpu.memory_space<vmem>>, %arg6: memref<1x8x8x8xf32, #tpu.memory_space<vmem>>, %arg7: memref<4x9x9x4xf32, #tpu.memory_space<vmem>>, %arg8: memref<4x10x10x4xf32, #tpu.memory_space<vmem>>) attributes {dimension_semantics = [#tpu.dimension_semantics<parallel>], iteration_bounds = array<i64: 2>, scalar_prefetch = 0 : i64, scratch_operands = 2 : i64, tpu.core_type = #tpu.core_type<tc>, window_params = [{transform_indices = @transform_0, window_bounds = array<i64: 1, 4, 8, 8, 4>}, {pipeline_mode = #tpu.pipeline_mode<synchronous>, transform_indices = @transform_1, window_bounds = array<i64: 36, 4>}, {pipeline_mode = #tpu.pipeline_mode<synchronous>, transform_indices = @transform_2, window_bounds = array<i64: 1, 4>}, {pipeline_mode = #tpu.pipeline_mode<synchronous>, transform_indices = @transform_3, window_bounds = array<i64: 144, 8>}, {pipeline_mode = #tpu.pipeline_mode<synchronous>, transform_indices = @transform_4, window_bounds = array<i64: 1, 8>}, {transform_indices = @transform_5, window_bounds = array<i64: 1, 8, 8, 8>}]} {
    %cst = arith.constant 0.000000e+00 : f32
    %0 = vector.broadcast %cst : f32 to vector<4x9x9x4xf32>
    %c0 = arith.constant 0 : index
    %c0_0 = arith.constant 0 : index
    %c0_1 = arith.constant 0 : index
    %c0_2 = arith.constant 0 : index
    %1 = vector.load %arg7[%c0, %c0_0, %c0_1, %c0_2] : memref<4x9x9x4xf32, #tpu.memory_space<vmem>>, vector<4x9x9x4xf32>
    tpu.vector_store %arg7[%c0, %c0_0, %c0_1, %c0_2], %0 {strides = array<i32>} : memref<4x9x9x4xf32, #tpu.memory_space<vmem>>, vector<4x9x9x4xf32>,
    %c0_3 = arith.constant 0 : index
    %c3 = arith.constant 3 : index
    %c0_4 = arith.constant 0 : index
    %c0_5 = arith.constant 0 : index
    %c0_6 = arith.constant 0 : index
    %2 = vector.load %arg1[%c0_3, %c3, %c0_4, %c0_5, %c0_6] : memref<1x4x8x8x4xf32, #tpu.memory_space<vmem>>, vector<1x1x8x8x4xf32>
    %3 = vector.shape_cast %2 : vector<1x1x8x8x4xf32> to vector<8x8x4xf32>
    %c0_7 = arith.constant 0 : index
    %c1 = arith.constant 1 : index
    %c1_8 = arith.constant 1 : index
    %c0_9 = arith.constant 0 : index
    %4 = vector.load %arg7[%c0_7, %c1, %c1_8, %c0_9] : memref<4x9x9x4xf32, #tpu.memory_space<vmem>>, vector<1x8x8x4xf32>
    %5 = vector.shape_cast %4 : vector<1x8x8x4xf32> to vector<8x8x4xf32>
    %6 = vector.shape_cast %3 : vector<8x8x4xf32> to vector<1x8x8x4xf32>
    tpu.vector_store %arg7[%c0_7, %c1, %c1_8, %c0_9], %6 {strides = array<i32>} : memref<4x9x9x4xf32, #tpu.memory_space<vmem>>, vector<1x8x8x4xf32>,
    %c0_10 = arith.constant 0 : index
    %c2 = arith.constant 2 : index
    %c0_11 = arith.constant 0 : index
    %c0_12 = arith.constant 0 : index
    %c0_13 = arith.constant 0 : index
    %7 = vector.load %arg1[%c0_10, %c2, %c0_11, %c0_12, %c0_13] : memref<1x4x8x8x4xf32, #tpu.memory_space<vmem>>, vector<1x1x8x8x4xf32>
    %8 = vector.shape_cast %7 : vector<1x1x8x8x4xf32> to vector<8x8x4xf32>
    %c1_14 = arith.constant 1 : index
    %c1_15 = arith.constant 1 : index
    %c0_16 = arith.constant 0 : index
    %c0_17 = arith.constant 0 : index
    %9 = vector.load %arg7[%c1_14, %c1_15, %c0_16, %c0_17] : memref<4x9x9x4xf32, #tpu.memory_space<vmem>>, vector<1x8x8x4xf32>
    %10 = vector.shape_cast %9 : vector<1x8x8x4xf32> to vector<8x8x4xf32>
    %11 = vector.shape_cast %8 : vector<8x8x4xf32> to vector<1x8x8x4xf32>
    tpu.vector_store %arg7[%c1_14, %c1_15, %c0_16, %c0_17], %11 {strides = array<i32>} : memref<4x9x9x4xf32, #tpu.memory_space<vmem>>, vector<1x8x8x4xf32>,
    %c0_18 = arith.constant 0 : index
    %c1_19 = arith.constant 1 : index
    %c0_20 = arith.constant 0 : index
    %c0_21 = arith.constant 0 : index
    %c0_22 = arith.constant 0 : index
    %12 = vector.load %arg1[%c0_18, %c1_19, %c0_20, %c0_21, %c0_22] : memref<1x4x8x8x4xf32, #tpu.memory_space<vmem>>, vector<1x1x8x8x4xf32>
    %13 = vector.shape_cast %12 : vector<1x1x8x8x4xf32> to vector<8x8x4xf32>
    %c2_23 = arith.constant 2 : index
    %c0_24 = arith.constant 0 : index
    %c1_25 = arith.constant 1 : index
    %c0_26 = arith.constant 0 : index
    %14 = vector.load %arg7[%c2_23, %c0_24, %c1_25, %c0_26] : memref<4x9x9x4xf32, #tpu.memory_space<vmem>>, vector<1x8x8x4xf32>
    %15 = vector.shape_cast %14 : vector<1x8x8x4xf32> to vector<8x8x4xf32>
    %16 = vector.shape_cast %13 : vector<8x8x4xf32> to vector<1x8x8x4xf32>
    tpu.vector_store %arg7[%c2_23, %c0_24, %c1_25, %c0_26], %16 {strides = array<i32>} : memref<4x9x9x4xf32, #tpu.memory_space<vmem>>, vector<1x8x8x4xf32>,
    %c0_27 = arith.constant 0 : index
    %c0_28 = arith.constant 0 : index
    %c0_29 = arith.constant 0 : index
    %c0_30 = arith.constant 0 : index
    %c0_31 = arith.constant 0 : index
    %17 = vector.load %arg1[%c0_27, %c0_28, %c0_29, %c0_30, %c0_31] : memref<1x4x8x8x4xf32, #tpu.memory_space<vmem>>, vector<1x1x8x8x4xf32>
    %18 = vector.shape_cast %17 : vector<1x1x8x8x4xf32> to vector<8x8x4xf32>
    %c3_32 = arith.constant 3 : index
    %c0_33 = arith.constant 0 : index
    %c0_34 = arith.constant 0 : index
    %c0_35 = arith.constant 0 : index
    %19 = vector.load %arg7[%c3_32, %c0_33, %c0_34, %c0_35] : memref<4x9x9x4xf32, #tpu.memory_space<vmem>>, vector<1x8x8x4xf32>
    %20 = vector.shape_cast %19 : vector<1x8x8x4xf32> to vector<8x8x4xf32>
    %21 = vector.shape_cast %18 : vector<8x8x4xf32> to vector<1x8x8x4xf32>
    tpu.vector_store %arg7[%c3_32, %c0_33, %c0_34, %c0_35], %21 {strides = array<i32>} : memref<4x9x9x4xf32, #tpu.memory_space<vmem>>, vector<1x8x8x4xf32>,
    %c0_36 = arith.constant 0 : index
    %c0_37 = arith.constant 0 : index
    %c0_38 = arith.constant 0 : index
    %c0_39 = arith.constant 0 : index
    %22 = vector.load %arg7[%c0_36, %c0_37, %c0_38, %c0_39] : memref<4x9x9x4xf32, #tpu.memory_space<vmem>>, vector<1x8x8x4xf32>
    %23 = vector.shape_cast %22 : vector<1x8x8x4xf32> to vector<8x8x4xf32>
    %24 = vector.shape_cast %23 : vector<8x8x4xf32> to vector<64x4xf32>
    %c1_40 = arith.constant 1 : index
    %c0_41 = arith.constant 0 : index
    %c0_42 = arith.constant 0 : index
    %c0_43 = arith.constant 0 : index
    %25 = vector.load %arg7[%c1_40, %c0_41, %c0_42, %c0_43] : memref<4x9x9x4xf32, #tpu.memory_space<vmem>>, vector<1x8x8x4xf32>
    %26 = vector.shape_cast %25 : vector<1x8x8x4xf32> to vector<8x8x4xf32>
    %27 = vector.shape_cast %26 : vector<8x8x4xf32> to vector<64x4xf32>
    %c0_44 = arith.constant 0 : index
    %c0_45 = arith.constant 0 : index
    %c1_46 = arith.constant 1 : index
    %c0_47 = arith.constant 0 : index
    %28 = vector.load %arg7[%c0_44, %c0_45, %c1_46, %c0_47] : memref<4x9x9x4xf32, #tpu.memory_space<vmem>>, vector<1x8x8x4xf32>
    %29 = vector.shape_cast %28 : vector<1x8x8x4xf32> to vector<8x8x4xf32>
    %30 = vector.shape_cast %29 : vector<8x8x4xf32> to vector<64x4xf32>
    %c2_48 = arith.constant 2 : index
    %c0_49 = arith.constant 0 : index
    %c0_50 = arith.constant 0 : index
    %c0_51 = arith.constant 0 : index
    %31 = vector.load %arg7[%c2_48, %c0_49, %c0_50, %c0_51] : memref<4x9x9x4xf32, #tpu.memory_space<vmem>>, vector<1x8x8x4xf32>
    %32 = vector.shape_cast %31 : vector<1x8x8x4xf32> to vector<8x8x4xf32>
    %33 = vector.shape_cast %32 : vector<8x8x4xf32> to vector<64x4xf32>
    %c3_52 = arith.constant 3 : index
    %c0_53 = arith.constant 0 : index
    %c0_54 = arith.constant 0 : index
    %c0_55 = arith.constant 0 : index
    %34 = vector.load %arg7[%c3_52, %c0_53, %c0_54, %c0_55] : memref<4x9x9x4xf32, #tpu.memory_space<vmem>>, vector<1x8x8x4xf32>
    %35 = vector.shape_cast %34 : vector<1x8x8x4xf32> to vector<8x8x4xf32>
    %36 = vector.shape_cast %35 : vector<8x8x4xf32> to vector<64x4xf32>
    %c2_56 = arith.constant 2 : index
    %c0_57 = arith.constant 0 : index
    %c1_58 = arith.constant 1 : index
    %c0_59 = arith.constant 0 : index
    %37 = vector.load %arg7[%c2_56, %c0_57, %c1_58, %c0_59] : memref<4x9x9x4xf32, #tpu.memory_space<vmem>>, vector<1x8x8x4xf32>
    %38 = vector.shape_cast %37 : vector<1x8x8x4xf32> to vector<8x8x4xf32>
    %39 = vector.shape_cast %38 : vector<8x8x4xf32> to vector<64x4xf32>
    %c0_60 = arith.constant 0 : index
    %c1_61 = arith.constant 1 : index
    %c0_62 = arith.constant 0 : index
    %c0_63 = arith.constant 0 : index
    %40 = vector.load %arg7[%c0_60, %c1_61, %c0_62, %c0_63] : memref<4x9x9x4xf32, #tpu.memory_space<vmem>>, vector<1x8x8x4xf32>
    %41 = vector.shape_cast %40 : vector<1x8x8x4xf32> to vector<8x8x4xf32>
    %42 = vector.shape_cast %41 : vector<8x8x4xf32> to vector<64x4xf32>
    %c1_64 = arith.constant 1 : index
    %c1_65 = arith.constant 1 : index
    %c0_66 = arith.constant 0 : index
    %c0_67 = arith.constant 0 : index
    %43 = vector.load %arg7[%c1_64, %c1_65, %c0_66, %c0_67] : memref<4x9x9x4xf32, #tpu.memory_space<vmem>>, vector<1x8x8x4xf32>
    %44 = vector.shape_cast %43 : vector<1x8x8x4xf32> to vector<8x8x4xf32>
    %45 = vector.shape_cast %44 : vector<8x8x4xf32> to vector<64x4xf32>
    %c0_68 = arith.constant 0 : index
    %c1_69 = arith.constant 1 : index
    %c1_70 = arith.constant 1 : index
    %c0_71 = arith.constant 0 : index
    %46 = vector.load %arg7[%c0_68, %c1_69, %c1_70, %c0_71] : memref<4x9x9x4xf32, #tpu.memory_space<vmem>>, vector<1x8x8x4xf32>
    %47 = vector.shape_cast %46 : vector<1x8x8x4xf32> to vector<8x8x4xf32>
    %48 = vector.shape_cast %47 : vector<8x8x4xf32> to vector<64x4xf32>
    %49 = tpu.concatenate %24, %27, %30, %33, %36, %39, %42, %45, %48 in 1 : vector<64x4xf32>, vector<64x4xf32>, vector<64x4xf32>, vector<64x4xf32>, vector<64x4xf32>, vector<64x4xf32>, vector<64x4xf32>, vector<64x4xf32>, vector<64x4xf32> -> vector<64x36xf32>
    %c1_72 = arith.constant 1 : index
    %c0_73 = arith.constant 0 : index
    %c0_74 = arith.constant 0 : index
    %c0_75 = arith.constant 0 : index
    %50 = vector.load %arg7[%c1_72, %c0_73, %c0_74, %c0_75] : memref<4x9x9x4xf32, #tpu.memory_space<vmem>>, vector<1x8x8x4xf32>
    %51 = vector.shape_cast %50 : vector<1x8x8x4xf32> to vector<8x8x4xf32>
    %52 = vector.shape_cast %51 : vector<8x8x4xf32> to vector<64x4xf32>
    %c0_76 = arith.constant 0 : index
    %c0_77 = arith.constant 0 : index
    %c1_78 = arith.constant 1 : index
    %c0_79 = arith.constant 0 : index
    %53 = vector.load %arg7[%c0_76, %c0_77, %c1_78, %c0_79] : memref<4x9x9x4xf32, #tpu.memory_space<vmem>>, vector<1x8x8x4xf32>
    %54 = vector.shape_cast %53 : vector<1x8x8x4xf32> to vector<8x8x4xf32>
    %55 = vector.shape_cast %54 : vector<8x8x4xf32> to vector<64x4xf32>
    %c1_80 = arith.constant 1 : index
    %c0_81 = arith.constant 0 : index
    %c1_82 = arith.constant 1 : index
    %c0_83 = arith.constant 0 : index
    %56 = vector.load %arg7[%c1_80, %c0_81, %c1_82, %c0_83] : memref<4x9x9x4xf32, #tpu.memory_space<vmem>>, vector<1x8x8x4xf32>
    %57 = vector.shape_cast %56 : vector<1x8x8x4xf32> to vector<8x8x4xf32>
    %58 = vector.shape_cast %57 : vector<8x8x4xf32> to vector<64x4xf32>
    %c3_84 = arith.constant 3 : index
    %c0_85 = arith.constant 0 : index
    %c0_86 = arith.constant 0 : index
    %c0_87 = arith.constant 0 : index
    %59 = vector.load %arg7[%c3_84, %c0_85, %c0_86, %c0_87] : memref<4x9x9x4xf32, #tpu.memory_space<vmem>>, vector<1x8x8x4xf32>
    %60 = vector.shape_cast %59 : vector<1x8x8x4xf32> to vector<8x8x4xf32>
    %61 = vector.shape_cast %60 : vector<8x8x4xf32> to vector<64x4xf32>
    %c2_88 = arith.constant 2 : index
    %c0_89 = arith.constant 0 : index
    %c1_90 = arith.constant 1 : index
    %c0_91 = arith.constant 0 : index
    %62 = vector.load %arg7[%c2_88, %c0_89, %c1_90, %c0_91] : memref<4x9x9x4xf32, #tpu.memory_space<vmem>>, vector<1x8x8x4xf32>
    %63 = vector.shape_cast %62 : vector<1x8x8x4xf32> to vector<8x8x4xf32>
    %64 = vector.shape_cast %63 : vector<8x8x4xf32> to vector<64x4xf32>
    %c3_92 = arith.constant 3 : index
    %c0_93 = arith.constant 0 : index
    %c1_94 = arith.constant 1 : index
    %c0_95 = arith.constant 0 : index
    %65 = vector.load %arg7[%c3_92, %c0_93, %c1_94, %c0_95] : memref<4x9x9x4xf32, #tpu.memory_space<vmem>>, vector<1x8x8x4xf32>
    %66 = vector.shape_cast %65 : vector<1x8x8x4xf32> to vector<8x8x4xf32>
    %67 = vector.shape_cast %66 : vector<8x8x4xf32> to vector<64x4xf32>
    %c1_96 = arith.constant 1 : index
    %c1_97 = arith.constant 1 : index
    %c0_98 = arith.constant 0 : index
    %c0_99 = arith.constant 0 : index
    %68 = vector.load %arg7[%c1_96, %c1_97, %c0_98, %c0_99] : memref<4x9x9x4xf32, #tpu.memory_space<vmem>>, vector<1x8x8x4xf32>
    %69 = vector.shape_cast %68 : vector<1x8x8x4xf32> to vector<8x8x4xf32>
    %70 = vector.shape_cast %69 : vector<8x8x4xf32> to vector<64x4xf32>
    %c0_100 = arith.constant 0 : index
    %c1_101 = arith.constant 1 : index
    %c1_102 = arith.constant 1 : index
    %c0_103 = arith.constant 0 : index
    %71 = vector.load %arg7[%c0_100, %c1_101, %c1_102, %c0_103] : memref<4x9x9x4xf32, #tpu.memory_space<vmem>>, vector<1x8x8x4xf32>
    %72 = vector.shape_cast %71 : vector<1x8x8x4xf32> to vector<8x8x4xf32>
    %73 = vector.shape_cast %72 : vector<8x8x4xf32> to vector<64x4xf32>
    %c1_104 = arith.constant 1 : index
    %c1_105 = arith.constant 1 : index
    %c1_106 = arith.constant 1 : index
    %c0_107 = arith.constant 0 : index
    %74 = vector.load %arg7[%c1_104, %c1_105, %c1_106, %c0_107] : memref<4x9x9x4xf32, #tpu.memory_space<vmem>>, vector<1x8x8x4xf32>
    %75 = vector.shape_cast %74 : vector<1x8x8x4xf32> to vector<8x8x4xf32>
    %76 = vector.shape_cast %75 : vector<8x8x4xf32> to vector<64x4xf32>
    %77 = tpu.concatenate %52, %55, %58, %61, %64, %67, %70, %73, %76 in 1 : vector<64x4xf32>, vector<64x4xf32>, vector<64x4xf32>, vector<64x4xf32>, vector<64x4xf32>, vector<64x4xf32>, vector<64x4xf32>, vector<64x4xf32>, vector<64x4xf32> -> vector<64x36xf32>
    %c2_108 = arith.constant 2 : index
    %c0_109 = arith.constant 0 : index
    %c0_110 = arith.constant 0 : index
    %c0_111 = arith.constant 0 : index
    %78 = vector.load %arg7[%c2_108, %c0_109, %c0_110, %c0_111] : memref<4x9x9x4xf32, #tpu.memory_space<vmem>>, vector<1x8x8x4xf32>
    %79 = vector.shape_cast %78 : vector<1x8x8x4xf32> to vector<8x8x4xf32>
    %80 = vector.shape_cast %79 : vector<8x8x4xf32> to vector<64x4xf32>
    %c3_112 = arith.constant 3 : index
    %c0_113 = arith.constant 0 : index
    %c0_114 = arith.constant 0 : index
    %c0_115 = arith.constant 0 : index
    %81 = vector.load %arg7[%c3_112, %c0_113, %c0_114, %c0_115] : memref<4x9x9x4xf32, #tpu.memory_space<vmem>>, vector<1x8x8x4xf32>
    %82 = vector.shape_cast %81 : vector<1x8x8x4xf32> to vector<8x8x4xf32>
    %83 = vector.shape_cast %82 : vector<8x8x4xf32> to vector<64x4xf32>
    %c2_116 = arith.constant 2 : index
    %c0_117 = arith.constant 0 : index
    %c1_118 = arith.constant 1 : index
    %c0_119 = arith.constant 0 : index
    %84 = vector.load %arg7[%c2_116, %c0_117, %c1_118, %c0_119] : memref<4x9x9x4xf32, #tpu.memory_space<vmem>>, vector<1x8x8x4xf32>
    %85 = vector.shape_cast %84 : vector<1x8x8x4xf32> to vector<8x8x4xf32>
    %86 = vector.shape_cast %85 : vector<8x8x4xf32> to vector<64x4xf32>
    %c0_120 = arith.constant 0 : index
    %c1_121 = arith.constant 1 : index
    %c0_122 = arith.constant 0 : index
    %c0_123 = arith.constant 0 : index
    %87 = vector.load %arg7[%c0_120, %c1_121, %c0_122, %c0_123] : memref<4x9x9x4xf32, #tpu.memory_space<vmem>>, vector<1x8x8x4xf32>
    %88 = vector.shape_cast %87 : vector<1x8x8x4xf32> to vector<8x8x4xf32>
    %89 = vector.shape_cast %88 : vector<8x8x4xf32> to vector<64x4xf32>
    %c1_124 = arith.constant 1 : index
    %c1_125 = arith.constant 1 : index
    %c0_126 = arith.constant 0 : index
    %c0_127 = arith.constant 0 : index
    %90 = vector.load %arg7[%c1_124, %c1_125, %c0_126, %c0_127] : memref<4x9x9x4xf32, #tpu.memory_space<vmem>>, vector<1x8x8x4xf32>
    %91 = vector.shape_cast %90 : vector<1x8x8x4xf32> to vector<8x8x4xf32>
    %92 = vector.shape_cast %91 : vector<8x8x4xf32> to vector<64x4xf32>
    %c0_128 = arith.constant 0 : index
    %c1_129 = arith.constant 1 : index
    %c1_130 = arith.constant 1 : index
    %c0_131 = arith.constant 0 : index
    %93 = vector.load %arg7[%c0_128, %c1_129, %c1_130, %c0_131] : memref<4x9x9x4xf32, #tpu.memory_space<vmem>>, vector<1x8x8x4xf32>
    %94 = vector.shape_cast %93 : vector<1x8x8x4xf32> to vector<8x8x4xf32>
    %95 = vector.shape_cast %94 : vector<8x8x4xf32> to vector<64x4xf32>
    %c2_132 = arith.constant 2 : index
    %c1_133 = arith.constant 1 : index
    %c0_134 = arith.constant 0 : index
    %c0_135 = arith.constant 0 : index
    %96 = vector.load %arg7[%c2_132, %c1_133, %c0_134, %c0_135] : memref<4x9x9x4xf32, #tpu.memory_space<vmem>>, vector<1x8x8x4xf32>
    %97 = vector.shape_cast %96 : vector<1x8x8x4xf32> to vector<8x8x4xf32>
    %98 = vector.shape_cast %97 : vector<8x8x4xf32> to vector<64x4xf32>
    %c3_136 = arith.constant 3 : index
    %c1_137 = arith.constant 1 : index
    %c0_138 = arith.constant 0 : index
    %c0_139 = arith.constant 0 : index
    %99 = vector.load %arg7[%c3_136, %c1_137, %c0_138, %c0_139] : memref<4x9x9x4xf32, #tpu.memory_space<vmem>>, vector<1x8x8x4xf32>
    %100 = vector.shape_cast %99 : vector<1x8x8x4xf32> to vector<8x8x4xf32>
    %101 = vector.shape_cast %100 : vector<8x8x4xf32> to vector<64x4xf32>
    %c2_140 = arith.constant 2 : index
    %c1_141 = arith.constant 1 : index
    %c1_142 = arith.constant 1 : index
    %c0_143 = arith.constant 0 : index
    %102 = vector.load %arg7[%c2_140, %c1_141, %c1_142, %c0_143] : memref<4x9x9x4xf32, #tpu.memory_space<vmem>>, vector<1x8x8x4xf32>
    %103 = vector.shape_cast %102 : vector<1x8x8x4xf32> to vector<8x8x4xf32>
    %104 = vector.shape_cast %103 : vector<8x8x4xf32> to vector<64x4xf32>
    %105 = tpu.concatenate %80, %83, %86, %89, %92, %95, %98, %101, %104 in 1 : vector<64x4xf32>, vector<64x4xf32>, vector<64x4xf32>, vector<64x4xf32>, vector<64x4xf32>, vector<64x4xf32>, vector<64x4xf32>, vector<64x4xf32>, vector<64x4xf32> -> vector<64x36xf32>
    %c3_144 = arith.constant 3 : index
    %c0_145 = arith.constant 0 : index
    %c0_146 = arith.constant 0 : index
    %c0_147 = arith.constant 0 : index
    %106 = vector.load %arg7[%c3_144, %c0_145, %c0_146, %c0_147] : memref<4x9x9x4xf32, #tpu.memory_space<vmem>>, vector<1x8x8x4xf32>
    %107 = vector.shape_cast %106 : vector<1x8x8x4xf32> to vector<8x8x4xf32>
    %108 = vector.shape_cast %107 : vector<8x8x4xf32> to vector<64x4xf32>
    %c2_148 = arith.constant 2 : index
    %c0_149 = arith.constant 0 : index
    %c1_150 = arith.constant 1 : index
    %c0_151 = arith.constant 0 : index
    %109 = vector.load %arg7[%c2_148, %c0_149, %c1_150, %c0_151] : memref<4x9x9x4xf32, #tpu.memory_space<vmem>>, vector<1x8x8x4xf32>
    %110 = vector.shape_cast %109 : vector<1x8x8x4xf32> to vector<8x8x4xf32>
    %111 = vector.shape_cast %110 : vector<8x8x4xf32> to vector<64x4xf32>
    %c3_152 = arith.constant 3 : index
    %c0_153 = arith.constant 0 : index
    %c1_154 = arith.constant 1 : index
    %c0_155 = arith.constant 0 : index
    %112 = vector.load %arg7[%c3_152, %c0_153, %c1_154, %c0_155] : memref<4x9x9x4xf32, #tpu.memory_space<vmem>>, vector<1x8x8x4xf32>
    %113 = vector.shape_cast %112 : vector<1x8x8x4xf32> to vector<8x8x4xf32>
    %114 = vector.shape_cast %113 : vector<8x8x4xf32> to vector<64x4xf32>
    %c1_156 = arith.constant 1 : index
    %c1_157 = arith.constant 1 : index
    %c0_158 = arith.constant 0 : index
    %c0_159 = arith.constant 0 : index
    %115 = vector.load %arg7[%c1_156, %c1_157, %c0_158, %c0_159] : memref<4x9x9x4xf32, #tpu.memory_space<vmem>>, vector<1x8x8x4xf32>
    %116 = vector.shape_cast %115 : vector<1x8x8x4xf32> to vector<8x8x4xf32>
    %117 = vector.shape_cast %116 : vector<8x8x4xf32> to vector<64x4xf32>
    %c0_160 = arith.constant 0 : index
    %c1_161 = arith.constant 1 : index
    %c1_162 = arith.constant 1 : index
    %c0_163 = arith.constant 0 : index
    %118 = vector.load %arg7[%c0_160, %c1_161, %c1_162, %c0_163] : memref<4x9x9x4xf32, #tpu.memory_space<vmem>>, vector<1x8x8x4xf32>
    %119 = vector.shape_cast %118 : vector<1x8x8x4xf32> to vector<8x8x4xf32>
    %120 = vector.shape_cast %119 : vector<8x8x4xf32> to vector<64x4xf32>
    %c1_164 = arith.constant 1 : index
    %c1_165 = arith.constant 1 : index
    %c1_166 = arith.constant 1 : index
    %c0_167 = arith.constant 0 : index
    %121 = vector.load %arg7[%c1_164, %c1_165, %c1_166, %c0_167] : memref<4x9x9x4xf32, #tpu.memory_space<vmem>>, vector<1x8x8x4xf32>
    %122 = vector.shape_cast %121 : vector<1x8x8x4xf32> to vector<8x8x4xf32>
    %123 = vector.shape_cast %122 : vector<8x8x4xf32> to vector<64x4xf32>
    %c3_168 = arith.constant 3 : index
    %c1_169 = arith.constant 1 : index
    %c0_170 = arith.constant 0 : index
    %c0_171 = arith.constant 0 : index
    %124 = vector.load %arg7[%c3_168, %c1_169, %c0_170, %c0_171] : memref<4x9x9x4xf32, #tpu.memory_space<vmem>>, vector<1x8x8x4xf32>
    %125 = vector.shape_cast %124 : vector<1x8x8x4xf32> to vector<8x8x4xf32>
    %126 = vector.shape_cast %125 : vector<8x8x4xf32> to vector<64x4xf32>
    %c2_172 = arith.constant 2 : index
    %c1_173 = arith.constant 1 : index
    %c1_174 = arith.constant 1 : index
    %c0_175 = arith.constant 0 : index
    %127 = vector.load %arg7[%c2_172, %c1_173, %c1_174, %c0_175] : memref<4x9x9x4xf32, #tpu.memory_space<vmem>>, vector<1x8x8x4xf32>
    %128 = vector.shape_cast %127 : vector<1x8x8x4xf32> to vector<8x8x4xf32>
    %129 = vector.shape_cast %128 : vector<8x8x4xf32> to vector<64x4xf32>
    %c3_176 = arith.constant 3 : index
    %c1_177 = arith.constant 1 : index
    %c1_178 = arith.constant 1 : index
    %c0_179 = arith.constant 0 : index
    %130 = vector.load %arg7[%c3_176, %c1_177, %c1_178, %c0_179] : memref<4x9x9x4xf32, #tpu.memory_space<vmem>>, vector<1x8x8x4xf32>
    %131 = vector.shape_cast %130 : vector<1x8x8x4xf32> to vector<8x8x4xf32>
    %132 = vector.shape_cast %131 : vector<8x8x4xf32> to vector<64x4xf32>
    %133 = tpu.concatenate %108, %111, %114, %117, %120, %123, %126, %129, %132 in 1 : vector<64x4xf32>, vector<64x4xf32>, vector<64x4xf32>, vector<64x4xf32>, vector<64x4xf32>, vector<64x4xf32>, vector<64x4xf32>, vector<64x4xf32>, vector<64x4xf32> -> vector<64x36xf32>
    %134 = tpu.concatenate %49, %77, %105, %133 in 0 : vector<64x36xf32>, vector<64x36xf32>, vector<64x36xf32>, vector<64x36xf32> -> vector<256x36xf32>
    %c0_180 = arith.constant 0 : index
    %c0_181 = arith.constant 0 : index
    %135 = vector.load %arg2[%c0_180, %c0_181] : memref<36x4xf32, #tpu.memory_space<vmem>>, vector<36x4xf32>
    %cst_182 = arith.constant dense<0.000000e+00> : vector<256x4xf32>
    %136 = tpu.matmul %134, %135, %cst_182 {dimension_numbers = #tpu.dot_dimension_numbers<[1], [0], [0], [1], [0, 0, 1, 1], [], []>} : vector<256x36xf32>, vector<36x4xf32>, vector<256x4xf32> -> vector<256x4xf32>
    %c0_183 = arith.constant 0 : index
    %c0_184 = arith.constant 0 : index
    %137 = vector.load %arg3[%c0_183, %c0_184] : memref<1x4xf32, #tpu.memory_space<vmem>>, vector<1x4xf32>
    %138 = vector.broadcast %137 : vector<1x4xf32> to vector<256x4xf32>
    %139 = arith.addf %136, %138 : vector<256x4xf32>
    %cst_185 = arith.constant 2.000000e-01 : f32
    %140 = vector.broadcast %cst_185 : f32 to vector<256x4xf32>
    %141 = arith.mulf %140, %139 : vector<256x4xf32>
    %142 = arith.maximumf %139, %141 : vector<256x4xf32>
    %cst_186 = arith.constant 0.000000e+00 : f32
    %143 = vector.broadcast %cst_186 : f32 to vector<4x10x10x4xf32>
    %c0_187 = arith.constant 0 : index
    %c0_188 = arith.constant 0 : index
    %c0_189 = arith.constant 0 : index
    %c0_190 = arith.constant 0 : index
    %144 = vector.load %arg8[%c0_187, %c0_188, %c0_189, %c0_190] : memref<4x10x10x4xf32, #tpu.memory_space<vmem>>, vector<4x10x10x4xf32>
    tpu.vector_store %arg8[%c0_187, %c0_188, %c0_189, %c0_190], %143 {strides = array<i32>} : memref<4x10x10x4xf32, #tpu.memory_space<vmem>>, vector<4x10x10x4xf32>,
    %145 = vector.extract_strided_slice %142 {offsets = [0, 0], sizes = [64, 4], strides = [1, 1]} : vector<256x4xf32> to vector<64x4xf32>
    %146 = vector.shape_cast %145 : vector<64x4xf32> to vector<8x8x4xf32>
    %c0_191 = arith.constant 0 : index
    %c1_192 = arith.constant 1 : index
    %c1_193 = arith.constant 1 : index
    %c0_194 = arith.constant 0 : index
    %147 = vector.load %arg8[%c0_191, %c1_192, %c1_193, %c0_194] : memref<4x10x10x4xf32, #tpu.memory_space<vmem>>, vector<1x8x8x4xf32>
    %148 = vector.shape_cast %147 : vector<1x8x8x4xf32> to vector<8x8x4xf32>
    %149 = vector.shape_cast %146 : vector<8x8x4xf32> to vector<1x8x8x4xf32>
    tpu.vector_store %arg8[%c0_191, %c1_192, %c1_193, %c0_194], %149 {strides = array<i32>} : memref<4x10x10x4xf32, #tpu.memory_space<vmem>>, vector<1x8x8x4xf32>,
    %150 = vector.extract_strided_slice %142 {offsets = [64, 0], sizes = [64, 4], strides = [1, 1]} : vector<256x4xf32> to vector<64x4xf32>
    %151 = vector.shape_cast %150 : vector<64x4xf32> to vector<8x8x4xf32>
    %c1_195 = arith.constant 1 : index
    %c1_196 = arith.constant 1 : index
    %c1_197 = arith.constant 1 : index
    %c0_198 = arith.constant 0 : index
    %152 = vector.load %arg8[%c1_195, %c1_196, %c1_197, %c0_198] : memref<4x10x10x4xf32, #tpu.memory_space<vmem>>, vector<1x8x8x4xf32>
    %153 = vector.shape_cast %152 : vector<1x8x8x4xf32> to vector<8x8x4xf32>
    %154 = vector.shape_cast %151 : vector<8x8x4xf32> to vector<1x8x8x4xf32>
    tpu.vector_store %arg8[%c1_195, %c1_196, %c1_197, %c0_198], %154 {strides = array<i32>} : memref<4x10x10x4xf32, #tpu.memory_space<vmem>>, vector<1x8x8x4xf32>,
    %155 = vector.extract_strided_slice %142 {offsets = [128, 0], sizes = [64, 4], strides = [1, 1]} : vector<256x4xf32> to vector<64x4xf32>
    %156 = vector.shape_cast %155 : vector<64x4xf32> to vector<8x8x4xf32>
    %c2_199 = arith.constant 2 : index
    %c1_200 = arith.constant 1 : index
    %c1_201 = arith.constant 1 : index
    %c0_202 = arith.constant 0 : index
    %157 = vector.load %arg8[%c2_199, %c1_200, %c1_201, %c0_202] : memref<4x10x10x4xf32, #tpu.memory_space<vmem>>, vector<1x8x8x4xf32>
    %158 = vector.shape_cast %157 : vector<1x8x8x4xf32> to vector<8x8x4xf32>
    %159 = vector.shape_cast %156 : vector<8x8x4xf32> to vector<1x8x8x4xf32>
    tpu.vector_store %arg8[%c2_199, %c1_200, %c1_201, %c0_202], %159 {strides = array<i32>} : memref<4x10x10x4xf32, #tpu.memory_space<vmem>>, vector<1x8x8x4xf32>,
    %160 = vector.extract_strided_slice %142 {offsets = [192, 0], sizes = [64, 4], strides = [1, 1]} : vector<256x4xf32> to vector<64x4xf32>
    %161 = vector.shape_cast %160 : vector<64x4xf32> to vector<8x8x4xf32>
    %c3_203 = arith.constant 3 : index
    %c1_204 = arith.constant 1 : index
    %c1_205 = arith.constant 1 : index
    %c0_206 = arith.constant 0 : index
    %162 = vector.load %arg8[%c3_203, %c1_204, %c1_205, %c0_206] : memref<4x10x10x4xf32, #tpu.memory_space<vmem>>, vector<1x8x8x4xf32>
    %163 = vector.shape_cast %162 : vector<1x8x8x4xf32> to vector<8x8x4xf32>
    %164 = vector.shape_cast %161 : vector<8x8x4xf32> to vector<1x8x8x4xf32>
    tpu.vector_store %arg8[%c3_203, %c1_204, %c1_205, %c0_206], %164 {strides = array<i32>} : memref<4x10x10x4xf32, #tpu.memory_space<vmem>>, vector<1x8x8x4xf32>,
    %c0_207 = arith.constant 0 : index
    %c0_208 = arith.constant 0 : index
    %c0_209 = arith.constant 0 : index
    %c0_210 = arith.constant 0 : index
    %165 = vector.load %arg8[%c0_207, %c0_208, %c0_209, %c0_210] : memref<4x10x10x4xf32, #tpu.memory_space<vmem>>, vector<1x8x8x4xf32>
    %166 = vector.shape_cast %165 : vector<1x8x8x4xf32> to vector<8x8x4xf32>
    %167 = vector.shape_cast %166 : vector<8x8x4xf32> to vector<64x4xf32>
    %c1_211 = arith.constant 1 : index
    %c0_212 = arith.constant 0 : index
    %c0_213 = arith.constant 0 : index
    %c0_214 = arith.constant 0 : index
    %168 = vector.load %arg8[%c1_211, %c0_212, %c0_213, %c0_214] : memref<4x10x10x4xf32, #tpu.memory_space<vmem>>, vector<1x8x8x4xf32>
    %169 = vector.shape_cast %168 : vector<1x8x8x4xf32> to vector<8x8x4xf32>
    %170 = vector.shape_cast %169 : vector<8x8x4xf32> to vector<64x4xf32>
    %c0_215 = arith.constant 0 : index
    %c0_216 = arith.constant 0 : index
    %c1_217 = arith.constant 1 : index
    %c0_218 = arith.constant 0 : index
    %171 = vector.load %arg8[%c0_215, %c0_216, %c1_217, %c0_218] : memref<4x10x10x4xf32, #tpu.memory_space<vmem>>, vector<1x8x8x4xf32>
    %172 = vector.shape_cast %171 : vector<1x8x8x4xf32> to vector<8x8x4xf32>
    %173 = vector.shape_cast %172 : vector<8x8x4xf32> to vector<64x4xf32>
    %c1_219 = arith.constant 1 : index
    %c0_220 = arith.constant 0 : index
    %c1_221 = arith.constant 1 : index
    %c0_222 = arith.constant 0 : index
    %174 = vector.load %arg8[%c1_219, %c0_220, %c1_221, %c0_222] : memref<4x10x10x4xf32, #tpu.memory_space<vmem>>, vector<1x8x8x4xf32>
    %175 = vector.shape_cast %174 : vector<1x8x8x4xf32> to vector<8x8x4xf32>
    %176 = vector.shape_cast %175 : vector<8x8x4xf32> to vector<64x4xf32>
    %c0_223 = arith.constant 0 : index
    %c0_224 = arith.constant 0 : index
    %c2_225 = arith.constant 2 : index
    %c0_226 = arith.constant 0 : index
    %177 = vector.load %arg8[%c0_223, %c0_224, %c2_225, %c0_226] : memref<4x10x10x4xf32, #tpu.memory_space<vmem>>, vector<1x8x8x4xf32>
    %178 = vector.shape_cast %177 : vector<1x8x8x4xf32> to vector<8x8x4xf32>
    %179 = vector.shape_cast %178 : vector<8x8x4xf32> to vector<64x4xf32>
    %c1_227 = arith.constant 1 : index
    %c0_228 = arith.constant 0 : index
    %c2_229 = arith.constant 2 : index
    %c0_230 = arith.constant 0 : index
    %180 = vector.load %arg8[%c1_227, %c0_228, %c2_229, %c0_230] : memref<4x10x10x4xf32, #tpu.memory_space<vmem>>, vector<1x8x8x4xf32>
    %181 = vector.shape_cast %180 : vector<1x8x8x4xf32> to vector<8x8x4xf32>
    %182 = vector.shape_cast %181 : vector<8x8x4xf32> to vector<64x4xf32>
    %c2_231 = arith.constant 2 : index
    %c0_232 = arith.constant 0 : index
    %c0_233 = arith.constant 0 : index
    %c0_234 = arith.constant 0 : index
    %183 = vector.load %arg8[%c2_231, %c0_232, %c0_233, %c0_234] : memref<4x10x10x4xf32, #tpu.memory_space<vmem>>, vector<1x8x8x4xf32>
    %184 = vector.shape_cast %183 : vector<1x8x8x4xf32> to vector<8x8x4xf32>
    %185 = vector.shape_cast %184 : vector<8x8x4xf32> to vector<64x4xf32>
    %c3_235 = arith.constant 3 : index
    %c0_236 = arith.constant 0 : index
    %c0_237 = arith.constant 0 : index
    %c0_238 = arith.constant 0 : index
    %186 = vector.load %arg8[%c3_235, %c0_236, %c0_237, %c0_238] : memref<4x10x10x4xf32, #tpu.memory_space<vmem>>, vector<1x8x8x4xf32>
    %187 = vector.shape_cast %186 : vector<1x8x8x4xf32> to vector<8x8x4xf32>
    %188 = vector.shape_cast %187 : vector<8x8x4xf32> to vector<64x4xf32>
    %c2_239 = arith.constant 2 : index
    %c0_240 = arith.constant 0 : index
    %c1_241 = arith.constant 1 : index
    %c0_242 = arith.constant 0 : index
    %189 = vector.load %arg8[%c2_239, %c0_240, %c1_241, %c0_242] : memref<4x10x10x4xf32, #tpu.memory_space<vmem>>, vector<1x8x8x4xf32>
    %190 = vector.shape_cast %189 : vector<1x8x8x4xf32> to vector<8x8x4xf32>
    %191 = vector.shape_cast %190 : vector<8x8x4xf32> to vector<64x4xf32>
    %c3_243 = arith.constant 3 : index
    %c0_244 = arith.constant 0 : index
    %c1_245 = arith.constant 1 : index
    %c0_246 = arith.constant 0 : index
    %192 = vector.load %arg8[%c3_243, %c0_244, %c1_245, %c0_246] : memref<4x10x10x4xf32, #tpu.memory_space<vmem>>, vector<1x8x8x4xf32>
    %193 = vector.shape_cast %192 : vector<1x8x8x4xf32> to vector<8x8x4xf32>
    %194 = vector.shape_cast %193 : vector<8x8x4xf32> to vector<64x4xf32>
    %c2_247 = arith.constant 2 : index
    %c0_248 = arith.constant 0 : index
    %c2_249 = arith.constant 2 : index
    %c0_250 = arith.constant 0 : index
    %195 = vector.load %arg8[%c2_247, %c0_248, %c2_249, %c0_250] : memref<4x10x10x4xf32, #tpu.memory_space<vmem>>, vector<1x8x8x4xf32>
    %196 = vector.shape_cast %195 : vector<1x8x8x4xf32> to vector<8x8x4xf32>
    %197 = vector.shape_cast %196 : vector<8x8x4xf32> to vector<64x4xf32>
    %c3_251 = arith.constant 3 : index
    %c0_252 = arith.constant 0 : index
    %c2_253 = arith.constant 2 : index
    %c0_254 = arith.constant 0 : index
    %198 = vector.load %arg8[%c3_251, %c0_252, %c2_253, %c0_254] : memref<4x10x10x4xf32, #tpu.memory_space<vmem>>, vector<1x8x8x4xf32>
    %199 = vector.shape_cast %198 : vector<1x8x8x4xf32> to vector<8x8x4xf32>
    %200 = vector.shape_cast %199 : vector<8x8x4xf32> to vector<64x4xf32>
    %c0_255 = arith.constant 0 : index
    %c1_256 = arith.constant 1 : index
    %c0_257 = arith.constant 0 : index
    %c0_258 = arith.constant 0 : index
    %201 = vector.load %arg8[%c0_255, %c1_256, %c0_257, %c0_258] : memref<4x10x10x4xf32, #tpu.memory_space<vmem>>, vector<1x8x8x4xf32>
    %202 = vector.shape_cast %201 : vector<1x8x8x4xf32> to vector<8x8x4xf32>
    %203 = vector.shape_cast %202 : vector<8x8x4xf32> to vector<64x4xf32>
    %c1_259 = arith.constant 1 : index
    %c1_260 = arith.constant 1 : index
    %c0_261 = arith.constant 0 : index
    %c0_262 = arith.constant 0 : index
    %204 = vector.load %arg8[%c1_259, %c1_260, %c0_261, %c0_262] : memref<4x10x10x4xf32, #tpu.memory_space<vmem>>, vector<1x8x8x4xf32>
    %205 = vector.shape_cast %204 : vector<1x8x8x4xf32> to vector<8x8x4xf32>
    %206 = vector.shape_cast %205 : vector<8x8x4xf32> to vector<64x4xf32>
    %c0_263 = arith.constant 0 : index
    %c1_264 = arith.constant 1 : index
    %c1_265 = arith.constant 1 : index
    %c0_266 = arith.constant 0 : index
    %207 = vector.load %arg8[%c0_263, %c1_264, %c1_265, %c0_266] : memref<4x10x10x4xf32, #tpu.memory_space<vmem>>, vector<1x8x8x4xf32>
    %208 = vector.shape_cast %207 : vector<1x8x8x4xf32> to vector<8x8x4xf32>
    %209 = vector.shape_cast %208 : vector<8x8x4xf32> to vector<64x4xf32>
    %c1_267 = arith.constant 1 : index
    %c1_268 = arith.constant 1 : index
    %c1_269 = arith.constant 1 : index
    %c0_270 = arith.constant 0 : index
    %210 = vector.load %arg8[%c1_267, %c1_268, %c1_269, %c0_270] : memref<4x10x10x4xf32, #tpu.memory_space<vmem>>, vector<1x8x8x4xf32>
    %211 = vector.shape_cast %210 : vector<1x8x8x4xf32> to vector<8x8x4xf32>
    %212 = vector.shape_cast %211 : vector<8x8x4xf32> to vector<64x4xf32>
    %c0_271 = arith.constant 0 : index
    %c1_272 = arith.constant 1 : index
    %c2_273 = arith.constant 2 : index
    %c0_274 = arith.constant 0 : index
    %213 = vector.load %arg8[%c0_271, %c1_272, %c2_273, %c0_274] : memref<4x10x10x4xf32, #tpu.memory_space<vmem>>, vector<1x8x8x4xf32>
    %214 = vector.shape_cast %213 : vector<1x8x8x4xf32> to vector<8x8x4xf32>
    %215 = vector.shape_cast %214 : vector<8x8x4xf32> to vector<64x4xf32>
    %c1_275 = arith.constant 1 : index
    %c1_276 = arith.constant 1 : index
    %c2_277 = arith.constant 2 : index
    %c0_278 = arith.constant 0 : index
    %216 = vector.load %arg8[%c1_275, %c1_276, %c2_277, %c0_278] : memref<4x10x10x4xf32, #tpu.memory_space<vmem>>, vector<1x8x8x4xf32>
    %217 = vector.shape_cast %216 : vector<1x8x8x4xf32> to vector<8x8x4xf32>
    %218 = vector.shape_cast %217 : vector<8x8x4xf32> to vector<64x4xf32>
    %c2_279 = arith.constant 2 : index
    %c1_280 = arith.constant 1 : index
    %c0_281 = arith.constant 0 : index
    %c0_282 = arith.constant 0 : index
    %219 = vector.load %arg8[%c2_279, %c1_280, %c0_281, %c0_282] : memref<4x10x10x4xf32, #tpu.memory_space<vmem>>, vector<1x8x8x4xf32>
    %220 = vector.shape_cast %219 : vector<1x8x8x4xf32> to vector<8x8x4xf32>
    %221 = vector.shape_cast %220 : vector<8x8x4xf32> to vector<64x4xf32>
    %c3_283 = arith.constant 3 : index
    %c1_284 = arith.constant 1 : index
    %c0_285 = arith.constant 0 : index
    %c0_286 = arith.constant 0 : index
    %222 = vector.load %arg8[%c3_283, %c1_284, %c0_285, %c0_286] : memref<4x10x10x4xf32, #tpu.memory_space<vmem>>, vector<1x8x8x4xf32>
    %223 = vector.shape_cast %222 : vector<1x8x8x4xf32> to vector<8x8x4xf32>
    %224 = vector.shape_cast %223 : vector<8x8x4xf32> to vector<64x4xf32>
    %c2_287 = arith.constant 2 : index
    %c1_288 = arith.constant 1 : index
    %c1_289 = arith.constant 1 : index
    %c0_290 = arith.constant 0 : index
    %225 = vector.load %arg8[%c2_287, %c1_288, %c1_289, %c0_290] : memref<4x10x10x4xf32, #tpu.memory_space<vmem>>, vector<1x8x8x4xf32>
    %226 = vector.shape_cast %225 : vector<1x8x8x4xf32> to vector<8x8x4xf32>
    %227 = vector.shape_cast %226 : vector<8x8x4xf32> to vector<64x4xf32>
    %c3_291 = arith.constant 3 : index
    %c1_292 = arith.constant 1 : index
    %c1_293 = arith.constant 1 : index
    %c0_294 = arith.constant 0 : index
    %228 = vector.load %arg8[%c3_291, %c1_292, %c1_293, %c0_294] : memref<4x10x10x4xf32, #tpu.memory_space<vmem>>, vector<1x8x8x4xf32>
    %229 = vector.shape_cast %228 : vector<1x8x8x4xf32> to vector<8x8x4xf32>
    %230 = vector.shape_cast %229 : vector<8x8x4xf32> to vector<64x4xf32>
    %c2_295 = arith.constant 2 : index
    %c1_296 = arith.constant 1 : index
    %c2_297 = arith.constant 2 : index
    %c0_298 = arith.constant 0 : index
    %231 = vector.load %arg8[%c2_295, %c1_296, %c2_297, %c0_298] : memref<4x10x10x4xf32, #tpu.memory_space<vmem>>, vector<1x8x8x4xf32>
    %232 = vector.shape_cast %231 : vector<1x8x8x4xf32> to vector<8x8x4xf32>
    %233 = vector.shape_cast %232 : vector<8x8x4xf32> to vector<64x4xf32>
    %c3_299 = arith.constant 3 : index
    %c1_300 = arith.constant 1 : index
    %c2_301 = arith.constant 2 : index
    %c0_302 = arith.constant 0 : index
    %234 = vector.load %arg8[%c3_299, %c1_300, %c2_301, %c0_302] : memref<4x10x10x4xf32, #tpu.memory_space<vmem>>, vector<1x8x8x4xf32>
    %235 = vector.shape_cast %234 : vector<1x8x8x4xf32> to vector<8x8x4xf32>
    %236 = vector.shape_cast %235 : vector<8x8x4xf32> to vector<64x4xf32>
    %c0_303 = arith.constant 0 : index
    %c2_304 = arith.constant 2 : index
    %c0_305 = arith.constant 0 : index
    %c0_306 = arith.constant 0 : index
    %237 = vector.load %arg8[%c0_303, %c2_304, %c0_305, %c0_306] : memref<4x10x10x4xf32, #tpu.memory_space<vmem>>, vector<1x8x8x4xf32>
    %238 = vector.shape_cast %237 : vector<1x8x8x4xf32> to vector<8x8x4xf32>
    %239 = vector.shape_cast %238 : vector<8x8x4xf32> to vector<64x4xf32>
    %c1_307 = arith.constant 1 : index
    %c2_308 = arith.constant 2 : index
    %c0_309 = arith.constant 0 : index
    %c0_310 = arith.constant 0 : index
    %240 = vector.load %arg8[%c1_307, %c2_308, %c0_309, %c0_310] : memref<4x10x10x4xf32, #tpu.memory_space<vmem>>, vector<1x8x8x4xf32>
    %241 = vector.shape_cast %240 : vector<1x8x8x4xf32> to vector<8x8x4xf32>
    %242 = vector.shape_cast %241 : vector<8x8x4xf32> to vector<64x4xf32>
    %c0_311 = arith.constant 0 : index
    %c2_312 = arith.constant 2 : index
    %c1_313 = arith.constant 1 : index
    %c0_314 = arith.constant 0 : index
    %243 = vector.load %arg8[%c0_311, %c2_312, %c1_313, %c0_314] : memref<4x10x10x4xf32, #tpu.memory_space<vmem>>, vector<1x8x8x4xf32>
    %244 = vector.shape_cast %243 : vector<1x8x8x4xf32> to vector<8x8x4xf32>
    %245 = vector.shape_cast %244 : vector<8x8x4xf32> to vector<64x4xf32>
    %c1_315 = arith.constant 1 : index
    %c2_316 = arith.constant 2 : index
    %c1_317 = arith.constant 1 : index
    %c0_318 = arith.constant 0 : index
    %246 = vector.load %arg8[%c1_315, %c2_316, %c1_317, %c0_318] : memref<4x10x10x4xf32, #tpu.memory_space<vmem>>, vector<1x8x8x4xf32>
    %247 = vector.shape_cast %246 : vector<1x8x8x4xf32> to vector<8x8x4xf32>
    %248 = vector.shape_cast %247 : vector<8x8x4xf32> to vector<64x4xf32>
    %c0_319 = arith.constant 0 : index
    %c2_320 = arith.constant 2 : index
    %c2_321 = arith.constant 2 : index
    %c0_322 = arith.constant 0 : index
    %249 = vector.load %arg8[%c0_319, %c2_320, %c2_321, %c0_322] : memref<4x10x10x4xf32, #tpu.memory_space<vmem>>, vector<1x8x8x4xf32>
    %250 = vector.shape_cast %249 : vector<1x8x8x4xf32> to vector<8x8x4xf32>
    %251 = vector.shape_cast %250 : vector<8x8x4xf32> to vector<64x4xf32>
    %c1_323 = arith.constant 1 : index
    %c2_324 = arith.constant 2 : index
    %c2_325 = arith.constant 2 : index
    %c0_326 = arith.constant 0 : index
    %252 = vector.load %arg8[%c1_323, %c2_324, %c2_325, %c0_326] : memref<4x10x10x4xf32, #tpu.memory_space<vmem>>, vector<1x8x8x4xf32>
    %253 = vector.shape_cast %252 : vector<1x8x8x4xf32> to vector<8x8x4xf32>
    %254 = vector.shape_cast %253 : vector<8x8x4xf32> to vector<64x4xf32>
    %c2_327 = arith.constant 2 : index
    %c2_328 = arith.constant 2 : index
    %c0_329 = arith.constant 0 : index
    %c0_330 = arith.constant 0 : index
    %255 = vector.load %arg8[%c2_327, %c2_328, %c0_329, %c0_330] : memref<4x10x10x4xf32, #tpu.memory_space<vmem>>, vector<1x8x8x4xf32>
    %256 = vector.shape_cast %255 : vector<1x8x8x4xf32> to vector<8x8x4xf32>
    %257 = vector.shape_cast %256 : vector<8x8x4xf32> to vector<64x4xf32>
    %c3_331 = arith.constant 3 : index
    %c2_332 = arith.constant 2 : index
    %c0_333 = arith.constant 0 : index
    %c0_334 = arith.constant 0 : index
    %258 = vector.load %arg8[%c3_331, %c2_332, %c0_333, %c0_334] : memref<4x10x10x4xf32, #tpu.memory_space<vmem>>, vector<1x8x8x4xf32>
    %259 = vector.shape_cast %258 : vector<1x8x8x4xf32> to vector<8x8x4xf32>
    %260 = vector.shape_cast %259 : vector<8x8x4xf32> to vector<64x4xf32>
    %c2_335 = arith.constant 2 : index
    %c2_336 = arith.constant 2 : index
    %c1_337 = arith.constant 1 : index
    %c0_338 = arith.constant 0 : index
    %261 = vector.load %arg8[%c2_335, %c2_336, %c1_337, %c0_338] : memref<4x10x10x4xf32, #tpu.memory_space<vmem>>, vector<1x8x8x4xf32>
    %262 = vector.shape_cast %261 : vector<1x8x8x4xf32> to vector<8x8x4xf32>
    %263 = vector.shape_cast %262 : vector<8x8x4xf32> to vector<64x4xf32>
    %c3_339 = arith.constant 3 : index
    %c2_340 = arith.constant 2 : index
    %c1_341 = arith.constant 1 : index
    %c0_342 = arith.constant 0 : index
    %264 = vector.load %arg8[%c3_339, %c2_340, %c1_341, %c0_342] : memref<4x10x10x4xf32, #tpu.memory_space<vmem>>, vector<1x8x8x4xf32>
    %265 = vector.shape_cast %264 : vector<1x8x8x4xf32> to vector<8x8x4xf32>
    %266 = vector.shape_cast %265 : vector<8x8x4xf32> to vector<64x4xf32>
    %c2_343 = arith.constant 2 : index
    %c2_344 = arith.constant 2 : index
    %c2_345 = arith.constant 2 : index
    %c0_346 = arith.constant 0 : index
    %267 = vector.load %arg8[%c2_343, %c2_344, %c2_345, %c0_346] : memref<4x10x10x4xf32, #tpu.memory_space<vmem>>, vector<1x8x8x4xf32>
    %268 = vector.shape_cast %267 : vector<1x8x8x4xf32> to vector<8x8x4xf32>
    %269 = vector.shape_cast %268 : vector<8x8x4xf32> to vector<64x4xf32>
    %c3_347 = arith.constant 3 : index
    %c2_348 = arith.constant 2 : index
    %c2_349 = arith.constant 2 : index
    %c0_350 = arith.constant 0 : index
    %270 = vector.load %arg8[%c3_347, %c2_348, %c2_349, %c0_350] : memref<4x10x10x4xf32, #tpu.memory_space<vmem>>, vector<1x8x8x4xf32>
    %271 = vector.shape_cast %270 : vector<1x8x8x4xf32> to vector<8x8x4xf32>
    %272 = vector.shape_cast %271 : vector<8x8x4xf32> to vector<64x4xf32>
    %273 = tpu.concatenate %167, %170, %173, %176, %179, %182, %185, %188, %191, %194, %197, %200, %203, %206, %209, %212 in 1 : vector<64x4xf32>, vector<64x4xf32>, vector<64x4xf32>, vector<64x4xf32>, vector<64x4xf32>, vector<64x4xf32>, vector<64x4xf32>, vector<64x4xf32>, vector<64x4xf32>, vector<64x4xf32>, vector<64x4xf32>, vector<64x4xf32>, vector<64x4xf32>, vector<64x4xf32>, vector<64x4xf32>, vector<64x4xf32> -> vector<64x64xf32>
    %274 = tpu.concatenate %215, %218, %221, %224, %227, %230, %233, %236, %239, %242, %245, %248, %251, %254, %257, %260 in 1 : vector<64x4xf32>, vector<64x4xf32>, vector<64x4xf32>, vector<64x4xf32>, vector<64x4xf32>, vector<64x4xf32>, vector<64x4xf32>, vector<64x4xf32>, vector<64x4xf32>, vector<64x4xf32>, vector<64x4xf32>, vector<64x4xf32>, vector<64x4xf32>, vector<64x4xf32>, vector<64x4xf32>, vector<64x4xf32> -> vector<64x64xf32>
    %275 = tpu.concatenate %263, %266, %269, %272 in 1 : vector<64x4xf32>, vector<64x4xf32>, vector<64x4xf32>, vector<64x4xf32> -> vector<64x16xf32>
    %276 = tpu.concatenate %273, %274, %275 in 1 : vector<64x64xf32>, vector<64x64xf32>, vector<64x16xf32> -> vector<64x144xf32>
    %c0_351 = arith.constant 0 : index
    %c0_352 = arith.constant 0 : index
    %277 = vector.load %arg4[%c0_351, %c0_352] : memref<144x8xf32, #tpu.memory_space<vmem>>, vector<144x8xf32>
    %cst_353 = arith.constant dense<0.000000e+00> : vector<64x8xf32>
    %278 = tpu.matmul %276, %277, %cst_353 {dimension_numbers = #tpu.dot_dimension_numbers<[1], [0], [0], [1], [0, 0, 1, 1], [], []>} : vector<64x144xf32>, vector<144x8xf32>, vector<64x8xf32> -> vector<64x8xf32>
    %c0_354 = arith.constant 0 : index
    %c0_355 = arith.constant 0 : index
    %279 = vector.load %arg5[%c0_354, %c0_355] : memref<1x8xf32, #tpu.memory_space<vmem>>, vector<1x8xf32>
    %280 = vector.broadcast %279 : vector<1x8xf32> to vector<64x8xf32>
    %281 = arith.addf %278, %280 : vector<64x8xf32>
    %cst_356 = arith.constant 2.000000e-01 : f32
    %282 = vector.broadcast %cst_356 : f32 to vector<64x8xf32>
    %283 = arith.mulf %282, %281 : vector<64x8xf32>
    %284 = arith.maximumf %281, %283 : vector<64x8xf32>
    %285 = vector.shape_cast %284 : vector<64x8xf32> to vector<1x8x8x8xf32>
    %c0_357 = arith.constant 0 : index
    %c0_358 = arith.constant 0 : index
    %c0_359 = arith.constant 0 : index
    %c0_360 = arith.constant 0 : index
    %286 = vector.load %arg6[%c0_357, %c0_358, %c0_359, %c0_360] : memref<1x8x8x8xf32, #tpu.memory_space<vmem>>, vector<1x8x8x8xf32>
    tpu.vector_store %arg6[%c0_357, %c0_358, %c0_359, %c0_360], %285 {strides = array<i32>} : memref<1x8x8x8xf32, #tpu.memory_space<vmem>>, vector<1x8x8x8xf32>,
    return
  }
  func.func @transform_0(%arg0: i32) -> (i32, i32, i32, i32, i32) {
    %c0_i32 = arith.constant 0 : i32
    %c0_i32_0 = arith.constant 0 : i32
    %c0_i32_1 = arith.constant 0 : i32
    %c0_i32_2 = arith.constant 0 : i32
    %c0_i32_3 = arith.constant 0 : i32
    return %arg0, %c0_i32, %c0_i32_0, %c0_i32_1, %c0_i32_2 : i32, i32, i32, i32, i32
  }
  func.func @transform_1(%arg0: i32) -> (i32, i32) {
    %c0_i32 = arith.constant 0 : i32
    %c0_i32_0 = arith.constant 0 : i32
    %c0_i32_1 = arith.constant 0 : i32
    return %c0_i32, %c0_i32_0 : i32, i32
  }
  func.func @transform_2(%arg0: i32) -> (i32, i32) {
    %c0_i32 = arith.constant 0 : i32
    %c0_i32_0 = arith.constant 0 : i32
    %c0_i32_1 = arith.constant 0 : i32
    return %c0_i32, %c0_i32_0 : i32, i32
  }
  func.func @transform_3(%arg0: i32) -> (i32, i32) {
    %c0_i32 = arith.constant 0 : i32
    %c0_i32_0 = arith.constant 0 : i32
    %c0_i32_1 = arith.constant 0 : i32
    return %c0_i32, %c0_i32_0 : i32, i32
  }
  func.func @transform_4(%arg0: i32) -> (i32, i32) {
    %c0_i32 = arith.constant 0 : i32
    %c0_i32_0 = arith.constant 0 : i32
    %c0_i32_1 = arith.constant 0 : i32
    return %c0_i32, %c0_i32_0 : i32, i32
  }
  func.func @transform_5(%arg0: i32) -> (i32, i32, i32, i32) {
    %c0_i32 = arith.constant 0 : i32
    %c0_i32_0 = arith.constant 0 : i32
    %c0_i32_1 = arith.constant 0 : i32
    %c0_i32_2 = arith.constant 0 : i32
    return %arg0, %c0_i32, %c0_i32_0, %c0_i32_1 : i32, i32, i32, i32
  }
}

</mosaic_0001>

<bundles_post_ra>
// kernel: conv_block_forward.1
= control target key start
LH: loop header
LB: loop body
LE: loop exit
PB: predicated region body
PF: predicated region fallthrough
CT: control target
= control target key end

     0   :  { %s4765_s18 = smov 0   ;;  %s8039_s0 = inlined_call_operand.vmem [shape: f32[2,4,8,8,4], index: 0, kind: input, shape index: {}]   ;;  %s8040_s1 = inlined_call_operand.vmem [shape: f32[36,4], index: 1, kind: input, shape index: {}]   ;;  %s8041_s2 = inlined_call_operand.vmem [shape: f32[1,4], index: 2, kind: input, shape index: {}]   ;;  %s8042_s3 = inlined_call_operand.vmem [shape: f32[144,8], index: 3, kind: input, shape index: {}]   ;;  %s8043_s4 = inlined_call_operand.vmem [shape: f32[1,8], index: 4, kind: input, shape index: {}]   ;;  %s8044_s5 = inlined_call_operand.vmem [shape: f32[2,8,8,8], index: 5, kind: output, shape index: {}]  }
   0x1 LB: > { %s3925_s19 = sadd.s32 4294967295, %s4716_s18   ;;  %p3929_p0 = scmp.ge.s32.totalorder %s4716_s18, 1  ;;  %s4716_s18 = sphi %s4765_s18, %s15_s18  }
   0x2   : > { %p187_p1 = scmp.lt.s32.totalorder %s4716_s18, 3 }
   0x4   : > { %p188_p2 = pnand %p3929_p0, %p187_p1 }
   0x6   : > { %191 = sbr.rel (%p188_p2) target bundleno = 1772 (0x6ec), region = 40 }
   0xb   : > { %vm225_vm0 = vcmask 31744   ;;  %v8045_v0 = vmov 0.0   ;;  %s4719_s20 = smov 4   ;;  %p215_p3 = scmp.lt.s32.totalorder %s3925_s19, 1  ;;  %vm227_vm1 = vcmask 24576   ;;  %vm1758_vm2 = vcmask 1043456  }
   0xc   : > { %245 = vst.msk [vmem:[#allocation2 + $0x90] sm:$0xff] %vm225_vm0, %v8045_v0  ;;  %s4720_s25 = smov 8   ;;  %s4721_s26 = smov 12   ;;  %vm707_vm3 = vcmask 64512   ;;  %vm716_vm4 = vcmask 97280   ;;  %vm725_vm5 = vcmask 130048  }
   0xd   : > { %226 = vst.msk [vmem:[#allocation2] sm:$0xff] %vm225_vm0, %v8045_v0  ;;  %s8436_s19 = smov (!%p215_p3, %s3925_s19), 1  ;;  %s4722_s27 = smov 16   ;;  %vm734_vm6 = vcmask 162816   ;;  %vm743_vm7 = vcmask 195584   ;;  %vm761_vm8 = vcmask 261120  }
   0xe   : > { %229 = vst.msk [vmem:[#allocation2 + $0x10] sm:$0xff] %vm225_vm0, %v8045_v0  ;;  %s4001_s21 = sshll.u32 %s8436_s19, 8  ;;  %s4723_s28 = smov 20   ;;  %vm752_vm9 = vcmask 228352   ;;  %vm1661_vm10 = vcmask 293888   ;;  %vm1940_vm11 = vcmask 25600  }
   0xf   : > { %231 = vst.msk [vmem:[#allocation2 + $0x20] sm:$0xff] %vm225_vm0, %v8045_v0  ;;  %s4926_s24 = scalar_lea.vmem %s8039_s0, %s4001_s21  ;;  %s4724_s29 = smov 24   ;;  %vm2903_vm12 = vcmask 326656   ;;  %vm2912_vm13 = vcmask 359424   ;;  %vm2921_vm14 = vcmask 392192   ;;  %vm2930_vm15 = vcmask 424960  }
  0x10   : > { %233 = vst.msk [vmem:[#allocation2 + $0x30] sm:$0xff] %vm225_vm0, %v8045_v0  ;;  %v3945_v2 = vld [vmem:[%s4926_s24 + $0x98] sm:$0xff]  ;;  %v3943_v3 = vld [vmem:[%s4926_s24 + $0x88] sm:$0xff]  ;;  %v3942_v4 = vld [vmem:[%s4926_s24 + $0x80] sm:$0xff]  ;;  %s4725_s30 = smov 28   ;;  %s4726_s6 = smov 32  }
  0x11   : > { %235 = vst.msk [vmem:[#allocation2 + $0x40] sm:$0xff] %vm225_vm0, %v8045_v0  ;;  %v3946_v5 = vld [vmem:[%s4926_s24 + $0xa0] sm:$0xff]  ;;  %v3944_v6 = vld [vmem:[%s4926_s24 + $0x90] sm:$0xff]  ;;  %v3947_v7 = vld [vmem:[%s4926_s24 + $0xa8] sm:$0xff]  ;;  %s4728_s7 = smov 40   ;;  %s4729_s8 = smov 44  }
  0x12   : > { %237 = vst.msk [vmem:[#allocation2 + $0x50] sm:$0xff] %vm225_vm0, %v8045_v0  ;;  %v3948_v15 = vld [vmem:[%s4926_s24 + $0xb0] sm:$0xff]  ;;  %v3934_v16 = vld [vmem:[%s4926_s24 + $0xc0] sm:$0xff]  ;;  %v3935_v18 = vld [vmem:[%s4926_s24 + $0xc8] sm:$0xff]  ;;  %s4730_s9 = smov 48   ;;  %s4731_s10 = smov 52  }
  0x13   : > { %v379_v1 = vld [vmem:[#allocation2 + $0x90] sm:$0xff]  ;;  %239 = vst.msk [vmem:[#allocation2 + $0x60] sm:$0xff] %vm225_vm0, %v8045_v0  ;;  %v3937_v19 = vld [vmem:[%s4926_s24 + $0xd8] sm:$0xff]  ;;  %v3939_v20 = vld [vmem:[%s4926_s24 + $0xe8] sm:$0xff]  ;;  %s4732_s11 = smov 56   ;;  %s4733_s12 = smov 60  }
  0x14   : > { %451 = vrot.lane.b32.xlu0 %v379_v1, %s4719_s20  ;;  %241 = vst.msk [vmem:[#allocation2 + $0x70] sm:$0xff] %vm225_vm0, %v8045_v0  ;;  %v3936_v17 = vld [vmem:[%s4926_s24 + $0xd0] sm:$0xff]  ;;  %v3938_v21 = vld [vmem:[%s4926_s24 + $0xe0] sm:$0xff]  ;;  %v3951_v23 = vld [vmem:[%s4926_s24 + $0x48] sm:$0xff] }
  0x15   : > { %243 = vst.msk [vmem:[#allocation2 + $0x80] sm:$0xff] %vm225_vm0, %v8045_v0  ;;  %v3940_v22 = vld [vmem:[%s4926_s24 + $0xf0] sm:$0xff]  ;;  %v3950_v24 = vld [vmem:[%s4926_s24 + $0x40] sm:$0xff]  ;;  %v3953_v30 = vld [vmem:[%s4926_s24 + $0x58] sm:$0xff] }
  0x16   : > { %247 = vst.msk [vmem:[#allocation2 + $0xa0] sm:$0xff] %vm225_vm0, %v8045_v0  ;;  %v3952_v26 = vld [vmem:[%s4926_s24 + $0x50] sm:$0xff]  ;;  %v3954_v28 = vld [vmem:[%s4926_s24 + $0x60] sm:$0xff]  ;;  %v3955_v31 = vld [vmem:[%s4926_s24 + $0x68] sm:$0xff] }
  0x17   : > { %249 = vst.msk [vmem:[#allocation2 + $0xb0] sm:$0xff] %vm225_vm0, %v8045_v0  ;;  %v3957_v32 = vld [vmem:[%s4926_s24 + $0x78] sm:$0xff]  ;;  %v3956_v33 = vld [vmem:[%s4926_s24 + $0x70] sm:$0xff]  ;;  %v353_v35 = vld [vmem:[%s4926_s24] sm:$0xff] }
  0x18   : > { %251 = vst.msk [vmem:[#allocation2 + $0xc0] sm:$0xff] %vm225_vm0, %v8045_v0  ;;  %v355_v38 = vld [vmem:[%s4926_s24 + $0x10] sm:$0xff]  ;;  %v354_v39 = vld [vmem:[%s4926_s24 + $0x8] sm:$0xff]  ;;  %v356_v40 = vld [vmem:[%s4926_s24 + $0x18] sm:$0xff] }
  0x19   : > { %253 = vst.msk [vmem:[#allocation2 + $0xd0] sm:$0xff] %vm225_vm0, %v8045_v0  ;;  %v358_v44 = vld [vmem:[%s4926_s24 + $0x28] sm:$0xff]  ;;  %v357_v45 = vld [vmem:[%s4926_s24 + $0x20] sm:$0xff]  ;;  %v359_v46 = vld [vmem:[%s4926_s24 + $0x30] sm:$0xff] }
  0x1a   : > { %255 = vst.msk [vmem:[#allocation2 + $0xe0] sm:$0xff] %vm225_vm0, %v8045_v0  ;;  %v360_v50 = vld [vmem:[%s4926_s24 + $0x38] sm:$0xff] }
  0x1b   : > { %257 = vst.msk [vmem:[#allocation2 + $0xf0] sm:$0xff] %vm225_vm0, %v8045_v0 }
  0x1c   : > { %259 = vst.msk [vmem:[#allocation2 + $0x100] sm:$0xff] %vm225_vm0, %v8045_v0 }
  0x1d   : > { %261 = vst.msk [vmem:[#allocation2 + $0x110] sm:$0xff] %vm225_vm0, %v8045_v0 }
  0x1e   : > { %263 = vst.msk [vmem:[#allocation2 + $0x120] sm:$0xff] %vm225_vm0, %v8045_v0 }
  0x1f   : > { %265 = vst.msk [vmem:[#allocation2 + $0x130] sm:$0xff] %vm225_vm0, %v8045_v0 }
  0x20   : > { %267 = vst.msk [vmem:[#allocation2 + $0x140] sm:$0xff] %vm225_vm0, %v8045_v0 }
  0x21   : > { %269 = vst.msk [vmem:[#allocation2 + $0x150] sm:$0xff] %vm225_vm0, %v8045_v0 }
  0x22   : > { %271 = vst.msk [vmem:[#allocation2 + $0x160] sm:$0xff] %vm225_vm0, %v8045_v0 }
  0x23   : > { %273 = vst.msk [vmem:[#allocation2 + $0x170] sm:$0xff] %vm225_vm0, %v8045_v0 }
  0x24   : > { %275 = vst.msk [vmem:[#allocation2 + $0x180] sm:$0xff] %vm225_vm0, %v8045_v0 }
  0x25   : > { %277 = vst.msk [vmem:[#allocation2 + $0x190] sm:$0xff] %vm225_vm0, %v8045_v0 }
  0x26   : > { %279 = vst.msk [vmem:[#allocation2 + $0x1a0] sm:$0xff] %vm225_vm0, %v8045_v0 }
  0x27   : > { %281 = vst.msk [vmem:[#allocation2 + $0x1b0] sm:$0xff] %vm225_vm0, %v8045_v0 }
  0x28   : > { %283 = vst.msk [vmem:[#allocation2 + $0x1c0] sm:$0xff] %vm225_vm0, %v8045_v0 }
  0x29   : > { %285 = vst.msk [vmem:[#allocation2 + $0x1d0] sm:$0xff] %vm225_vm0, %v8045_v0 }
  0x2a   : > { %287 = vst.msk [vmem:[#allocation2 + $0x1e0] sm:$0xff] %vm225_vm0, %v8045_v0 }
  0x2b   : > { %289 = vst.msk [vmem:[#allocation2 + $0x1f0] sm:$0xff] %vm225_vm0, %v8045_v0 }
  0x2c   : > { %291 = vst.msk [vmem:[#allocation2 + $0x200] sm:$0xff] %vm225_vm0, %v8045_v0 }
  0x2d   : > { %293 = vst.msk [vmem:[#allocation2 + $0x210] sm:$0xff] %vm225_vm0, %v8045_v0 }
  0x2e   : > { %295 = vst.msk [vmem:[#allocation2 + $0x220] sm:$0xff] %vm225_vm0, %v8045_v0 }
  0x2f   : > { %297 = vst.msk [vmem:[#allocation2 + $0x230] sm:$0xff] %vm225_vm0, %v8045_v0 }
  0x30   : > { %1939 = vst.msk [vmem:[#allocation3] sm:$0xff] %vm225_vm0, %v8045_v0 }
  0x31   : > { %1942 = vst.msk [vmem:[#allocation3 + $0x10] sm:$0xff] %vm225_vm0, %v8045_v0 }
  0x32   : > { %1944 = vst.msk [vmem:[#allocation3 + $0x20] sm:$0xff] %vm225_vm0, %v8045_v0 }
  0x33   : > { %1946 = vst.msk [vmem:[#allocation3 + $0x30] sm:$0xff] %vm225_vm0, %v8045_v0 }
  0x34   : > { %1948 = vst.msk [vmem:[#allocation3 + $0x40] sm:$0xff] %vm225_vm0, %v8045_v0 }
  0x35   : > { %1950 = vst.msk [vmem:[#allocation3 + $0x50] sm:$0xff] %vm225_vm0, %v8045_v0 }
  0x36   : > { %1952 = vst.msk [vmem:[#allocation3 + $0x60] sm:$0xff] %vm225_vm0, %v8045_v0 }
  0x37   : > { %1954 = vst.msk [vmem:[#allocation3 + $0x70] sm:$0xff] %vm225_vm0, %v8045_v0 }
  0x38   : > { %1956 = vst.msk [vmem:[#allocation3 + $0x80] sm:$0xff] %vm225_vm0, %v8045_v0 }
  0x39   : > { %1958 = vst.msk [vmem:[#allocation3 + $0x90] sm:$0xff] %vm225_vm0, %v8045_v0 }
  0x3a   : > { %1960 = vst.msk [vmem:[#allocation3 + $0xa0] sm:$0xff] %vm225_vm0, %v8045_v0 }
  0x3b   : > { %1962 = vst.msk [vmem:[#allocation3 + $0xb0] sm:$0xff] %vm225_vm0, %v8045_v0 }
  0x3c   : > { %1964 = vst.msk [vmem:[#allocation3 + $0xc0] sm:$0xff] %vm225_vm0, %v8045_v0 }
  0x3d   : > { %1966 = vst.msk [vmem:[#allocation3 + $0xd0] sm:$0xff] %vm225_vm0, %v8045_v0 }
  0x3e   : > { %1968 = vst.msk [vmem:[#allocation3 + $0xe0] sm:$0xff] %vm225_vm0, %v8045_v0 }
  0x3f   : > { %1970 = vst.msk [vmem:[#allocation3 + $0xf0] sm:$0xff] %vm225_vm0, %v8045_v0 }
  0x40   : > { %1972 = vst.msk [vmem:[#allocation3 + $0x100] sm:$0xff] %vm225_vm0, %v8045_v0 }
  0x41   : > { %1974 = vst.msk [vmem:[#allocation3 + $0x110] sm:$0xff] %vm225_vm0, %v8045_v0 }
  0x42   : > { %1976 = vst.msk [vmem:[#allocation3 + $0x120] sm:$0xff] %vm225_vm0, %v8045_v0 }
  0x43   : > { %1978 = vst.msk [vmem:[#allocation3 + $0x130] sm:$0xff] %vm225_vm0, %v8045_v0 }
  0x44   : > { %1980 = vst.msk [vmem:[#allocation3 + $0x140] sm:$0xff] %vm225_vm0, %v8045_v0 }
  0x45   : > { %1982 = vst.msk [vmem:[#allocation3 + $0x150] sm:$0xff] %vm225_vm0, %v8045_v0 }
  0x46   : > { %1984 = vst.msk [vmem:[#allocation3 + $0x160] sm:$0xff] %vm225_vm0, %v8045_v0 }
  0x47   : > { %1986 = vst.msk [vmem:[#allocation3 + $0x170] sm:$0xff] %vm225_vm0, %v8045_v0 }
  0x48   : > { %1988 = vst.msk [vmem:[#allocation3 + $0x180] sm:$0xff] %vm225_vm0, %v8045_v0 }
  0x49   : > { %1990 = vst.msk [vmem:[#allocation3 + $0x190] sm:$0xff] %vm225_vm0, %v8045_v0 }
  0x4a   : > { %1992 = vst.msk [vmem:[#allocation3 + $0x1a0] sm:$0xff] %vm225_vm0, %v8045_v0 }
  0x4b   : > { %1994 = vst.msk [vmem:[#allocation3 + $0x1b0] sm:$0xff] %vm225_vm0, %v8045_v0 }
  0x4c   : > { %1996 = vst.msk [vmem:[#allocation3 + $0x1c0] sm:$0xff] %vm225_vm0, %v8045_v0 }
  0x4d   : > { %1998 = vst.msk [vmem:[#allocation3 + $0x1d0] sm:$0xff] %vm225_vm0, %v8045_v0 }
  0x4e   : > { %2000 = vst.msk [vmem:[#allocation3 + $0x1e0] sm:$0xff] %vm225_vm0, %v8045_v0 }
  0x4f   : > { %2002 = vst.msk [vmem:[#allocation3 + $0x1f0] sm:$0xff] %vm225_vm0, %v8045_v0 }
  0x50   : > { %2004 = vst.msk [vmem:[#allocation3 + $0x200] sm:$0xff] %vm225_vm0, %v8045_v0 }
  0x51   : > { %2006 = vst.msk [vmem:[#allocation3 + $0x210] sm:$0xff] %vm225_vm0, %v8045_v0 }
  0x52   : > { %2008 = vst.msk [vmem:[#allocation3 + $0x220] sm:$0xff] %vm225_vm0, %v8045_v0 }
  0x53   : > { %2010 = vst.msk [vmem:[#allocation3 + $0x230] sm:$0xff] %vm225_vm0, %v8045_v0 }
  0x54   : > { %2012 = vst.msk [vmem:[#allocation3 + $0x240] sm:$0xff] %vm225_vm0, %v8045_v0 }
  0x55   : > { %2014 = vst.msk [vmem:[#allocation3 + $0x250] sm:$0xff] %vm225_vm0, %v8045_v0 }
  0x56   : > { %2016 = vst.msk [vmem:[#allocation3 + $0x260] sm:$0xff] %vm225_vm0, %v8045_v0 }
  0x57   : > { %2018 = vst.msk [vmem:[#allocation3 + $0x270] sm:$0xff] %vm225_vm0, %v8045_v0 }
  0x58   : > { %330 = vst.msk [vmem:[#allocation2 + $0xd0] sm:$0xff] %vm225_vm0, %v3945_v2 }
  0x59   : > { %328 = vst.msk [vmem:[#allocation2 + $0xb0] sm:$0xff] %vm225_vm0, %v3943_v3 }
  0x5a   : > { %327 = vst.msk [vmem:[#allocation2 + $0xa0] sm:$0xff] %vm225_vm0, %v3942_v4  ;;  %v3941_v4 = vld [vmem:[%s4926_s24 + $0xf8] sm:$0xff] }
  0x5b   : > { %331 = vst.msk [vmem:[#allocation2 + $0xe0] sm:$0xff] %vm225_vm0, %v3946_v5 }
  0x5c   : > { %329 = vst.msk [vmem:[#allocation2 + $0xc0] sm:$0xff] %vm225_vm0, %v3944_v6 }
  0x5d   : > { %332 = vst.msk [vmem:[#allocation2 + $0xf0] sm:$0xff] %vm225_vm0, %v3947_v7 }
  0x5e   : > { %228 = vst.msk [vmem:[#allocation2 + $0x8] sm:$0x1] %vm227_vm1, %v8045_v0 }
  0x5f   : > { %v4952_v8 = vld [vmem:[#allocation2 + $0xd0] sm:$0xff]  ;;  %230 = vst.msk [vmem:[#allocation2 + $0x18] sm:$0x1] %vm227_vm1, %v8045_v0 }
  0x60   : > { %459 = vrot.lane.b32.xlu2 %v4952_v8, %s4719_s20  ;;  %v4958_v9 = vld [vmem:[#allocation2 + $0xb0] sm:$0xff]  ;;  %232 = vst.msk [vmem:[#allocation2 + $0x28] sm:$0x1] %vm227_vm1, %v8045_v0 }
  0x61   : > { %455 = vrot.lane.b32.xlu1 %v4958_v9, %s4719_s20  ;;  %v4964_v10 = vld [vmem:[#allocation2 + $0xa0] sm:$0xff]  ;;  %234 = vst.msk [vmem:[#allocation2 + $0x38] sm:$0x1] %vm227_vm1, %v8045_v0 }
  0x62   : > { %453 = vrot.lane.b32.xlu0 %v4964_v10, %s4719_s20  ;;  %236 = vst.msk [vmem:[#allocation2 + $0x48] sm:$0x1] %vm227_vm1, %v8045_v0  ;;  %v4976_v11 = vld [vmem:[#allocation2 + $0xe0] sm:$0xff] }
  0x63   : > { %238 = vst.msk [vmem:[#allocation2 + $0x58] sm:$0x1] %vm227_vm1, %v8045_v0  ;;  %v4980_v12 = vld [vmem:[#allocation2 + $0xc0] sm:$0xff] }
  0x64   : > { %240 = vst.msk [vmem:[#allocation2 + $0x68] sm:$0x1] %vm227_vm1, %v8045_v0  ;;  %v4984_v13 = vld [vmem:[#allocation2 + $0xf0] sm:$0xff] }
  0x65   : > { %242 = vst.msk [vmem:[#allocation2 + $0x78] sm:$0x1] %vm227_vm1, %v8045_v0  ;;  %v5004_v14 = vld [vmem:[#allocation2 + $0x1] sm:$0xff] }
  0x66   : > { %244 = vst.msk [vmem:[#allocation2 + $0x88] sm:$0x1] %vm227_vm1, %v8045_v0 }
  0x67   : > { %8156 = vst [vmem:[#allocation4_spill] sm:$0xff] %v4984_v13 }
  0x68   : > { %246 = vst.msk [vmem:[#allocation2 + $0x98] sm:$0x1] %vm227_vm1, %v8045_v0  ;;  %461 = vrot.lane.b32.xlu2 %v4976_v11, %s4719_s20 }
  0x69   : > { %248 = vst.msk [vmem:[#allocation2 + $0xa8] sm:$0x1] %vm227_vm1, %v8045_v0  ;;  %457 = vrot.lane.b32.xlu1 %v4980_v12, %s4719_s20 }
  0x6a   : > { %250 = vst.msk [vmem:[#allocation2 + $0xb8] sm:$0x1] %vm227_vm1, %v8045_v0  ;;  %463 = vrot.lane.b32.xlu0 %v4984_v13, %s4719_s20 }
  0x6b   : > { %252 = vst.msk [vmem:[#allocation2 + $0xc8] sm:$0x1] %vm227_vm1, %v8045_v0 }
  0x6c   : > { %254 = vst.msk [vmem:[#allocation2 + $0xd8] sm:$0x1] %vm227_vm1, %v8045_v0 }
  0x6d   : > { %256 = vst.msk [vmem:[#allocation2 + $0xe8] sm:$0x1] %vm227_vm1, %v8045_v0 }
  0x6e   : > { %258 = vst.msk [vmem:[#allocation2 + $0xf8] sm:$0x1] %vm227_vm1, %v8045_v0 }
  0x6f   : > { %260 = vst.msk [vmem:[#allocation2 + $0x108] sm:$0x1] %vm227_vm1, %v8045_v0 }
  0x70   : > { %262 = vst.msk [vmem:[#allocation2 + $0x118] sm:$0x1] %vm227_vm1, %v8045_v0  ;;  %483 = vrot.lane.b32.xlu2 %v5004_v14, %s4720_s25 }
  0x71   : > { %264 = vst.msk [vmem:[#allocation2 + $0x128] sm:$0x1] %vm227_vm1, %v8045_v0 }
  0x72   : > { %266 = vst.msk [vmem:[#allocation2 + $0x138] sm:$0x1] %vm227_vm1, %v8045_v0 }
  0x73   : > { %268 = vst.msk [vmem:[#allocation2 + $0x148] sm:$0x1] %vm227_vm1, %v8045_v0 }
  0x74   : > { %270 = vst.msk [vmem:[#allocation2 + $0x158] sm:$0x1] %vm227_vm1, %v8045_v0 }
  0x75   : > { %272 = vst.msk [vmem:[#allocation2 + $0x168] sm:$0x1] %vm227_vm1, %v8045_v0 }
  0x76   : > { %274 = vst.msk [vmem:[#allocation2 + $0x178] sm:$0x1] %vm227_vm1, %v8045_v0 }
  0x77   : > { %276 = vst.msk [vmem:[#allocation2 + $0x188] sm:$0x1] %vm227_vm1, %v8045_v0 }
  0x78   : > { %278 = vst.msk [vmem:[#allocation2 + $0x198] sm:$0x1] %vm227_vm1, %v8045_v0 }
  0x79   : > { %280 = vst.msk [vmem:[#allocation2 + $0x1a8] sm:$0x1] %vm227_vm1, %v8045_v0 }
  0x7a   : > { %282 = vst.msk [vmem:[#allocation2 + $0x1b8] sm:$0x1] %vm227_vm1, %v8045_v0 }
  0x7b   : > { %284 = vst.msk [vmem:[#allocation2 + $0x1c8] sm:$0x1] %vm227_vm1, %v8045_v0 }
  0x7c   : > { %286 = vst.msk [vmem:[#allocation2 + $0x1d8] sm:$0x1] %vm227_vm1, %v8045_v0 }
  0x7d   : > { %288 = vst.msk [vmem:[#allocation2 + $0x1e8] sm:$0x1] %vm227_vm1, %v8045_v0 }
  0x7e   : > { %290 = vst.msk [vmem:[#allocation2 + $0x1f8] sm:$0x1] %vm227_vm1, %v8045_v0 }
  0x7f   : > { %292 = vst.msk [vmem:[#allocation2 + $0x208] sm:$0x1] %vm227_vm1, %v8045_v0 }
  0x80   : > { %294 = vst.msk [vmem:[#allocation2 + $0x218] sm:$0x1] %vm227_vm1, %v8045_v0 }
  0x81   : > { %296 = vst.msk [vmem:[#allocation2 + $0x228] sm:$0x1] %vm227_vm1, %v8045_v0 }
  0x82   : > { %298 = vst.msk [vmem:[#allocation2 + $0x238] sm:$0x1] %vm227_vm1, %v8045_v0  ;;  %vm2939_vm1 = vcmask 457728  }
  0x83   : > { %333 = vst.msk [vmem:[#allocation2 + $0x100] sm:$0xff] %vm225_vm0, %v3948_v15 }
  0x84   : > { %309 = vst.msk [vmem:[#allocation2 + $0x11] sm:$0xff] %vm225_vm0, %v3934_v16 }
  0x85   : > { %311 = vst.msk [vmem:[#allocation2 + $0x31] sm:$0xff] %vm225_vm0, %v3936_v17 }
  0x86   : > { %310 = vst.msk [vmem:[#allocation2 + $0x21] sm:$0xff] %vm225_vm0, %v3935_v18 }
  0x87   : > { %312 = vst.msk [vmem:[#allocation2 + $0x41] sm:$0xff] %vm225_vm0, %v3937_v19 }
  0x88   : > { %314 = vst.msk [vmem:[#allocation2 + $0x61] sm:$0xff] %vm225_vm0, %v3939_v20 }
  0x89   : > { %313 = vst.msk [vmem:[#allocation2 + $0x51] sm:$0xff] %vm225_vm0, %v3938_v21  ;;  %v5216_v21 = vpop.permute.xlu0 %451 }
  0x8a   : > { %v5067_v25 = vld [vmem:[#allocation2 + $0x100] sm:$0xff]  ;;  %315 = vst.msk [vmem:[#allocation2 + $0x71] sm:$0xff] %vm225_vm0, %v3940_v22 }
  0x8b   : > { %465 = vrot.lane.b32.xlu1 %v5067_v25, %s4719_s20  ;;  %v5073_v27 = vld [vmem:[#allocation2 + $0x11] sm:$0xff]  ;;  %346 = vst.msk [vmem:[#allocation2 + $0x131] sm:$0xff] %vm225_vm0, %v3951_v23 }
  0x8c   : > { %8157 = vst [vmem:[#allocation5_spill] sm:$0xff] %v5073_v27  ;;  %485 = vrot.lane.b32.xlu0 %v5073_v27, %s4720_s25  ;;  %v5079_v29 = vld [vmem:[#allocation2 + $0x31] sm:$0xff] }
  0x8d   : > { %8158 = vst [vmem:[#allocation6_spill] sm:$0xff] %v5079_v29  ;;  %489 = vrot.lane.b32.xlu2 %v5079_v29, %s4720_s25  ;;  %v5091_v34 = vld [vmem:[#allocation2 + $0x21] sm:$0xff]  ;;  %v5214_v20 = vld [vmem:[#allocation2 + $0x10] sm:$0xff] }
  0x8e   : > { %345 = vst.msk [vmem:[#allocation2 + $0x121] sm:$0xff] %vm225_vm0, %v3950_v24  ;;  %v5095_v36 = vld [vmem:[#allocation2 + $0x41] sm:$0xff]  ;;  %v5218_v22 = vld [vmem:[#allocation2 + $0x30] sm:$0xff]  ;;  %v3949_v24 = vld [vmem:[%s4926_s24 + $0xb8] sm:$0xff]  ;;  %s4727_s24 = smov 36  }
  0x8f   : > { %347 = vst.msk [vmem:[#allocation2 + $0x141] sm:$0xff] %vm225_vm0, %v3952_v26  ;;  %v5098_v37 = vld [vmem:[#allocation2 + $0x61] sm:$0xff] }
  0x90   : > { %349 = vst.msk [vmem:[#allocation2 + $0x161] sm:$0xff] %vm225_vm0, %v3954_v28  ;;  %v5114_v41 = vld [vmem:[#allocation2 + $0x51] sm:$0xff]  ;;  %v5204_v18 = vld [vmem:[#allocation2 + $0x20] sm:$0xff] }
  0x91   : > { %348 = vst.msk [vmem:[#allocation2 + $0x151] sm:$0xff] %vm225_vm0, %v3953_v30  ;;  %v5116_v42 = vld [vmem:[#allocation2 + $0x71] sm:$0xff]  ;;  %v5234_v30 = vld [vmem:[#allocation2 + $0x60] sm:$0xff] }
  0x92   : > { %8159 = vst [vmem:[#allocation7_spill] sm:$0xff] %v5091_v34  ;;  %v396_v43 = vld [vmem:[#allocation2 + $0x130] sm:$0xff] }
  0x93   : > { %350 = vst.msk [vmem:[#allocation2 + $0x171] sm:$0xff] %vm225_vm0, %v3955_v31  ;;  %487 = vrot.lane.b32.xlu1 %v5091_v34, %s4720_s25  ;;  %v5172_v1 = vld [vmem:[#allocation2 + $0x131] sm:$0xff]  ;;  %v5236_v31 = vld [vmem:[#allocation2 + $0x40] sm:$0xff] }
  0x94   : > { %8160 = vst [vmem:[#allocation8_spill] sm:$0xff] %v5095_v36  ;;  %491 = vrot.lane.b32.xlu0 %v5095_v36, %s4720_s25  ;;  %v5220_v23 = vld [vmem:[#allocation2 + $0x50] sm:$0xff] }
  0x95   : > { %352 = vst.msk [vmem:[#allocation2 + $0x191] sm:$0xff] %vm225_vm0, %v3957_v32  ;;  %495 = vrot.lane.b32.xlu2 %v5098_v37, %s4720_s25  ;;  %v395_v47 = vld [vmem:[#allocation2 + $0x120] sm:$0xff] }
  0x96   : > { %8161 = vst [vmem:[#allocation9_spill] sm:$0xff] %v5098_v37  ;;  %v397_v48 = vld [vmem:[#allocation2 + $0x140] sm:$0xff] }
  0x97   : > { %351 = vst.msk [vmem:[#allocation2 + $0x181] sm:$0xff] %vm225_vm0, %v3956_v33  ;;  %v399_v49 = vld [vmem:[#allocation2 + $0x160] sm:$0xff] }
  0x98   : > { %362 = vst.msk [vmem:[#allocation2 + $0x1b0] sm:$0xff] %vm225_vm0, %v353_v35  ;;  %v398_v51 = vld [vmem:[#allocation2 + $0x150] sm:$0xff]  ;;  %v5162_v62 = vld [vmem:[#allocation2 + $0x121] sm:$0xff] }
  0x99   : > { %364 = vst.msk [vmem:[#allocation2 + $0x1d0] sm:$0xff] %vm225_vm0, %v355_v38  ;;  %v5176_v3 = vld [vmem:[#allocation2 + $0x151] sm:$0xff]  ;;  %v5186_v5 = vld [vmem:[#allocation2 + $0x141] sm:$0xff] }
  0x9a   : > { %363 = vst.msk [vmem:[#allocation2 + $0x1c0] sm:$0xff] %vm225_vm0, %v354_v39  ;;  %v400_v52 = vld [vmem:[#allocation2 + $0x170] sm:$0xff]  ;;  %v5188_v6 = vld [vmem:[#allocation2 + $0x161] sm:$0xff] }
  0x9b   : > { %365 = vst.msk [vmem:[#allocation2 + $0x1e0] sm:$0xff] %vm225_vm0, %v356_v40  ;;  %493 = vrot.lane.b32.xlu1 %v5114_v41, %s4720_s25  ;;  %v5200_v16 = vld [vmem:[#allocation2 + $0x171] sm:$0xff] }
  0x9c   : > { %8162 = vst [vmem:[#allocation10_spill] sm:$0xff] %v5114_v41  ;;  %497 = vrot.lane.b32.xlu0 %v5116_v42, %s4720_s25  ;;  %v402_v53 = vld [vmem:[#allocation2 + $0x190] sm:$0xff] }
  0x9d   : > { %8163 = vst [vmem:[#allocation11_spill] sm:$0xff] %v5116_v42  ;;  %517 = vrot.lane.b32.xlu2 %v396_v43, %s4721_s26  ;;  %v5202_v17 = vld [vmem:[#allocation2 + $0x191] sm:$0xff] }
  0x9e   : > { %367 = vst.msk [vmem:[#allocation2 + $0x200] sm:$0xff] %vm225_vm0, %v358_v44  ;;  %v401_v54 = vld [vmem:[#allocation2 + $0x180] sm:$0xff]  ;;  %v5250_v38 = vld [vmem:[#allocation2 + $0x70] sm:$0xff] }
  0x9f   : > { %366 = vst.msk [vmem:[#allocation2 + $0x1f0] sm:$0xff] %vm225_vm0, %v357_v45  ;;  %v5137_v55 = vld [vmem:[#allocation2 + $0x1b0] sm:$0xff]  ;;  %v5190_v7 = vld [vmem:[#allocation2 + $0x181] sm:$0xff] }
  0xa0   : > { %368 = vst.msk [vmem:[#allocation2 + $0x210] sm:$0xff] %vm225_vm0, %v359_v46  ;;  %v5139_v56 = vld [vmem:[#allocation2 + $0x1d0] sm:$0xff] }
  0xa1   : > { %369 = vst.msk [vmem:[#allocation2 + $0x220] sm:$0xff] %vm225_vm0, %v360_v50  ;;  %v5146_v57 = vld [vmem:[#allocation2 + $0x1c0] sm:$0xff] }
  0xa2   : > { %8164 = vst [vmem:[#allocation12_spill] sm:$0xff] %v5137_v55  ;;  %v5148_v58 = vld [vmem:[#allocation2 + $0x1e0] sm:$0xff] }
  0xa3   : > { %515 = vrot.lane.b32.xlu1 %v395_v47, %s4721_s26  ;;  %8165 = vst [vmem:[#allocation13_spill] sm:$0xff] %v5139_v56 }
  0xa4   : > { %519 = vrot.lane.b32.xlu0 %v397_v48, %s4721_s26  ;;  %8166 = vst [vmem:[#allocation14_spill] sm:$0xff] %v5146_v57 }
  0xa5   : > { %523 = vrot.lane.b32.xlu2 %v399_v49, %s4721_s26  ;;  %8167 = vst [vmem:[#allocation15_spill] sm:$0xff] %v5148_v58  ;;  %v5150_v59 = vld [vmem:[#allocation2 + $0x200] sm:$0xff] }
  0xa6   : > { %8168 = vst [vmem:[#allocation16_spill] sm:$0xff] %v5150_v59  ;;  %v5158_v60 = vld [vmem:[#allocation2 + $0x1f0] sm:$0xff] }
  0xa7   : > { %8169 = vst [vmem:[#allocation17_spill] sm:$0xff] %v5158_v60  ;;  %v5160_v61 = vld [vmem:[#allocation2 + $0x210] sm:$0xff] }
  0xa8   : > { %8170 = vst [vmem:[#allocation18_spill] sm:$0xff] %v5160_v61  ;;  %v5170_v63 = vld [vmem:[#allocation2 + $0x220] sm:$0xff] }
  0xa9   : > { %316 = vst.msk [vmem:[#allocation2 + $0x81] sm:$0xff] %vm225_vm0, %v3941_v4 }
  0xaa   : > { %8171 = vst [vmem:[#allocation19_spill] sm:$0xff] %v5190_v7 }
  0xab   : > { %521 = vrot.lane.b32.xlu1 %v398_v51, %s4721_s26  ;;  %8172 = vst [vmem:[#allocation20_spill] sm:$0xff] %v5200_v16 }
  0xac   : > { %525 = vrot.lane.b32.xlu0 %v400_v52, %s4721_s26  ;;  %8173 = vst [vmem:[#allocation21_spill] sm:$0xff] %v5202_v17 }
  0xad   : > { %529 = vrot.lane.b32.xlu2 %v402_v53, %s4721_s26  ;;  %334 = vst.msk [vmem:[#allocation2 + $0x110] sm:$0xff] %vm225_vm0, %v3949_v24 }
  0xae   : > { %8174 = vst [vmem:[#allocation22_spill] sm:$0xff] %v5234_v30 }
  0xaf   : > { %8177 = vst [vmem:[#allocation25_spill] sm:$0xff] %v5250_v38 }
  0xb0   : > { %v5240_v33 = vld [vmem:[#allocation2 + $0x80] sm:$0xff] }
  0xb1   : > { %8175 = vst [vmem:[#allocation23_spill] sm:$0xff] %v5240_v33  ;;  %v5314_v0 = vld [vmem:[#allocation2 + $0x81] sm:$0xff] }
  0xb2   : > { %8183 = vst [vmem:[#allocation31_spill] sm:$0xff] %v5314_v0 }
  0xb3   : > { %527 = vrot.lane.b32.xlu1 %v401_v54, %s4721_s26 }
  0xb4   : > { %547 = vrot.lane.b32.xlu0 %v5137_v55, %s4722_s27  ;;  %v5288_v50 = vld [vmem:[#allocation2 + $0x110] sm:$0xff] }
  0xb5   : > { %551 = vrot.lane.b32.xlu2 %v5139_v56, %s4722_s27  ;;  %8181 = vst [vmem:[#allocation29_spill] sm:$0xff] %v5288_v50 }
  0xba   : > { %v5174_v2 = vpop.permute.xlu2 %459 }
  0xbb   : > { %549 = vrot.lane.b32.xlu1 %v5146_v57, %s4722_s27 }
  0xbc   : > { %553 = vrot.lane.b32.xlu0 %v5148_v58, %s4722_s27 }
  0xbd   : > { %557 = vrot.lane.b32.xlu2 %v5150_v59, %s4722_s27 }
  0xc2   : > { %v5194_v15 = vpop.permute.xlu2 %461 }
  0xc3   : > { %555 = vrot.lane.b32.xlu1 %v5158_v60, %s4722_s27 }
  0xc4   : > { %559 = vrot.lane.b32.xlu0 %v5160_v61, %s4722_s27 }
  0xc5   : > { %579 = vrot.lane.b32.xlu2 %v5162_v62, %s4723_s28 }
  0xca   : > { %v5212_v19 = vpop.permute.xlu2 %483 }
  0xcb   : > { %561 = vrot.lane.b32.xlu1 %v5170_v63, %s4722_s27 }
  0xcc   : > { %581 = vrot.lane.b32.xlu0 %v5172_v1, %s4723_s28 }
  0xcd   : > { %585 = vrot.lane.b32.xlu2 %v5176_v3, %s4723_s28 }
  0xd3   : > { %583 = vrot.lane.b32.xlu1 %v5186_v5, %s4723_s28  ;;  %v5232_v28 = vpop.permute.xlu1 %455 }
  0xd4   : > { %587 = vrot.lane.b32.xlu0 %v5188_v6, %s4723_s28  ;;  %v5238_v32 = vpop.permute.xlu0 %453 }
  0xd5   : > { %591 = vrot.lane.b32.xlu2 %v5190_v7, %s4723_s28 }
  0xdb   : > { %589 = vrot.lane.b32.xlu1 %v5200_v16, %s4723_s28  ;;  %v5254_v39 = vpop.permute.xlu1 %457 }
  0xdc   : > { %593 = vrot.lane.b32.xlu0 %v5202_v17, %s4723_s28  ;;  %v5258_v40 = vpop.permute.xlu0 %463 }
  0xdd   : > { %613 = vrot.lane.b32.xlu2 %v5204_v18, %s4724_s29  ;;  %8178 = vst [vmem:[#allocation26_spill] sm:$0xff] %v5258_v40  ;;  %v5414_v40 = vld [vmem:[#allocation2 + $0x101] sm:$0xff] }
  0xde   : > { %8195 = vst [vmem:[#allocation43_spill] sm:$0xff] %v5414_v40 }
  0xe3   : > { %611 = vrot.lane.b32.xlu1 %v5214_v20, %s4724_s29 }
  0xe4   : > { %615 = vrot.lane.b32.xlu0 %v5218_v22, %s4724_s29 }
  0xe5   : > { %619 = vrot.lane.b32.xlu2 %v5220_v23, %s4724_s29 }
  0xe7   : > { %v5230_v26 = vpop.permute.xlu2 %489 }
  0xeb   : > { %617 = vrot.lane.b32.xlu1 %v5236_v31, %s4724_s29 }
  0xec   : > { %621 = vrot.lane.b32.xlu0 %v5234_v30, %s4724_s29 }
  0xed   : > { %625 = vrot.lane.b32.xlu2 %v5240_v33, %s4724_s29 }
  0xef   : > { %v5248_v35 = vpop.permute.xlu2 %495 }
  0xf0   : > { %8176 = vst [vmem:[#allocation24_spill] sm:$0xff] %v5248_v35  ;;  %v5365_v35 = vld [vmem:[#allocation2 + $0xa1] sm:$0xff] }
  0xf1   : > { %8188 = vst [vmem:[#allocation36_spill] sm:$0xff] %v5365_v35 }
  0xf3   : > { %623 = vrot.lane.b32.xlu1 %v5250_v38, %s4724_s29 }
  0xf4   : > { %643 = vrot.lane.b32.xlu0 %v4964_v10, %s4725_s30 }
  0xf5   : > { %647 = vrot.lane.b32.xlu2 %v4980_v12, %s4725_s30 }
  0xf7   : > { %v5262_v43 = vpop.permute.xlu2 %517 }
  0xfb   : > { %645 = vrot.lane.b32.xlu1 %v4958_v9, %s4725_s30 }
  0xfc   : > { %649 = vrot.lane.b32.xlu0 %v4952_v8, %s4725_s30 }
  0xfd   : > { %v5268_v44 = vpop.permute.xlu1 %465  ;;  %653 = vrot.lane.b32.xlu2 %v4984_v13, %s4725_s30  ;;  %v5389_v13 = vld [vmem:[#allocation2 + $0xd1] sm:$0xff] }
  0xfe   : > { %8179 = vst [vmem:[#allocation27_spill] sm:$0xff] %v5268_v44  ;;  %v5272_v45 = vpop.permute.xlu0 %485 }
  0xff   : > { %v5274_v46 = vpop.permute.xlu2 %523  ;;  %8192 = vst [vmem:[#allocation40_spill] sm:$0xff] %v5389_v13 }
 0x103   : > { %651 = vrot.lane.b32.xlu1 %v4976_v11, %s4725_s30 }
 0x104   : > { %655 = vrot.lane.b32.xlu0 %v5067_v25, %s4725_s30 }
 0x105   : > { %v5280_v47 = vpop.permute.xlu1 %487  ;;  %675 = vrot.lane.b32.xlu2 %v5073_v27, %s4726_s6 }
 0x106   : > { %v5284_v48 = vpop.permute.xlu0 %491 }
 0x107   : > { %v5286_v49 = vpop.permute.xlu2 %529 }
 0x108   : > { %8180 = vst [vmem:[#allocation28_spill] sm:$0xff] %v5286_v49 }
 0x10b   : > { %657 = vrot.lane.b32.xlu1 %v5288_v50, %s4725_s30  ;;  %v5369_v50 = vld [vmem:[#allocation2 + $0xe1] sm:$0xff] }
 0x10c   : > { %677 = vrot.lane.b32.xlu0 %v5091_v34, %s4726_s6  ;;  %8190 = vst [vmem:[#allocation38_spill] sm:$0xff] %v5369_v50 }
 0x10d   : > { %v5294_v51 = vpop.permute.xlu1 %493  ;;  %681 = vrot.lane.b32.xlu2 %v5095_v36, %s4726_s6 }
 0x10e   : > { %v5298_v52 = vpop.permute.xlu0 %497 }
 0x10f   : > { %8182 = vst [vmem:[#allocation30_spill] sm:$0xff] %v5298_v52  ;;  %v5300_v53 = vpop.permute.xlu2 %551 }
 0x113   : > { %679 = vrot.lane.b32.xlu1 %v5079_v29, %s4726_s6 }
 0x114   : > { %683 = vrot.lane.b32.xlu0 %v5114_v41, %s4726_s6 }
 0x115   : > { %v5306_v54 = vpop.permute.xlu1 %515  ;;  %687 = vrot.lane.b32.xlu2 %v5116_v42, %s4726_s6 }
 0x116   : > { %v5310_v4 = vpop.permute.xlu0 %519 }
 0x117   : > { %v5312_v24 = vpop.permute.xlu2 %557 }
 0x11b   : > { %685 = vrot.lane.b32.xlu1 %v5098_v37, %s4726_s6 }
 0x11c   : > { %689 = vrot.lane.b32.xlu0 %v5314_v0, %s4726_s6 }
 0x11d   : > { %v5320_v33 = vpop.permute.xlu1 %521  ;;  %796 = vrot.lane.b32.xlu2 %v5073_v27, %s4719_s20 }
 0x11e   : > { %v5324_v49 = vpop.permute.xlu0 %525 }
 0x11f   : > { %v5326_v52 = vpop.permute.xlu2 %579 }
 0x123   : > { %794 = vrot.lane.b32.xlu1 %v5004_v14, %s4719_s20 }
 0x124   : > { %798 = vrot.lane.b32.xlu0 %v5091_v34, %s4719_s20  ;;  %v5352_v34 = vld [vmem:[#allocation2 + $0xb1] sm:$0xff] }
 0x125   : > { %v5332_v38 = vpop.permute.xlu1 %527  ;;  %802 = vrot.lane.b32.xlu2 %v5095_v36, %s4719_s20  ;;  %v770_v36 = vld [vmem:[#allocation2 + $0x91] sm:$0xff]  ;;  %8186 = vst [vmem:[#allocation34_spill] sm:$0xff] %v5352_v34 }
 0x126   : > { %8184 = vst [vmem:[#allocation32_spill] sm:$0xff] %v5332_v38  ;;  %v5336_v0 = vpop.permute.xlu0 %547 }
 0x127   : > { %v5338_v44 = vpop.permute.xlu2 %585 }
 0x12b   : > { %800 = vrot.lane.b32.xlu1 %v5079_v29, %s4719_s20 }
 0x12c   : > { %804 = vrot.lane.b32.xlu0 %v5114_v41, %s4719_s20 }
 0x12d   : > { %v5344_v27 = vpop.permute.xlu1 %549  ;;  %808 = vrot.lane.b32.xlu2 %v5116_v42, %s4719_s20 }
 0x12e   : > { %v5348_v14 = vpop.permute.xlu0 %553 }
 0x12f   : > { %v5350_v38 = vpop.permute.xlu2 %591 }
 0x130   : > { %8185 = vst [vmem:[#allocation33_spill] sm:$0xff] %v5350_v38  ;;  %v5367_v38 = vld [vmem:[#allocation2 + $0xc1] sm:$0xff] }
 0x131   : > { %8189 = vst [vmem:[#allocation37_spill] sm:$0xff] %v5367_v38 }
 0x133   : > { %806 = vrot.lane.b32.xlu1 %v5098_v37, %s4719_s20 }
 0x134   : > { %826 = vrot.lane.b32.xlu0 %v770_v36, %s4720_s25 }
 0x135   : > { %v5357_v29 = vpop.permute.xlu1 %555  ;;  %830 = vrot.lane.b32.xlu2 %v5352_v34, %s4720_s25 }
 0x136   : > { %v5361_v41 = vpop.permute.xlu0 %559 }
 0x137   : > { %8187 = vst [vmem:[#allocation35_spill] sm:$0xff] %v5361_v41  ;;  %v5363_v42 = vpop.permute.xlu2 %613  ;;  %v1656_v41 = vld [vmem:[%s8040_s1 + $0x20] sm:$0xf] }
 0x138   : > { %3958 = vmatpush.msk.msra.mxu0 %vm1758_vm2, %v1656_v41  ;;  %4003 = vmatpush.msk.msra.mxu1 %vm1758_vm2, %v1656_v41 }
 0x139   : > { %4005 = vmatpush.msk.msra.mxu3 %vm1758_vm2, %v1656_v41  ;;  %4004 = vmatpush.msk.msra.mxu2 %vm1758_vm2, %v1656_v41  ;;  %vm2948_vm2 = vcmask 490496  }
 0x13b   : > { %828 = vrot.lane.b32.xlu1 %v5365_v35, %s4720_s25  ;;  %v1655_v35 = vld [vmem:[%s8040_s1 + $0x18] sm:$0xff] }
 0x13c   : > { %832 = vrot.lane.b32.xlu0 %v5367_v38, %s4720_s25  ;;  %v5391_v38 = vld [vmem:[#allocation2 + $0xf1] sm:$0xff]  ;;  %1774 = vmatpush.msra.mxu0 %v1655_v35 }
 0x13d   : > { %v5375_v36 = vpop.permute.xlu1 %561  ;;  %836 = vrot.lane.b32.xlu2 %v5369_v50, %s4720_s25  ;;  %8193 = vst [vmem:[#allocation41_spill] sm:$0xff] %v5391_v38  ;;  %4006 = vmatpush.msra.mxu1 %v1655_v35  ;;  %v1654_v50 = vld [vmem:[%s8040_s1 + $0x10] sm:$0xff] }
 0x13e   : > { %8191 = vst [vmem:[#allocation39_spill] sm:$0xff] %v5375_v36  ;;  %v5379_v34 = vpop.permute.xlu0 %581  ;;  %4008 = vmatpush.msra.mxu3 %v1655_v35  ;;  %1775 = vmatpush.msra.mxu0 %v1654_v50 }
 0x13f   : > { %v5381_v37 = vpop.permute.xlu2 %619  ;;  %4009 = vmatpush.msra.mxu1 %v1654_v50  ;;  %4007 = vmatpush.msra.mxu2 %v1655_v35 }
 0x140   : > { %4011 = vmatpush.msra.mxu3 %v1654_v50 }
 0x141   : > { %4010 = vmatpush.msra.mxu2 %v1654_v50 }
 0x143   : > { %834 = vrot.lane.b32.xlu1 %v5389_v13, %s4720_s25  ;;  %v1653_v13 = vld [vmem:[%s8040_s1 + $0x8] sm:$0xff] }
 0x144   : > { %838 = vrot.lane.b32.xlu0 %v5391_v38, %s4720_s25  ;;  %1776 = vmatpush.msra.mxu0 %v1653_v13  ;;  %v1652_v38 = vld [vmem:[%s8040_s1] sm:$0xff] }
 0x145   : > { %v5400_v36 = vpop.permute.xlu1 %583  ;;  %850 = vrot.lane.b32.xlu2 %v5137_v55, %s4721_s26  ;;  %4012 = vmatpush.msra.mxu1 %v1653_v13 }
 0x146   : > { %v5404_v41 = vpop.permute.xlu0 %587  ;;  %4014 = vmatpush.msra.mxu3 %v1653_v13  ;;  %1777 = vmatpush.msra.mxu0 %v1652_v38 }
 0x147   : > { %v5409_v30 = vpop.permute.xlu2 %625  ;;  %4015 = vmatpush.msra.mxu1 %v1652_v38  ;;  %4013 = vmatpush.msra.mxu2 %v1653_v13 }
 0x148   : > { %8194 = vst [vmem:[#allocation42_spill] sm:$0xff] %v5409_v30  ;;  %4017 = vmatpush.msra.mxu3 %v1652_v38 }
 0x149   : > { %4016 = vmatpush.msra.mxu2 %v1652_v38 }
 0x14b   : > { %840 = vrot.lane.b32.xlu1 %v5414_v40, %s4720_s25 }
 0x14c   : > { %852 = vrot.lane.b32.xlu0 %v5146_v57, %s4721_s26  ;;  %v370_v57 = vld [vmem:[#allocation2] sm:$0xff] }
 0x14d   : > { %v5420_v35 = vpop.permute.xlu1 %589  ;;  %856 = vrot.lane.b32.xlu2 %v5148_v58, %s4721_s26 }
 0x14e   : > { %v5424_v55 = vpop.permute.xlu0 %593 }
 0x14f   : > { %v5426_v30 = vpop.permute.xlu2 %647 }
 0x153   : > { %854 = vrot.lane.b32.xlu1 %v5139_v56, %s4721_s26  ;;  %v699_v56 = vsel %vm225_vm0, %v370_v57, %v5216_v21 }
 0x154   : > { %858 = vrot.lane.b32.xlu0 %v5158_v60, %s4721_s26  ;;  %v708_v40 = vsel %vm707_vm3, %v699_v56, %v5212_v19 }
 0x155   : > { %v612_v13 = vpop.permute.xlu1 %611  ;;  %862 = vrot.lane.b32.xlu2 %v5160_v61, %s4721_s26 }
 0x156   : > { %v5434_v38 = vpop.permute.xlu0 %615 }
 0x157   : > { %v5436_v50 = vpop.permute.xlu2 %653 }
 0x15b   : > { %860 = vrot.lane.b32.xlu1 %v5150_v59, %s4721_s26  ;;  %v717_v59 = vsel %vm716_vm4, %v708_v40, %v5306_v54 }
 0x15c   : > { %864 = vrot.lane.b32.xlu0 %v5170_v63, %s4721_s26  ;;  %v726_v57 = vsel %vm725_vm5, %v717_v59, %v5336_v0 }
 0x15d   : > { %v5444_v60 = vpop.permute.xlu1 %617  ;;  %876 = vrot.lane.b32.xlu2 %v5172_v1, %s4722_s27  ;;  %v735_v21 = vsel %vm734_vm6, %v726_v57, %v5326_v52 }
 0x15e   : > { %v5448_v61 = vpop.permute.xlu0 %621  ;;  %v744_v19 = vsel %vm743_vm7, %v735_v21, %v612_v13  ;;  %v5480_v21 = vld [vmem:[#allocation2 + $0x1b1] sm:$0xff] }
 0x15f   : > { %v676_v58 = vpop.permute.xlu2 %675  ;;  %8196 = vst [vmem:[#allocation44_spill] sm:$0xff] %v5480_v21 }
 0x163   : > { %874 = vrot.lane.b32.xlu1 %v5162_v62, %s4722_s27 }
 0x164   : > { %878 = vrot.lane.b32.xlu0 %v5186_v5, %s4722_s27 }
 0x165   : > { %v5462_v56 = vpop.permute.xlu1 %623  ;;  %882 = vrot.lane.b32.xlu2 %v5188_v6, %s4722_s27 }
 0x166   : > { %v644_v0 = vpop.permute.xlu0 %643 }
 0x167   : > { %v753_v59 = vsel %vm752_vm9, %v744_v19, %v644_v0  ;;  %v5468_v40 = vpop.permute.xlu2 %681  ;;  %v5482_v19 = vld [vmem:[#allocation2 + $0x1d1] sm:$0xff] }
 0x168   : > { %v762_v54 = vsel %vm761_vm8, %v753_v59, %v676_v58  ;;  %8197 = vst [vmem:[#allocation45_spill] sm:$0xff] %v5482_v19  ;;  %v700_v58 = vsel %vm225_vm0, %v5214_v20, %v5238_v32 }
 0x169   : > { %3959 = vmatmul.msk.f32.vlgmr.msra.gmra.mxu0 %vm1661_vm10, %v762_v54  ;;  %v709_v0 = vsel %vm707_vm3, %v700_v58, %v5272_v45  ;;  %v5511_v58 = vld [vmem:[#allocation2 + $0x201] sm:$0xff] }
 0x16a   : > { %8200 = vst [vmem:[#allocation48_spill] sm:$0xff] %v5511_v58 }
 0x16b   : > { %880 = vrot.lane.b32.xlu1 %v5176_v3, %s4722_s27 }
 0x16c   : > { %884 = vrot.lane.b32.xlu0 %v5200_v16, %s4722_s27  ;;  %v5503_v16 = vld [vmem:[#allocation2 + $0x1c1] sm:$0xff] }
 0x16d   : > { %v646_v52 = vpop.permute.xlu1 %645  ;;  %888 = vrot.lane.b32.xlu2 %v5202_v17, %s4722_s27  ;;  %8198 = vst [vmem:[#allocation46_spill] sm:$0xff] %v5503_v16 }
 0x16e   : > { %v650_v13 = vpop.permute.xlu0 %649 }
 0x16f   : > { %v5478_v57 = vpop.permute.xlu2 %687 }
 0x173   : > { %886 = vrot.lane.b32.xlu1 %v5190_v7, %s4722_s27  ;;  %v718_v7 = vsel %vm716_vm4, %v709_v0, %v5262_v43 }
 0x174   : > { %906 = vrot.lane.b32.xlu0 %v5480_v21, %s4723_s28  ;;  %v727_v32 = vsel %vm725_vm5, %v718_v7, %v5344_v27  ;;  %v5507_v21 = vld [vmem:[#allocation2 + $0x1e1] sm:$0xff] }
 0x175   : > { %v5493_v59 = vpop.permute.xlu1 %651  ;;  %910 = vrot.lane.b32.xlu2 %v5482_v19, %s4723_s28  ;;  %8199 = vst [vmem:[#allocation47_spill] sm:$0xff] %v5507_v21  ;;  %v736_v45 = vsel %vm734_vm6, %v727_v32, %v5379_v34  ;;  %v701_v19 = vsel %vm225_vm0, %v5204_v18, %v5232_v28 }
 0x176   : > { %v5497_v54 = vpop.permute.xlu0 %655  ;;  %v710_v27 = vsel %vm707_vm3, %v701_v19, %v5280_v47  ;;  %v745_v7 = vsel %vm743_vm7, %v736_v45, %v5363_v42  ;;  %v5535_v47 = vld [vmem:[#allocation2 + $0x1f1] sm:$0xff] }
 0x177   : > { %v5499_v17 = vpop.permute.xlu2 %796  ;;  %v719_v34 = vsel %vm716_vm4, %v710_v27, %v5310_v4  ;;  %v754_v0 = vsel %vm752_vm9, %v745_v7, %v646_v52  ;;  %8201 = vst [vmem:[#allocation49_spill] sm:$0xff] %v5535_v47  ;;  %v5539_v19 = vld [vmem:[#allocation2 + $0x211] sm:$0xff]  ;;  %v702_v4 = vsel %vm225_vm0, %v5218_v22, %v5254_v39 }
 0x178   : > { %v728_v42 = vsel %vm725_vm5, %v719_v34, %v5300_v53  ;;  %8202 = vst [vmem:[#allocation50_spill] sm:$0xff] %v5539_v19  ;;  %v711_v53 = vsel %vm707_vm3, %v702_v4, %v5230_v26  ;;  %v5566_v26 = vld [vmem:[#allocation2 + $0x221] sm:$0xff]  ;;  %v8206_v4 = vld [vmem:[#allocation22_spill] sm:$0xff] }
 0x179   : > { %v737_v52 = vsel %vm734_vm6, %v728_v42, %v5400_v36  ;;  %v720_v39 = vsel %vm716_vm4, %v711_v53, %v5320_v33  ;;  %8204 = vst [vmem:[#allocation52_spill] sm:$0xff] %v5566_v26  ;;  %v8209_v53 = vld [vmem:[#allocation24_spill] sm:$0xff] }
 0x17a   : > { %v746_v45 = vsel %vm743_vm7, %v737_v52, %v5434_v38  ;;  %v729_v7 = vsel %vm725_vm5, %v720_v39, %v5348_v14  ;;  %v8207_v52 = vld [vmem:[#allocation4_spill] sm:$0xff]  ;;  %v8210_v39 = vld [vmem:[#allocation7_spill] sm:$0xff] }
 0x17b   : > { %908 = vrot.lane.b32.xlu1 %v5503_v16, %s4723_s28  ;;  %v755_v38 = vsel %vm752_vm9, %v746_v45, %v5426_v30  ;;  %v703_v30 = vsel %vm225_vm0, %v5236_v31, %v5174_v2  ;;  %v8208_v45 = vld [vmem:[#allocation29_spill] sm:$0xff] }
 0x17c   : > { %912 = vrot.lane.b32.xlu0 %v5507_v21, %s4723_s28 }
 0x17d   : > { %v5524_v43 = vpop.permute.xlu1 %657  ;;  %916 = vrot.lane.b32.xlu2 %v5511_v58, %s4723_s28  ;;  %v5934_v58 = vld [vmem:[#allocation2 + $0xb0] sm:$0xff] }
 0x17e   : > { %v678_v28 = vpop.permute.xlu0 %677 }
 0x17f   : > { %v763_v32 = vsel %vm761_vm8, %v754_v0, %v678_v28  ;;  %v5532_v21 = vpop.permute.xlu2 %802  ;;  %v712_v28 = vsel %vm707_vm3, %v703_v30, %v5284_v48  ;;  %v8213_v30 = vld [vmem:[#allocation33_spill] sm:$0xff] }
 0x180   : > { %3960 = vmatmul.msk.f32.gmra.mxu0 %vm1661_vm10, %v763_v32  ;;  %v721_v2 = vsel %vm716_vm4, %v712_v28, %v5274_v46 }
 0x183   : > { %914 = vrot.lane.b32.xlu1 %v5535_v47, %s4723_s28 }
 0x184   : > { %918 = vrot.lane.b32.xlu0 %v5539_v19, %s4723_s28 }
 0x185   : > { %v680_v27 = vpop.permute.xlu1 %679  ;;  %930 = vrot.lane.b32.xlu2 %v4964_v10, %s4724_s29  ;;  %v738_v10 = vsel %vm734_vm6, %v729_v7, %v5338_v44  ;;  %v8212_v7 = vld [vmem:[#allocation35_spill] sm:$0xff] }
 0x186   : > { %v684_v36 = vpop.permute.xlu0 %683  ;;  %v764_v34 = vsel %vm761_vm8, %v755_v38, %v680_v27  ;;  %v747_v33 = vsel %vm743_vm7, %v738_v10, %v5444_v60 }
 0x187   : > { %v5563_v0 = vpop.permute.xlu2 %808  ;;  %v756_v14 = vsel %vm752_vm9, %v747_v33, %v650_v13 }
 0x188   : > { %8203 = vst [vmem:[#allocation51_spill] sm:$0xff] %v5563_v0  ;;  %3961 = vmatmul.msk.f32.gmra.mxu0 %vm1661_vm10, %v764_v34  ;;  %v765_v44 = vsel %vm761_vm8, %v756_v14, %v5468_v40  ;;  %v4667_v0 = vld [vmem:[#allocation2 + $0x90] sm:$0xff] }
 0x18b   : > { %920 = vrot.lane.b32.xlu1 %v5566_v26, %s4723_s28 }
 0x18c   : > { %932 = vrot.lane.b32.xlu0 %v4958_v9, %s4724_s29  ;;  %v730_v9 = vsel %vm725_vm5, %v721_v2, %v5357_v29  ;;  %v8215_v2 = vld [vmem:[#allocation27_spill] sm:$0xff] }
 0x18d   : > { %v686_v32 = vpop.permute.xlu1 %685  ;;  %936 = vrot.lane.b32.xlu2 %v4952_v8, %s4724_s29  ;;  %v739_v48 = vsel %vm734_vm6, %v730_v9, %v5404_v41  ;;  %v704_v8 = vsel %vm225_vm0, %v5220_v23, %v5194_v15 }
 0x18e   : > { %v690_v60 = vpop.permute.xlu0 %689  ;;  %v713_v46 = vsel %vm707_vm3, %v704_v8, %v5294_v51  ;;  %v748_v40 = vsel %vm743_vm7, %v739_v48, %v5381_v37  ;;  %v8205_v51 = vld [vmem:[#allocation26_spill] sm:$0xff] }
 0x18f   : > { %v5586_v42 = vpop.permute.xlu2 %830  ;;  %v757_v15 = vsel %vm752_vm9, %v748_v40, %v5493_v59  ;;  %v8217_v48 = vld [vmem:[#allocation6_spill] sm:$0xff] }
 0x190   : > { %3962 = vmatmul.msk.f32.gmra.mxu0 %vm1661_vm10, %v765_v44  ;;  %v8214_v44 = vld [vmem:[#allocation5_spill] sm:$0xff]  ;;  %v8218_v8 = vld [vmem:[#allocation30_spill] sm:$0xff] }
 0x193   : > { %934 = vrot.lane.b32.xlu1 %v4980_v12, %s4724_s29  ;;  %v722_v12 = vsel %vm716_vm4, %v713_v46, %v5324_v49 }
 0x194   : > { %938 = vrot.lane.b32.xlu0 %v4976_v11, %s4724_s29  ;;  %v766_v11 = vsel %vm761_vm8, %v757_v15, %v684_v36  ;;  %v731_v37 = vsel %vm725_vm5, %v722_v12, %v5312_v24  ;;  %v8211_v36 = vld [vmem:[#allocation32_spill] sm:$0xff] }
 0x195   : > { %v5606_v29 = vpop.permute.xlu1 %794  ;;  %942 = vrot.lane.b32.xlu2 %v5067_v25, %s4724_s29  ;;  %v705_v25 = vsel %vm225_vm0, %v8206_v4, %v8205_v51  ;;  %v740_v49 = vsel %vm734_vm6, %v731_v37, %v5420_v35  ;;  %v8220_v37 = vld [vmem:[#allocation28_spill] sm:$0xff]  ;;  %v8221_v51 = vld [vmem:[#allocation39_spill] sm:$0xff] }
 0x196   : > { %v5614_v41 = vpop.permute.xlu0 %798  ;;  %v749_v59 = vsel %vm743_vm7, %v740_v49, %v5448_v61  ;;  %v714_v27 = vsel %vm707_vm3, %v705_v25, %v8209_v53 }
 0x197   : > { %v5617_v13 = vpop.permute.xlu2 %836  ;;  %v723_v35 = vsel %vm716_vm4, %v714_v27, %v8211_v36  ;;  %v758_v61 = vsel %vm752_vm9, %v749_v59, %v5436_v50  ;;  %v8216_v50 = vld [vmem:[#allocation25_spill] sm:$0xff]  ;;  %v8222_v59 = vld [vmem:[#allocation8_spill] sm:$0xff] }
 0x198   : > { %3963 = vmatmul.msk.f32.gmra.mxu0 %vm1661_vm10, %v766_v11  ;;  %v732_v34 = vsel %vm725_vm5, %v723_v35, %v8212_v7  ;;  %v767_v10 = vsel %vm761_vm8, %v758_v61, %v686_v32  ;;  %v706_v9 = vsel %vm225_vm0, %v8216_v50, %v8215_v2  ;;  %v8226_v7 = vld [vmem:[#allocation11_spill] sm:$0xff]  ;;  %v8232_v2 = vld [vmem:[#allocation41_spill] sm:$0xff] }
 0x199   : > { %v741_v14 = vsel %vm734_vm6, %v732_v34, %v8213_v30  ;;  %v715_v46 = vsel %vm707_vm3, %v706_v9, %v8218_v8  ;;  %v8227_v34 = vld [vmem:[#allocation36_spill] sm:$0xff]  ;;  %v8228_v30 = vld [vmem:[#allocation37_spill] sm:$0xff]  ;;  %v8234_v8 = vld [vmem:[#allocation43_spill] sm:$0xff] }
 0x19a   : > { %v750_v28 = vsel %vm743_vm7, %v741_v14, %v5462_v56  ;;  %v8219_v56 = vld [vmem:[#allocation10_spill] sm:$0xff] }
 0x19b   : > { %940 = vrot.lane.b32.xlu1 %v8207_v52, %s4724_s29  ;;  %v759_v32 = vsel %vm752_vm9, %v750_v28, %v5497_v54  ;;  %v724_v54 = vsel %vm716_vm4, %v715_v46, %v8220_v37  ;;  %v8223_v52 = vld [vmem:[#allocation9_spill] sm:$0xff]  ;;  %v8230_v28 = vld [vmem:[#allocation40_spill] sm:$0xff] }
 0x19c   : > { %944 = vrot.lane.b32.xlu0 %v8208_v45, %s4724_s29  ;;  %v768_v15 = vsel %vm761_vm8, %v759_v32, %v5478_v57  ;;  %v733_v25 = vsel %vm725_vm5, %v724_v54, %v8221_v51  ;;  %v8224_v57 = vld [vmem:[#allocation42_spill] sm:$0xff] }
 0x19d   : > { %v5635_v24 = vpop.permute.xlu1 %800  ;;  %956 = vrot.lane.b32.xlu2 %v8210_v39, %s4725_s30  ;;  %v742_v49 = vsel %vm734_vm6, %v733_v25, %v5424_v55  ;;  %v8225_v39 = vld [vmem:[#allocation31_spill] sm:$0xff]  ;;  %v8238_v51 = vld [vmem:[#allocation14_spill] sm:$0xff]  ;;  %v8239_v25 = vmov 0.0  }
 0x19e   : > { %v5641_v38 = vpop.permute.xlu0 %804  ;;  %v751_v53 = vsel %vm743_vm7, %v742_v49, %v8224_v57  ;;  %v5737_v54 = vld [vmem:[#allocation2 + $0x111] sm:$0xff]  ;;  %1943 = vst.msk [vmem:[#allocation3 + $0x18] sm:$0x3] %vm1940_vm11, %v8239_v25 }
 0x19f   : > { %v5648_v33 = vpop.permute.xlu2 %850  ;;  %v760_v36 = vsel %vm752_vm9, %v751_v53, %v5524_v43  ;;  %8237 = vst [vmem:[#allocation4_spill] sm:$0xff] %v5737_v54  ;;  %v8242_v53 = vld [vmem:[#allocation13_spill] sm:$0xff] }
 0x1a0   : > { %3964 = vmatmul.msk.f32.gmra.mxu0 %vm1661_vm10, %v767_v10  ;;  %v769_v55 = vsel %vm761_vm8, %v760_v36, %v690_v60  ;;  %v8229_v60 = vld [vmem:[#allocation34_spill] sm:$0xff]  ;;  %1941 = vst.msk [vmem:[#allocation3 + $0x8] sm:$0x3] %vm1940_vm11, %v8239_v25  ;;  %v8243_v36 = vld [vmem:[#allocation17_spill] sm:$0xff] }
 0x1a1   : > { %1945 = vst.msk [vmem:[#allocation3 + $0x28] sm:$0x3] %vm1940_vm11, %v8239_v25 }
 0x1a2   : > { %1947 = vst.msk [vmem:[#allocation3 + $0x38] sm:$0x3] %vm1940_vm11, %v8239_v25 }
 0x1a3   : > { %954 = vrot.lane.b32.xlu1 %v8214_v44, %s4725_s30  ;;  %1949 = vst.msk [vmem:[#allocation3 + $0x48] sm:$0x3] %vm1940_vm11, %v8239_v25 }
 0x1a4   : > { %958 = vrot.lane.b32.xlu0 %v8217_v48, %s4725_s30  ;;  %v8233_v48 = vld [vmem:[#allocation38_spill] sm:$0xff]  ;;  %1951 = vst.msk [vmem:[#allocation3 + $0x58] sm:$0x3] %vm1940_vm11, %v8239_v25 }
 0x1a5   : > { %v5666_v40 = vpop.permute.xlu1 %806  ;;  %962 = vrot.lane.b32.xlu2 %v8219_v56, %s4725_s30  ;;  %v8235_v56 = vld [vmem:[#allocation12_spill] sm:$0xff]  ;;  %1953 = vst.msk [vmem:[#allocation3 + $0x68] sm:$0x3] %vm1940_vm11, %v8239_v25 }
 0x1a6   : > { %v5670_v12 = vpop.permute.xlu0 %826  ;;  %1955 = vst.msk [vmem:[#allocation3 + $0x78] sm:$0x3] %vm1940_vm11, %v8239_v25 }
 0x1a7   : > { %v5674_v11 = vpop.permute.xlu2 %856  ;;  %1957 = vst.msk [vmem:[#allocation3 + $0x88] sm:$0x3] %vm1940_vm11, %v8239_v25 }
 0x1a8   : > { %3965 = vmatmul.msk.f32.gmra.mxu0 %vm1661_vm10, %v768_v15  ;;  %1959 = vst.msk [vmem:[#allocation3 + $0x98] sm:$0x3] %vm1940_vm11, %v8239_v25 }
 0x1a9   : > { %1961 = vst.msk [vmem:[#allocation3 + $0xa8] sm:$0x3] %vm1940_vm11, %v8239_v25 }
 0x1aa   : > { %1963 = vst.msk [vmem:[#allocation3 + $0xb8] sm:$0x3] %vm1940_vm11, %v8239_v25 }
 0x1ab   : > { %960 = vrot.lane.b32.xlu1 %v8222_v59, %s4725_s30  ;;  %v8240_v59 = vld [vmem:[#allocation15_spill] sm:$0xff]  ;;  %1965 = vst.msk [vmem:[#allocation3 + $0xc8] sm:$0x3] %vm1940_vm11, %v8239_v25 }
 0x1ac   : > { %964 = vrot.lane.b32.xlu0 %v8223_v52, %s4725_s30  ;;  %1967 = vst.msk [vmem:[#allocation3 + $0xd8] sm:$0x3] %vm1940_vm11, %v8239_v25 }
 0x1ad   : > { %v5689_v27 = vpop.permute.xlu1 %828  ;;  %968 = vrot.lane.b32.xlu2 %v8225_v39, %s4725_s30  ;;  %1969 = vst.msk [vmem:[#allocation3 + $0xe8] sm:$0x3] %vm1940_vm11, %v8239_v25 }
 0x1ae   : > { %v5695_v35 = vpop.permute.xlu0 %832  ;;  %1971 = vst.msk [vmem:[#allocation3 + $0xf8] sm:$0x3] %vm1940_vm11, %v8239_v25 }
 0x1af   : > { %v5698_v61 = vpop.permute.xlu2 %862  ;;  %1973 = vst.msk [vmem:[#allocation3 + $0x108] sm:$0x3] %vm1940_vm11, %v8239_v25 }
 0x1b0   : > { %3966 = vmatmul.msk.f32.gmra.mxu0 %vm1661_vm10, %v769_v55  ;;  %1975 = vst.msk [vmem:[#allocation3 + $0x118] sm:$0x3] %vm1940_vm11, %v8239_v25 }
 0x1b1   : > { %1977 = vst.msk [vmem:[#allocation3 + $0x128] sm:$0x3] %vm1940_vm11, %v8239_v25 }
 0x1b2   : > { %1979 = vst.msk [vmem:[#allocation3 + $0x138] sm:$0x3] %vm1940_vm11, %v8239_v25 }
 0x1b3   : > { %966 = vrot.lane.b32.xlu1 %v8226_v7, %s4725_s30  ;;  %v8244_v7 = vld [vmem:[#allocation18_spill] sm:$0xff]  ;;  %1981 = vst.msk [vmem:[#allocation3 + $0x148] sm:$0x3] %vm1940_vm11, %v8239_v25 }
 0x1b4   : > { %986 = vrot.lane.b32.xlu0 %v8227_v34, %s4726_s6  ;;  %1983 = vst.msk [vmem:[#allocation3 + $0x158] sm:$0x3] %vm1940_vm11, %v8239_v25 }
 0x1b5   : > { %v5705_v10 = vpop.permute.xlu1 %834  ;;  %990 = vrot.lane.b32.xlu2 %v8228_v30, %s4726_s6  ;;  %1985 = vst.msk [vmem:[#allocation3 + $0x168] sm:$0x3] %vm1940_vm11, %v8239_v25 }
 0x1b6   : > { %v5709_v43 = vpop.permute.xlu0 %838  ;;  %1987 = vst.msk [vmem:[#allocation3 + $0x178] sm:$0x3] %vm1940_vm11, %v8239_v25 }
 0x1b7   : > { %v5711_v14 = vpop.permute.xlu2 %876  ;;  %1989 = vst.msk [vmem:[#allocation3 + $0x188] sm:$0x3] %vm1940_vm11, %v8239_v25 }
 0x1b8   : > { %1991 = vst.msk [vmem:[#allocation3 + $0x198] sm:$0x3] %vm1940_vm11, %v8239_v25 }
 0x1b9   : > { %1993 = vst.msk [vmem:[#allocation3 + $0x1a8] sm:$0x3] %vm1940_vm11, %v8239_v25 }
 0x1ba   : > { %1995 = vst.msk [vmem:[#allocation3 + $0x1b8] sm:$0x3] %vm1940_vm11, %v8239_v25 }
 0x1bb   : > { %988 = vrot.lane.b32.xlu1 %v8229_v60, %s4726_s6  ;;  %v8245_v60 = vld [vmem:[#allocation16_spill] sm:$0xff]  ;;  %1997 = vst.msk [vmem:[#allocation3 + $0x1c8] sm:$0x3] %vm1940_vm11, %v8239_v25 }
 0x1bc   : > { %992 = vrot.lane.b32.xlu0 %v8230_v28, %s4726_s6  ;;  %1999 = vst.msk [vmem:[#allocation3 + $0x1d8] sm:$0x3] %vm1940_vm11, %v8239_v25 }
 0x1bd   : > { %v5717_v44 = vpop.permute.xlu1 %840  ;;  %996 = vrot.lane.b32.xlu2 %v8232_v2, %s4726_s6  ;;  %2001 = vst.msk [vmem:[#allocation3 + $0x1e8] sm:$0x3] %vm1940_vm11, %v8239_v25 }
 0x1be   : > { %8231 = vst [vmem:[#allocation26_spill] sm:$0xff] %v5717_v44  ;;  %v5721_v9 = vpop.permute.xlu0 %852 }
 0x1bf   : > { %v5723_v32 = vpop.permute.xlu2 %882  ;;  %2003 = vst.msk [vmem:[#allocation3 + $0x1f8] sm:$0x3] %vm1940_vm11, %v8239_v25 }
 0x1c0   : > { %2005 = vst.msk [vmem:[#allocation3 + $0x208] sm:$0x3] %vm1940_vm11, %v8239_v25 }
 0x1c1   : > { %2007 = vst.msk [vmem:[#allocation3 + $0x218] sm:$0x3] %vm1940_vm11, %v8239_v25 }
 0x1c2   : > { %2009 = vst.msk [vmem:[#allocation3 + $0x228] sm:$0x3] %vm1940_vm11, %v8239_v25 }
 0x1c3   : > { %994 = vrot.lane.b32.xlu1 %v8233_v48, %s4726_s6  ;;  %2011 = vst.msk [vmem:[#allocation3 + $0x238] sm:$0x3] %vm1940_vm11, %v8239_v25 }
 0x1c4   : > { %998 = vrot.lane.b32.xlu0 %v8234_v8, %s4726_s6  ;;  %2013 = vst.msk [vmem:[#allocation3 + $0x248] sm:$0x3] %vm1940_vm11, %v8239_v25 }
 0x1c5   : > { %v5729_v46 = vpop.permute.xlu1 %854  ;;  %1100 = vrot.lane.b32.xlu2 %v8235_v56, %s4719_s20  ;;  %2015 = vst.msk [vmem:[#allocation3 + $0x258] sm:$0x3] %vm1940_vm11, %v8239_v25 }
 0x1c6   : > { %v5733_v15 = vpop.permute.xlu0 %858  ;;  %2017 = vst.msk [vmem:[#allocation3 + $0x268] sm:$0x3] %vm1940_vm11, %v8239_v25 }
 0x1c7   : > { %v5735_v37 = vpop.permute.xlu2 %888  ;;  %2019 = vst.msk [vmem:[#allocation3 + $0x278] sm:$0x3] %vm1940_vm11, %v8239_v25 }
 0x1c8   : > { %8236 = vst [vmem:[#allocation22_spill] sm:$0xff] %v5735_v37 }
 0x1cb   : > { %1000 = vrot.lane.b32.xlu1 %v5737_v54, %s4726_s6 }
 0x1cc   : > { %1102 = vrot.lane.b32.xlu0 %v8238_v51, %s4719_s20 }
 0x1cd   : > { %v5745_v49 = vpop.permute.xlu1 %860  ;;  %1106 = vrot.lane.b32.xlu2 %v8240_v59, %s4719_s20  ;;  %v8247_v59 = vld [vmem:[#allocation20_spill] sm:$0xff] }
 0x1ce   : > { %v5751_v52 = vpop.permute.xlu0 %864 }
 0x1cf   : > { %8241 = vst [vmem:[#allocation29_spill] sm:$0xff] %v5751_v52  ;;  %v5755_v57 = vpop.permute.xlu2 %910  ;;  %v5969_v52 = vld [vmem:[#allocation2 + $0xf0] sm:$0xff] }
 0x1d3   : > { %1104 = vrot.lane.b32.xlu1 %v8242_v53, %s4719_s20 }
 0x1d4   : > { %1108 = vrot.lane.b32.xlu0 %v8243_v36, %s4719_s20  ;;  %v8248_v36 = vld [vmem:[#allocation21_spill] sm:$0xff] }
 0x1d5   : > { %v5773_v55 = vpop.permute.xlu1 %874  ;;  %1112 = vrot.lane.b32.xlu2 %v8244_v7, %s4719_s20 }
 0x1d6   : > { %v5779_v34 = vpop.permute.xlu0 %878 }
 0x1d7   : > { %v5783_v30 = vpop.permute.xlu2 %916 }
 0x1db   : > { %1110 = vrot.lane.b32.xlu1 %v8245_v60, %s4719_s20  ;;  %v8250_v60 = vld [vmem:[#allocation19_spill] sm:$0xff] }
 0x1dc   : > { %1114 = vrot.lane.b32.xlu0 %v5170_v63, %s4719_s20  ;;  %v5826_v63 = vld [vmem:[%s8041_s2] ss:$0 sm:$0xff] }
 0x1dd   : > { %v5801_v28 = vpop.permute.xlu1 %880  ;;  %1126 = vrot.lane.b32.xlu2 %v5172_v1, %s4720_s25 }
 0x1de   : > { %v5807_v2 = vpop.permute.xlu0 %884 }
 0x1df   : > { %v5811_v48 = vpop.permute.xlu2 %930 }
 0x1e3   : > { %1124 = vrot.lane.b32.xlu1 %v5162_v62, %s4720_s25 }
 0x1e4   : > { %1128 = vrot.lane.b32.xlu0 %v5186_v5, %s4720_s25 }
 0x1e5   : > { %v5834_v1 = vpop.permute.xlu1 %886  ;;  %1132 = vrot.lane.b32.xlu2 %v5188_v6, %s4720_s25 }
 0x1e6   : > { %8246 = vst [vmem:[#allocation24_spill] sm:$0xff] %v5834_v1  ;;  %v1779_v62 = vpop.f32.mrf.mxu0  ;;  %v5842_v8 = vpop.permute.xlu0 %906  ;;  %v5988_v1 = vld [vmem:[#allocation2 + $0x21] sm:$0xff] }
 0x1e7   : > { %v1780_v56 = vadd.f32 %v5826_v63, %v1779_v62  ;;  %v5847_v5 = vpop.permute.xlu2 %936 }
 0x1e9   : > { %v1875_v51 = vmul.f32 0.2, %v1780_v56 }
 0x1eb   : > { %v1907_v6 = vmax.f32 %v1780_v56, %v1875_v51  ;;  %1130 = vrot.lane.b32.xlu1 %v5176_v3, %s4720_s25 }
 0x1ec   : > { %1134 = vrot.lane.b32.xlu0 %v8247_v59, %s4720_s25 }
 0x1ed   : > { %2021 = vst.msk [vmem:[#allocation3 + $0x11] sm:$0xff] %vm225_vm0, %v1907_v6  ;;  %v5864_v53 = vpop.permute.xlu1 %908  ;;  %1138 = vrot.lane.b32.xlu2 %v8248_v36, %s4720_s25 }
 0x1ee   : > { %v5870_v7 = vpop.permute.xlu0 %912 }
 0x1ef   : > { %v5874_v3 = vpop.permute.xlu2 %942 }
 0x1f0   : > { %8249 = vst [vmem:[#allocation7_spill] sm:$0xff] %v5874_v3 }
 0x1f3   : > { %1136 = vrot.lane.b32.xlu1 %v8250_v60, %s4720_s25 }
 0x1f4   : > { %1148 = vrot.lane.b32.xlu0 %v5214_v20, %s4721_s26 }
 0x1f5   : > { %v5890_v62 = vpop.permute.xlu1 %914  ;;  %1152 = vrot.lane.b32.xlu2 %v5218_v22, %s4721_s26 }
 0x1f6   : > { %v5894_v56 = vpop.permute.xlu0 %918 }
 0x1f7   : > { %8251 = vst [vmem:[#allocation32_spill] sm:$0xff] %v5894_v56  ;;  %v5896_v51 = vpop.permute.xlu2 %956 }
 0x1fb   : > { %1150 = vrot.lane.b32.xlu1 %v5204_v18, %s4721_s26 }
 0x1fc   : > { %1154 = vrot.lane.b32.xlu0 %v5236_v31, %s4721_s26 }
 0x1fd   : > { %v5902_v6 = vpop.permute.xlu1 %920  ;;  %v1782_v25 = vpop.f32.mrf.mxu0  ;;  %1158 = vrot.lane.b32.xlu2 %v8206_v4, %s4721_s26  ;;  %v5918_v4 = vld [vmem:[#allocation2 + $0xa0] sm:$0xff] }
 0x1fe   : > { %8252 = vst [vmem:[#allocation35_spill] sm:$0xff] %v5902_v6  ;;  %v1783_v20 = vadd.f32 %v5826_v63, %v1782_v25  ;;  %v5907_v59 = vpop.permute.xlu0 %932  ;;  %v5951_v6 = vld [vmem:[#allocation2 + $0xc0] sm:$0xff] }
 0x1ff   : > { %v5909_v22 = vpop.permute.xlu2 %962 }
 0x200   : > { %v1876_v36 = vmul.f32 0.2, %v1783_v20 }
 0x202   : > { %v1908_v60 = vmax.f32 %v1783_v20, %v1876_v36 }
 0x203   : > { %1156 = vrot.lane.b32.xlu1 %v5220_v23, %s4721_s26 }
 0x204   : > { %2022 = vst.msk [vmem:[#allocation3 + $0x21] sm:$0xff] %vm225_vm0, %v1908_v60  ;;  %1160 = vrot.lane.b32.xlu0 %v8216_v50, %s4721_s26  ;;  %v8254_v60 = vld [vmem:[#allocation23_spill] sm:$0xff] }
 0x205   : > { %v5916_v18 = vpop.permute.xlu1 %934  ;;  %v1785_v31 = vpop.f32.mrf.mxu0  ;;  %1172 = vrot.lane.b32.xlu2 %v5918_v4, %s4722_s27  ;;  %v5929_v50 = vld [vmem:[#allocation3 + $0x11] sm:$0xff] }
 0x206   : > { %v1786_v25 = vadd.f32 %v5826_v63, %v1785_v31  ;;  %v5923_v54 = vpop.permute.xlu0 %938  ;;  %8255 = vst [vmem:[#allocation5_spill] sm:$0xff] %v5929_v50  ;;  %v5956_v31 = vld [vmem:[#allocation2 + $0xe0] sm:$0xff] }
 0x207   : > { %v5925_v20 = vpop.permute.xlu2 %968  ;;  %v5960_v50 = vld [vmem:[#allocation2 + $0x100] sm:$0xff] }
 0x208   : > { %8253 = vst [vmem:[#allocation33_spill] sm:$0xff] %v5925_v20  ;;  %v1877_v23 = vmul.f32 0.2, %v1786_v25 }
 0x209   : > { %8258 = vst [vmem:[#allocation6_spill] sm:$0xff] %v5960_v50 }
 0x20a   : > { %v1909_v36 = vmax.f32 %v1786_v25, %v1877_v23  ;;  %v5942_v23 = vld [vmem:[#allocation2 + $0xd0] sm:$0xff] }
 0x20b   : > { %1162 = vrot.lane.b32.xlu1 %v8254_v60, %s4721_s26  ;;  %v5931_v26 = vld [vmem:[#allocation3 + $0x21] sm:$0xff] }
 0x20c   : > { %8256 = vst [vmem:[#allocation27_spill] sm:$0xff] %v5931_v26  ;;  %1174 = vrot.lane.b32.xlu0 %v5934_v58, %s4722_s27 }
 0x20d   : > { %2023 = vst.msk [vmem:[#allocation3 + $0x31] sm:$0xff] %vm225_vm0, %v1909_v36  ;;  %v5940_v19 = vpop.permute.xlu1 %940  ;;  %v1788_v25 = vpop.f32.mrf.mxu0  ;;  %1178 = vrot.lane.b32.xlu2 %v5942_v23, %s4722_s27 }
 0x20e   : > { %v1789_v60 = vadd.f32 %v5826_v63, %v1788_v25  ;;  %v5947_v47 = vpop.permute.xlu0 %944 }
 0x20f   : > { %8257 = vst [vmem:[#allocation25_spill] sm:$0xff] %v5947_v47  ;;  %v5949_v36 = vpop.permute.xlu2 %990 }
 0x210   : > { %v1878_v16 = vmul.f32 0.2, %v1789_v60 }
 0x212   : > { %v1910_v20 = vmax.f32 %v1789_v60, %v1878_v16 }
 0x213   : > { %1176 = vrot.lane.b32.xlu1 %v5951_v6, %s4722_s27 }
 0x214   : > { %2024 = vst.msk [vmem:[#allocation3 + $0x41] sm:$0xff] %vm225_vm0, %v1910_v20  ;;  %1180 = vrot.lane.b32.xlu0 %v5956_v31, %s4722_s27  ;;  %v5973_v3 = vld [vmem:[#allocation3 + $0x31] sm:$0xff] }
 0x215   : > { %v955_v26 = vpop.permute.xlu1 %954  ;;  %v1791_v25 = vpop.f32.mrf.mxu0  ;;  %1184 = vrot.lane.b32.xlu2 %v5960_v50, %s4722_s27  ;;  %8259 = vst [vmem:[#allocation30_spill] sm:$0xff] %v5973_v3  ;;  %v1010_v50 = vsel %vm225_vm0, %v4667_v0, %v5606_v29  ;;  %v6003_v3 = vld [vmem:[#allocation2 + $0x11] sm:$0xff] }
 0x216   : > { %v1792_v16 = vadd.f32 %v5826_v63, %v1791_v25  ;;  %v5965_v60 = vpop.permute.xlu0 %958  ;;  %v1018_v25 = vsel %vm707_vm3, %v1010_v50, %v5670_v12 }
 0x217   : > { %v5967_v47 = vpop.permute.xlu2 %996 }
 0x218   : > { %v1879_v37 = vmul.f32 0.2, %v1792_v16 }
 0x21a   : > { %v1911_v20 = vmax.f32 %v1792_v16, %v1879_v37 }
 0x21b   : > { %1182 = vrot.lane.b32.xlu1 %v5969_v52, %s4722_s27  ;;  %v5975_v44 = vld [vmem:[#allocation3 + $0x41] sm:$0xff] }
 0x21c   : > { %8260 = vst [vmem:[#allocation10_spill] sm:$0xff] %v5975_v44  ;;  %1186 = vrot.lane.b32.xlu0 %v8208_v45, %s4722_s27  ;;  %v1026_v45 = vsel %vm716_vm4, %v1018_v25, %v5648_v33  ;;  %v6011_v33 = vld [vmem:[#allocation2 + $0x31] sm:$0xff] }
 0x21d   : > { %2025 = vst.msk [vmem:[#allocation3 + $0x51] sm:$0xff] %vm225_vm0, %v1911_v20  ;;  %v5986_v16 = vpop.permute.xlu1 %960  ;;  %v1794_v56 = vpop.f32.mrf.mxu0  ;;  %1198 = vrot.lane.b32.xlu2 %v5988_v1, %s4723_s28  ;;  %v1034_v12 = vsel %vm725_vm5, %v1026_v45, %v5773_v55 }
 0x21e   : > { %v1795_v0 = vadd.f32 %v5826_v63, %v1794_v56  ;;  %v5993_v29 = vpop.permute.xlu0 %964  ;;  %v1042_v50 = vsel %vm734_vm6, %v1034_v12, %v5842_v8  ;;  %v1011_v56 = vsel %vm225_vm0, %v5918_v4, %v5499_v17 }
 0x21f   : > { %v5995_v20 = vpop.permute.xlu2 %1100  ;;  %v1019_v55 = vsel %vm707_vm3, %v1011_v56, %v5689_v27  ;;  %v1050_v8 = vsel %vm743_vm7, %v1042_v50, %v5811_v48 }
 0x220   : > { %8261 = vst [vmem:[#allocation28_spill] sm:$0xff] %v5995_v20  ;;  %v1880_v37 = vmul.f32 0.2, %v1795_v0  ;;  %v1027_v17 = vsel %vm716_vm4, %v1019_v55, %v5721_v9  ;;  %v1012_v20 = vsel %vm225_vm0, %v5934_v58, %v5614_v41  ;;  %v1014_v55 = vsel %vm225_vm0, %v5942_v23, %v5532_v21  ;;  %v6052_v41 = vld [vmem:[#allocation2 + $0x61] sm:$0xff] }
 0x221   : > { %v1035_v50 = vsel %vm725_vm5, %v1027_v17, %v5711_v14  ;;  %v1022_v14 = vsel %vm707_vm3, %v1014_v55, %v5705_v10  ;;  %v1020_v21 = vsel %vm707_vm3, %v1012_v20, %v5586_v42  ;;  %v6086_v55 = vld [vmem:[#allocation2 + $0x71] sm:$0xff] }
 0x222   : > { %v1912_v44 = vmax.f32 %v1795_v0, %v1880_v37  ;;  %v6021_v0 = vld [vmem:[#allocation2 + $0x51] sm:$0xff]  ;;  %v1028_v10 = vsel %vm716_vm4, %v1020_v21, %v5729_v46  ;;  %v1015_v46 = vsel %vm225_vm0, %v5956_v31, %v5641_v38  ;;  %v1013_v38 = vsel %vm225_vm0, %v5951_v6, %v5635_v24 }
 0x223   : > { %1196 = vrot.lane.b32.xlu1 %v6003_v3, %s4723_s28  ;;  %v1036_v42 = vsel %vm725_vm5, %v1028_v10, %v5779_v34  ;;  %v1080_v10 = vld [vmem:[#allocation2 + $0x180] sm:$0xff] }
 0x224   : > { %2026 = vst.msk [vmem:[#allocation3 + $0x61] sm:$0xff] %vm225_vm0, %v1912_v44  ;;  %1200 = vrot.lane.b32.xlu0 %v6011_v33, %s4723_s28  ;;  %v1058_v44 = vsel %vm752_vm9, %v1050_v8, %v955_v26  ;;  %v1043_v26 = vsel %vm734_vm6, %v1035_v50, %v5864_v53  ;;  %v1030_v53 = vsel %vm716_vm4, %v1022_v14, %v5733_v15 }
 0x225   : > { %v6019_v37 = vpop.permute.xlu1 %966  ;;  %v1797_v25 = vpop.f32.mrf.mxu0  ;;  %1204 = vrot.lane.b32.xlu2 %v6021_v0, %s4723_s28  ;;  %v1051_v8 = vsel %vm743_vm7, %v1043_v26, %v5907_v59  ;;  %v1044_v34 = vsel %vm734_vm6, %v1036_v42, %v5755_v57  ;;  %v1023_v57 = vsel %vm707_vm3, %v1015_v46, %v5617_v13  ;;  %v6154_v46 = vld [vmem:[#allocation2 + $0x1c0] sm:$0xff] }
 0x226   : > { %v1798_v45 = vadd.f32 %v5826_v63, %v1797_v25  ;;  %v987_v12 = vpop.permute.xlu0 %986  ;;  %v6045_v25 = vld [vmem:[#allocation2 + $0x41] sm:$0xff] }
 0x227   : > { %v1066_v27 = vsel %vm761_vm8, %v1058_v44, %v987_v12  ;;  %v6030_v56 = vpop.permute.xlu2 %1106  ;;  %v1059_v12 = vsel %vm752_vm9, %v1051_v8, %v5896_v51 }
 0x228   : > { %v1881_v48 = vmul.f32 0.2, %v1798_v45  ;;  %3967 = vmatmul.msk.f32.gmra.mxu0 %vm1661_vm10, %v1066_v27  ;;  %v1038_v27 = vsel %vm725_vm5, %v1030_v53, %v5723_v32  ;;  %v1052_v32 = vsel %vm743_vm7, %v1044_v34, %v5916_v18  ;;  %v1031_v18 = vsel %vm716_vm4, %v1023_v57, %v5745_v49 }
 0x229   : > { %v1046_v51 = vsel %vm734_vm6, %v1038_v27, %v5890_v62  ;;  %v1021_v62 = vsel %vm707_vm3, %v1013_v38, %v5695_v35  ;;  %v1039_v13 = vsel %vm725_vm5, %v1031_v18, %v5807_v2  ;;  %v8263_v27 = vld [vmem:[#allocation32_spill] sm:$0xff] }
 0x22a   : > { %v1913_v9 = vmax.f32 %v1798_v45, %v1881_v48  ;;  %v1075_v48 = vld [vmem:[#allocation2 + $0x130] sm:$0xff]  ;;  %v1054_v50 = vsel %vm743_vm7, %v1046_v51, %v5923_v54  ;;  %v1060_v54 = vsel %vm752_vm9, %v1052_v32, %v5965_v60  ;;  %v1029_v49 = vsel %vm716_vm4, %v1021_v62, %v5674_v11  ;;  %v8264_v51 = vld [vmem:[#allocation51_spill] sm:$0xff] }
 0x22b   : > { %1202 = vrot.lane.b32.xlu1 %v6045_v25, %s4723_s28  ;;  %v1062_v24 = vsel %vm752_vm9, %v1054_v50, %v5909_v22  ;;  %v1068_v35 = vsel %vm761_vm8, %v1060_v54, %v5949_v36  ;;  %v1076_v22 = vld [vmem:[#allocation2 + $0x140] sm:$0xff]  ;;  %v1037_v53 = vsel %vm725_vm5, %v1029_v49, %v5801_v28  ;;  %v1047_v2 = vsel %vm734_vm6, %v1039_v13, %v5783_v30  ;;  %v8267_v50 = vld [vmem:[#allocation7_spill] sm:$0xff]  ;;  %v8271_v49 = vld [vmem:[#allocation25_spill] sm:$0xff] }
 0x22c   : > { %2027 = vst.msk [vmem:[#allocation3 + $0x71] sm:$0xff] %vm225_vm0, %v1913_v9  ;;  %1206 = vrot.lane.b32.xlu0 %v6052_v41, %s4723_s28  ;;  %v1077_v9 = vld [vmem:[#allocation2 + $0x150] sm:$0xff]  ;;  %v1055_v36 = vsel %vm743_vm7, %v1047_v2, %v5940_v19  ;;  %v1016_v11 = vsel %vm225_vm0, %v5969_v52, %v5666_v40  ;;  %v1082_v13 = vld [vmem:[#allocation2 + $0x1a0] sm:$0xff]  ;;  %v8273_v2 = vld [vmem:[#allocation33_spill] sm:$0xff] }
 0x22d   : > { %v989_v59 = vpop.permute.xlu1 %988  ;;  %v1800_v17 = vpop.f32.mrf.mxu0  ;;  %1210 = vrot.lane.b32.xlu2 %v8225_v39, %s4723_s28  ;;  %v1024_v30 = vsel %vm707_vm3, %v1016_v11, %v5709_v43  ;;  %v6204_v11 = vld [vmem:[#allocation2 + $0x1e0] sm:$0xff] }
 0x22e   : > { %v1801_v44 = vadd.f32 %v5826_v63, %v1800_v17  ;;  %v993_v45 = vpop.permute.xlu0 %992  ;;  %v1067_v20 = vsel %vm761_vm8, %v1059_v12, %v989_v59  ;;  %v1078_v59 = vld [vmem:[#allocation2 + $0x160] sm:$0xff]  ;;  %v1045_v17 = vsel %vm734_vm6, %v1037_v53, %v5870_v7  ;;  %v1032_v12 = vsel %vm716_vm4, %v1024_v30, %v5698_v61  ;;  %v8265_v61 = vld [vmem:[#allocation6_spill] sm:$0xff] }
 0x22f   : > { %v6070_v15 = vpop.permute.xlu2 %1112  ;;  %v1053_v28 = vsel %vm743_vm7, %v1045_v17, %v5847_v5  ;;  %v8262_v5 = vld [vmem:[#allocation24_spill] sm:$0xff]  ;;  %v6187_v53 = vld [vmem:[#allocation2 + $0x1f0] sm:$0xff] }
 0x230   : > { %v1882_v39 = vmul.f32 0.2, %v1801_v44  ;;  %3968 = vmatmul.msk.f32.gmra.mxu0 %vm1661_vm10, %v1067_v20  ;;  %v1061_v19 = vsel %vm752_vm9, %v1053_v28, %v5986_v16  ;;  %v1040_v20 = vsel %vm725_vm5, %v1032_v12, %v8262_v5  ;;  %v1079_v16 = vld [vmem:[#allocation2 + $0x170] sm:$0xff]  ;;  %8272 = vst [vmem:[#allocation39_spill] sm:$0xff] %v6187_v53  ;;  %v6208_v30 = vld [vmem:[#allocation2 + $0x220] sm:$0xff] }
 0x231   : > { %v1069_v43 = vsel %vm761_vm8, %v1061_v19, %v993_v45  ;;  %v8266_v45 = vld [vmem:[#allocation26_spill] sm:$0xff]  ;;  %8274 = vst [vmem:[#allocation8_spill] sm:$0xff] %v6208_v30 }
 0x232   : > { %v1914_v26 = vmax.f32 %v1801_v44, %v1882_v39  ;;  %v1063_v44 = vsel %vm752_vm9, %v1055_v36, %v5993_v29  ;;  %v1081_v39 = vld [vmem:[#allocation2 + $0x190] sm:$0xff] }
 0x233   : > { %1208 = vrot.lane.b32.xlu1 %v6086_v55, %s4723_s28  ;;  %v1071_v40 = vsel %vm761_vm8, %v1063_v44, %v5967_v47  ;;  %v1048_v47 = vsel %vm734_vm6, %v1040_v20, %v8263_v27  ;;  %v6206_v44 = vld [vmem:[#allocation2 + $0x200] sm:$0xff]  ;;  %v6224_v12 = vld [vmem:[#allocation2 + $0x230] sm:$0xff] }
 0x234   : > { %2028 = vst.msk [vmem:[#allocation3 + $0x81] sm:$0xff] %vm225_vm0, %v1914_v26  ;;  %1228 = vrot.lane.b32.xlu0 %v1075_v48, %s4724_s29  ;;  %v1017_v48 = vsel %vm225_vm0, %v8265_v61, %v8264_v51  ;;  %v1056_v26 = vsel %vm743_vm7, %v1048_v47, %v8267_v50  ;;  %v6240_v27 = vld [vmem:[#allocation2 + $0x131] sm:$0xff]  ;;  %v6260_v50 = vld [vmem:[#allocation2 + $0x181] sm:$0xff] }
 0x235   : > { %v995_v8 = vpop.permute.xlu1 %994  ;;  %1232 = vrot.lane.b32.xlu2 %v1077_v9, %s4724_s29  ;;  %v1025_v34 = vsel %vm707_vm3, %v1017_v48, %v8266_v45  ;;  %v8268_v9 = vld [vmem:[#allocation29_spill] sm:$0xff]  ;;  %v1064_v38 = vsel %vm752_vm9, %v1056_v26, %v6019_v37  ;;  %8276 = vst [vmem:[#allocation42_spill] sm:$0xff] %v6224_v12  ;;  %v6242_v47 = vld [vmem:[#allocation2 + $0x151] sm:$0xff] }
 0x236   : > { %v1070_v60 = vsel %vm761_vm8, %v1062_v24, %v995_v8  ;;  %v999_v14 = vpop.permute.xlu0 %998  ;;  %v1033_v32 = vsel %vm716_vm4, %v1025_v34, %v8268_v9  ;;  %v8269_v8 = vld [vmem:[#allocation22_spill] sm:$0xff]  ;;  %8278 = vst [vmem:[#allocation11_spill] sm:$0xff] %v6240_v27  ;;  %v6258_v34 = vld [vmem:[#allocation2 + $0x161] sm:$0xff] }
 0x237   : > { %3971 = vmatmul.msk.f32.vlgmr.msra.gmra.mxu1 %vm1661_vm10, %v1070_v60  ;;  %v6112_v21 = vpop.permute.xlu2 %1126  ;;  %v1072_v54 = vsel %vm761_vm8, %v1064_v38, %v999_v14  ;;  %v1041_v24 = vsel %vm725_vm5, %v1033_v32, %v8269_v8  ;;  %v8270_v60 = vld [vmem:[#allocation35_spill] sm:$0xff]  ;;  %8279 = vst [vmem:[#allocation36_spill] sm:$0xff] %v6242_v47  ;;  %v6262_v26 = vld [vmem:[#allocation2 + $0x1a1] sm:$0xff] }
 0x238   : > { %3969 = vmatmul.msk.f32.gmra.mxu0 %vm1661_vm10, %v1068_v35  ;;  %v1049_v37 = vsel %vm734_vm6, %v1041_v24, %v8270_v60  ;;  %v6183_v35 = vld [vmem:[#allocation2 + $0x1d0] sm:$0xff]  ;;  %8282 = vst [vmem:[#allocation40_spill] sm:$0xff] %v6258_v34  ;;  %v4675_v8 = vld [vmem:[#allocation2 + $0x121] sm:$0xff] }
 0x239   : > { %8283 = vst [vmem:[#allocation41_spill] sm:$0xff] %v6260_v50 }
 0x23a   : > { %8284 = vst [vmem:[#allocation38_spill] sm:$0xff] %v6262_v26 }
 0x23b   : > { %1230 = vrot.lane.b32.xlu1 %v1076_v22, %s4724_s29  ;;  %v1057_v22 = vsel %vm743_vm7, %v1049_v37, %v8271_v49  ;;  %v4677_v49 = vld [vmem:[#allocation2 + $0x131] sm:$0xff] }
 0x23c   : > { %1234 = vrot.lane.b32.xlu0 %v1078_v59, %s4724_s29  ;;  %v1065_v59 = vsel %vm752_vm9, %v1057_v22, %v8273_v2  ;;  %v4678_v22 = vld [vmem:[#allocation2 + $0x151] sm:$0xff] }
 0x23d   : > { %v1001_v7 = vpop.permute.xlu1 %1000  ;;  %1238 = vrot.lane.b32.xlu2 %v1080_v10, %s4724_s29 }
 0x23e   : > { %v6141_v29 = vpop.permute.xlu0 %1102  ;;  %v1073_v17 = vsel %vm761_vm8, %v1065_v59, %v1001_v7  ;;  %v4679_v59 = vld [vmem:[#allocation2 + $0x171] sm:$0xff] }
 0x23f   : > { %3972 = vmatmul.msk.f32.gmra.mxu1 %vm1661_vm10, %v1071_v40  ;;  %v6147_v42 = vpop.permute.xlu2 %1132  ;;  %v6222_v40 = vld [vmem:[#allocation2 + $0x210] sm:$0xff] }
 0x240   : > { %3970 = vmatmul.msk.f32.gmra.mxu0 %vm1661_vm10, %v1069_v43  ;;  %8275 = vst [vmem:[#allocation9_spill] sm:$0xff] %v6222_v40  ;;  %v6226_v43 = vld [vmem:[#allocation2 + $0x141] sm:$0xff] }
 0x241   : > { %8277 = vst [vmem:[#allocation31_spill] sm:$0xff] %v6226_v43 }
 0x243   : > { %1236 = vrot.lane.b32.xlu1 %v1079_v16, %s4724_s29 }
 0x244   : > { %1240 = vrot.lane.b32.xlu0 %v1081_v39, %s4724_s29  ;;  %v6244_v39 = vld [vmem:[#allocation2 + $0x171] sm:$0xff] }
 0x245   : > { %v6169_v57 = vpop.permute.xlu1 %1104  ;;  %1260 = vrot.lane.b32.xlu2 %v6154_v46, %s4725_s30  ;;  %8280 = vst [vmem:[#allocation37_spill] sm:$0xff] %v6244_v39 }
 0x246   : > { %v6174_v62 = vpop.permute.xlu0 %1108 }
 0x247   : > { %3973 = vmatmul.msk.f32.gmra.mxu1 %vm1661_vm10, %v1072_v54  ;;  %v6177_v18 = vpop.permute.xlu2 %1138  ;;  %v6276_v54 = vld [vmem:[#allocation2 + $0x191] sm:$0xff] }
 0x248   : > { %8285 = vst [vmem:[#allocation43_spill] sm:$0xff] %v6276_v54 }
 0x24b   : > { %1242 = vrot.lane.b32.xlu1 %v1082_v13, %s4724_s29  ;;  %v4676_v13 = vld [vmem:[#allocation2 + $0x141] sm:$0xff] }
 0x24c   : > { %1262 = vrot.lane.b32.xlu0 %v6183_v35, %s4725_s30 }
 0x24d   : > { %v6192_v14 = vpop.permute.xlu1 %1110  ;;  %1266 = vrot.lane.b32.xlu2 %v6187_v53, %s4725_s30 }
 0x24e   : > { %v6199_v36 = vpop.permute.xlu0 %1114 }
 0x24f   : > { %3974 = vmatmul.msk.f32.gmra.mxu1 %vm1661_vm10, %v1073_v17  ;;  %v6202_v10 = vpop.permute.xlu2 %1152 }
 0x253   : > { %1264 = vrot.lane.b32.xlu1 %v6204_v11, %s4725_s30 }
 0x254   : > { %1268 = vrot.lane.b32.xlu0 %v6206_v44, %s4725_s30 }
 0x255   : > { %v6214_v28 = vpop.permute.xlu1 %1124  ;;  %1272 = vrot.lane.b32.xlu2 %v6208_v30, %s4725_s30 }
 0x256   : > { %v6218_v7 = vpop.permute.xlu0 %1128 }
 0x257   : > { %v6220_v19 = vpop.permute.xlu2 %1158 }
 0x25b   : > { %1270 = vrot.lane.b32.xlu1 %v6222_v40, %s4725_s30 }
 0x25c   : > { %1274 = vrot.lane.b32.xlu0 %v6224_v12, %s4725_s30  ;;  %v8296_v12 = vld [vmem:[#allocation52_spill] sm:$0xff] }
 0x25d   : > { %v6232_v5 = vpop.permute.xlu1 %1130  ;;  %1294 = vrot.lane.b32.xlu2 %v6226_v43, %s4726_s6 }
 0x25e   : > { %v6236_v20 = vpop.permute.xlu0 %1134 }
 0x25f   : > { %v6238_v16 = vpop.permute.xlu2 %1172 }
 0x263   : > { %1292 = vrot.lane.b32.xlu1 %v6240_v27, %s4726_s6 }
 0x264   : > { %1296 = vrot.lane.b32.xlu0 %v6242_v47, %s4726_s6  ;;  %v8293_v47 = vld [vmem:[#allocation49_spill] sm:$0xff] }
 0x265   : > { %v6250_v51 = vpop.permute.xlu1 %1136  ;;  %1300 = vrot.lane.b32.xlu2 %v6244_v39, %s4726_s6 }
 0x266   : > { %v6254_v48 = vpop.permute.xlu0 %1148 }
 0x267   : > { %v6256_v45 = vpop.permute.xlu2 %1178 }
 0x268   : > { %8281 = vst [vmem:[#allocation34_spill] sm:$0xff] %v6256_v45 }
 0x26b   : > { %1298 = vrot.lane.b32.xlu1 %v6258_v34, %s4726_s6 }
 0x26c   : > { %1302 = vrot.lane.b32.xlu0 %v6260_v50, %s4726_s6  ;;  %v8289_v50 = vld [vmem:[#allocation46_spill] sm:$0xff] }
 0x26d   : > { %v6268_v9 = vpop.permute.xlu1 %1150  ;;  %1306 = vrot.lane.b32.xlu2 %v6262_v26, %s4726_s6  ;;  %v4681_v26 = vld [vmem:[#allocation2 + $0x181] sm:$0xff] }
 0x26e   : > { %v6272_v32 = vpop.permute.xlu0 %1154 }
 0x26f   : > { %v6274_v38 = vpop.permute.xlu2 %1184 }
 0x273   : > { %1304 = vrot.lane.b32.xlu1 %v6276_v54, %s4726_s6 }
 0x274   : > { %1388 = vrot.lane.b32.xlu0 %v4675_v8, %s4719_s20 }
 0x275   : > { %v6281_v24 = vpop.permute.xlu1 %1156  ;;  %1392 = vrot.lane.b32.xlu2 %v4676_v13, %s4719_s20  ;;  %v4680_v13 = vld [vmem:[#allocation2 + $0x161] sm:$0xff] }
 0x276   : > { %v6284_v60 = vpop.permute.xlu0 %1160 }
 0x277   : > { %v6286_v37 = vpop.permute.xlu2 %1198 }
 0x27b   : > { %1390 = vrot.lane.b32.xlu1 %v4677_v49, %s4719_s20  ;;  %v8287_v49 = vld [vmem:[#allocation44_spill] sm:$0xff] }
 0x27c   : > { %1394 = vrot.lane.b32.xlu0 %v4678_v22, %s4719_s20 }
 0x27d   : > { %v6290_v2 = vpop.permute.xlu1 %1162  ;;  %1398 = vrot.lane.b32.xlu2 %v4679_v59, %s4719_s20  ;;  %v4682_v59 = vld [vmem:[#allocation2 + $0x191] sm:$0xff] }
 0x27e   : > { %8286 = vst [vmem:[#allocation12_spill] sm:$0xff] %v6290_v2  ;;  %v6293_v17 = vpop.permute.xlu0 %1174 }
 0x27f   : > { %v6295_v8 = vpop.permute.xlu2 %1204 }
 0x283   : > { %1396 = vrot.lane.b32.xlu1 %v4680_v13, %s4719_s20  ;;  %v8290_v13 = vld [vmem:[#allocation47_spill] sm:$0xff] }
 0x284   : > { %1400 = vrot.lane.b32.xlu0 %v4681_v26, %s4719_s20 }
 0x285   : > { %v6299_v54 = vpop.permute.xlu1 %1176  ;;  %1412 = vrot.lane.b32.xlu2 %v8287_v49, %s4720_s25  ;;  %v8292_v49 = vld [vmem:[#allocation45_spill] sm:$0xff] }
 0x286   : > { %v6303_v22 = vpop.permute.xlu0 %1180 }
 0x287   : > { %v6305_v39 = vpop.permute.xlu2 %1210 }
 0x288   : > { %8288 = vst [vmem:[#allocation14_spill] sm:$0xff] %v6305_v39 }
 0x28b   : > { %1402 = vrot.lane.b32.xlu1 %v4682_v59, %s4719_s20  ;;  %v8294_v59 = vld [vmem:[#allocation50_spill] sm:$0xff] }
 0x28c   : > { %1414 = vrot.lane.b32.xlu0 %v8289_v50, %s4720_s25 }
 0x28d   : > { %v6310_v34 = vpop.permute.xlu1 %1182  ;;  %1418 = vrot.lane.b32.xlu2 %v8290_v13, %s4720_s25  ;;  %v8295_v13 = vld [vmem:[#allocation48_spill] sm:$0xff] }
 0x28e   : > { %v6314_v26 = vpop.permute.xlu0 %1186 }
 0x28f   : > { %8291 = vst [vmem:[#allocation15_spill] sm:$0xff] %v6314_v26  ;;  %v6316_v43 = vpop.permute.xlu2 %1232 }
 0x293   : > { %1416 = vrot.lane.b32.xlu1 %v8292_v49, %s4720_s25 }
 0x294   : > { %1420 = vrot.lane.b32.xlu0 %v8293_v47, %s4720_s25 }
 0x295   : > { %v6322_v27 = vpop.permute.xlu1 %1196  ;;  %1424 = vrot.lane.b32.xlu2 %v8294_v59, %s4720_s25 }
 0x296   : > { %v6326_v50 = vpop.permute.xlu0 %1200 }
 0x297   : > { %v6328_v30 = vpop.permute.xlu2 %1238 }
 0x29b   : > { %1422 = vrot.lane.b32.xlu1 %v8295_v13, %s4720_s25 }
 0x29c   : > { %1426 = vrot.lane.b32.xlu0 %v8296_v12, %s4720_s25 }
 0x29d   : > { %v6334_v40 = vpop.permute.xlu1 %1202  ;;  %1438 = vrot.lane.b32.xlu2 %v5934_v58, %s4721_s26 }
 0x29e   : > { %8297 = vst [vmem:[#allocation13_spill] sm:$0xff] %v6334_v40  ;;  %v6338_v47 = vpop.permute.xlu0 %1206 }
 0x29f   : > { %v6340_v49 = vpop.permute.xlu2 %1260 }
 0x2a3   : > { %1436 = vrot.lane.b32.xlu1 %v5918_v4, %s4721_s26 }
 0x2a4   : > { %1440 = vrot.lane.b32.xlu0 %v5951_v6, %s4721_s26 }
 0x2a5   : > { %v6346_v59 = vpop.permute.xlu1 %1208  ;;  %v1803_v13 = vpop.f32.mrf.mxu0  ;;  %1444 = vrot.lane.b32.xlu2 %v5956_v31, %s4721_s26  ;;  %v4683_v31 = vld [vmem:[#allocation2 + $0x110] sm:$0xff] }
 0x2a6   : > { %v1804_v12 = vadd.f32 %v5826_v63, %v1803_v13  ;;  %v6351_v53 = vpop.permute.xlu0 %1228 }
 0x2a7   : > { %v6353_v58 = vpop.permute.xlu2 %1266 }
 0x2a8   : > { %8298 = vst [vmem:[#allocation17_spill] sm:$0xff] %v6353_v58  ;;  %v1883_v39 = vmul.f32 0.2, %v1804_v12 }
 0x2aa   : > { %v1915_v40 = vmax.f32 %v1804_v12, %v1883_v39 }
 0x2ab   : > { %1442 = vrot.lane.b32.xlu1 %v5942_v23, %s4721_s26 }
 0x2ac   : > { %2030 = vst.msk [vmem:[#allocation3 + $0xb1] sm:$0xff] %vm225_vm0, %v1915_v40  ;;  %1446 = vrot.lane.b32.xlu0 %v5969_v52, %s4721_s26 }
 0x2ad   : > { %v6360_v6 = vpop.permute.xlu1 %1230  ;;  %v1806_v4 = vpop.f32.mrf.mxu0  ;;  %1450 = vrot.lane.b32.xlu2 %v4683_v31, %s4721_s26 }
 0x2ae   : > { %v1807_v13 = vadd.f32 %v5826_v63, %v1806_v4  ;;  %v6364_v45 = vpop.permute.xlu0 %1234 }
 0x2af   : > { %8299 = vst [vmem:[#allocation18_spill] sm:$0xff] %v6364_v45  ;;  %v6366_v58 = vpop.permute.xlu2 %1272 }
 0x2b0   : > { %8300 = vst [vmem:[#allocation16_spill] sm:$0xff] %v6366_v58  ;;  %v1884_v39 = vmul.f32 0.2, %v1807_v13 }
 0x2b2   : > { %v1916_v12 = vmax.f32 %v1807_v13, %v1884_v39 }
 0x2b3   : > { %1448 = vrot.lane.b32.xlu1 %v8265_v61, %s4721_s26  ;;  %v6381_v58 = vld [vmem:[#allocation3 + $0xb1] sm:$0xff] }
 0x2b4   : > { %2031 = vst.msk [vmem:[#allocation3 + $0xc1] sm:$0xff] %vm225_vm0, %v1916_v12  ;;  %v1815_v52 = vpop.f32.mrf.mxu1  ;;  %1460 = vrot.lane.b32.xlu0 %v6003_v3, %s4722_s27 }
 0x2b5   : > { %v1816_v23 = vadd.f32 %v5826_v63, %v1815_v52  ;;  %v1237_v40 = vpop.permute.xlu1 %1236  ;;  %v1809_v31 = vpop.f32.mrf.mxu0  ;;  %1464 = vrot.lane.b32.xlu2 %v6011_v33, %s4722_s27  ;;  %8301 = vst [vmem:[#allocation20_spill] sm:$0xff] %v6381_v58  ;;  %v6388_v33 = vld [vmem:[#allocation3 + $0xb2] sm:$0xff] }
 0x2b6   : > { %v1810_v4 = vadd.f32 %v5826_v63, %v1809_v31  ;;  %v6377_v45 = vpop.permute.xlu0 %1240  ;;  %8303 = vst [vmem:[#allocation19_spill] sm:$0xff] %v6388_v33 }
 0x2b7   : > { %v1887_v13 = vmul.f32 0.2, %v1816_v23  ;;  %v6379_v39 = vpop.permute.xlu2 %1294 }
 0x2b8   : > { %v1885_v61 = vmul.f32 0.2, %v1810_v4 }
 0x2b9   : > { %v1919_v12 = vmax.f32 %v1816_v23, %v1887_v13  ;;  %v4684_v13 = vld [vmem:[#allocation2 + $0x160] sm:$0xff] }
 0x2ba   : > { %v1917_v26 = vmax.f32 %v1810_v4, %v1885_v61 }
 0x2bb   : > { %2034 = vst.msk [vmem:[#allocation3 + $0xf1] sm:$0xff] %vm225_vm0, %v1919_v12  ;;  %1462 = vrot.lane.b32.xlu1 %v5988_v1, %s4722_s27  ;;  %v6386_v3 = vld [vmem:[#allocation3 + $0xc1] sm:$0xff]  ;;  %v1320_v1 = vsel %vm225_vm0, %v4684_v13, %v6174_v62 }
 0x2bc   : > { %8302 = vst [vmem:[#allocation21_spill] sm:$0xff] %v6386_v3  ;;  %v6390_v52 = vld [vmem:[#allocation3 + $0xc2] sm:$0xff]  ;;  %v1818_v31 = vpop.f32.mrf.mxu1  ;;  %1466 = vrot.lane.b32.xlu0 %v6045_v25, %s4722_s27  ;;  %v1328_v4 = vsel %vm707_vm3, %v1320_v1, %v6147_v42 }
 0x2bd   : > { %8304 = vst [vmem:[#allocation23_spill] sm:$0xff] %v6390_v52  ;;  %v1819_v61 = vadd.f32 %v5826_v63, %v1818_v31  ;;  %v6402_v12 = vpop.permute.xlu1 %1242  ;;  %v1812_v2 = vpop.f32.mrf.mxu0  ;;  %1470 = vrot.lane.b32.xlu2 %v6052_v41, %s4722_s27  ;;  %v1336_v62 = vsel %vm716_vm4, %v1328_v4, %v6281_v24 }
 0x2be   : > { %2032 = vst.msk [vmem:[#allocation3 + $0xd1] sm:$0xff] %vm225_vm0, %v1917_v26  ;;  %v1813_v25 = vadd.f32 %v5826_v63, %v1812_v2  ;;  %v6407_v26 = vpop.permute.xlu0 %1262  ;;  %v1344_v13 = vsel %vm725_vm5, %v1336_v62, %v6303_v22  ;;  %v4685_v22 = vld [vmem:[#allocation2 + $0xa1] sm:$0xff] }
 0x2bf   : > { %v1888_v23 = vmul.f32 0.2, %v1819_v61  ;;  %v1301_v3 = vpop.permute.xlu2 %1300  ;;  %v1352_v42 = vsel %vm734_vm6, %v1344_v13, %v6295_v8  ;;  %v4686_v62 = vld [vmem:[#allocation2 + $0x120] sm:$0xff] }
 0x2c0   : > { %v1886_v52 = vmul.f32 0.2, %v1813_v25 }
 0x2c1   : > { %v1920_v31 = vmax.f32 %v1819_v61, %v1888_v23 }
 0x2c2   : > { %v1918_v33 = vmax.f32 %v1813_v25, %v1886_v52  ;;  %v1360_v52 = vsel %vm743_vm7, %v1352_v42, %v1237_v40  ;;  %v6433_v8 = vld [vmem:[#allocation3 + $0xf0] sm:$0xff] }
 0x2c3   : > { %2035 = vst.msk [vmem:[#allocation3 + $0x101] sm:$0xff] %vm225_vm0, %v1920_v31  ;;  %1468 = vrot.lane.b32.xlu1 %v6021_v0, %s4722_s27  ;;  %v6435_v61 = vld [vmem:[#allocation3 + $0xf1] sm:$0xff]  ;;  %v8308_v31 = vld [vmem:[#allocation28_spill] sm:$0xff] }
 0x2c4   : > { %2033 = vst.msk [vmem:[#allocation3 + $0xe1] sm:$0xff] %vm225_vm0, %v1918_v33  ;;  %v1821_v41 = vpop.f32.mrf.mxu1  ;;  %1472 = vrot.lane.b32.xlu0 %v6086_v55, %s4722_s27  ;;  %v6437_v25 = vld [vmem:[#allocation3 + $0xf2] sm:$0xff]  ;;  %v1316_v40 = vsel %vm225_vm0, %v4686_v62, %v8308_v31 }
 0x2c5   : > { %v1822_v24 = vadd.f32 %v5826_v63, %v1821_v41  ;;  %v6424_v2 = vpop.permute.xlu1 %1264  ;;  %1484 = vrot.lane.b32.xlu2 %v4685_v22, %s4723_s28  ;;  %8305 = vst [vmem:[#allocation24_spill] sm:$0xff] %v6433_v8  ;;  %v4688_v62 = vld [vmem:[#allocation2 + $0xb1] sm:$0xff] }
 0x2c6   : > { %v1269_v23 = vpop.permute.xlu0 %1268  ;;  %8306 = vst [vmem:[#allocation32_spill] sm:$0xff] %v6435_v61  ;;  %v6464_v31 = vld [vmem:[#allocation3 + $0xd2] sm:$0xff] }
 0x2c7   : > { %v1889_v0 = vmul.f32 0.2, %v1822_v24  ;;  %v1368_v33 = vsel %vm752_vm9, %v1360_v52, %v1269_v23  ;;  %v6429_v4 = vpop.permute.xlu2 %1306  ;;  %8307 = vst [vmem:[#allocation51_spill] sm:$0xff] %v6437_v25  ;;  %v4689_v61 = vld [vmem:[#allocation2 + $0xd1] sm:$0xff] }
 0x2c8   : > { %v1376_v55 = vsel %vm761_vm8, %v1368_v33, %v1301_v3  ;;  %v4687_v3 = vld [vmem:[#allocation2 + $0x81] sm:$0xff]  ;;  %8315 = vst [vmem:[#allocation25_spill] sm:$0xff] %v6464_v31  ;;  %v4690_v25 = vld [vmem:[#allocation2 + $0x130] sm:$0xff] }
 0x2c9   : > { %v1921_v1 = vmax.f32 %v1822_v24, %v1889_v0  ;;  %3979 = vmatmul.msk.f32.vlgmr.msra.gmra.mxu3 %vm1661_vm10, %v1376_v55  ;;  %v6449_v24 = vld [vmem:[#allocation3 + $0xd0] sm:$0xff]  ;;  %v1324_v55 = vsel %vm707_vm3, %v1316_v40, %v6214_v28 }
 0x2ca   : > { %v6441_v13 = vld [vmem:[#allocation3 + $0x100] sm:$0xff]  ;;  %8312 = vst [vmem:[#allocation29_spill] sm:$0xff] %v6449_v24  ;;  %v1332_v23 = vsel %vm716_vm4, %v1324_v55, %v6254_v48  ;;  %v1317_v48 = vsel %vm225_vm0, %v4690_v25, %v6141_v29  ;;  %v4692_v28 = vld [vmem:[#allocation2 + $0x170] sm:$0xff] }
 0x2cb   : > { %8309 = vst [vmem:[#allocation6_spill] sm:$0xff] %v6441_v13  ;;  %v6443_v41 = vld [vmem:[#allocation3 + $0x101] sm:$0xff]  ;;  %1474 = vrot.lane.b32.xlu1 %v4687_v3, %s4722_s27  ;;  %v1340_v3 = vsel %vm725_vm5, %v1332_v23, %v6238_v16  ;;  %v1321_v16 = vsel %vm225_vm0, %v4692_v28, %v6192_v14  ;;  %v1325_v23 = vsel %vm707_vm3, %v1317_v48, %v6112_v21 }
 0x2cc   : > { %8310 = vst [vmem:[#allocation26_spill] sm:$0xff] %v6443_v41  ;;  %v6445_v42 = vld [vmem:[#allocation3 + $0x102] sm:$0xff]  ;;  %1486 = vrot.lane.b32.xlu0 %v4688_v62, %s4723_s28 }
 0x2cd   : > { %8311 = vst [vmem:[#allocation7_spill] sm:$0xff] %v6445_v42  ;;  %v6451_v22 = vld [vmem:[#allocation3 + $0xe0] sm:$0xff]  ;;  %v1271_v41 = vpop.permute.xlu1 %1270  ;;  %1490 = vrot.lane.b32.xlu2 %v4689_v61, %s4723_s28 }
 0x2ce   : > { %2036 = vst.msk [vmem:[#allocation3 + $0x111] sm:$0xff] %vm225_vm0, %v1921_v1  ;;  %v6453_v52 = vld [vmem:[#allocation3 + $0xe2] sm:$0xff]  ;;  %v1824_v1 = vpop.f32.mrf.mxu1  ;;  %v6474_v40 = vpop.permute.xlu0 %1274 }
 0x2cf   : > { %8313 = vst [vmem:[#allocation22_spill] sm:$0xff] %v6451_v22  ;;  %v1825_v0 = vadd.f32 %v5826_v63, %v1824_v1  ;;  %v6476_v33 = vpop.permute.xlu2 %1392  ;;  %v1348_v63 = vsel %vm734_vm6, %v1340_v3, %v6322_v27  ;;  %v4691_v1 = vld [vmem:[#allocation2 + $0xc1] sm:$0xff]  ;;  %v1329_v27 = vsel %vm707_vm3, %v1321_v16, %v6236_v20 }
 0x2d0   : > { %8314 = vst [vmem:[#allocation35_spill] sm:$0xff] %v6453_v52  ;;  %v1356_v61 = vsel %vm743_vm7, %v1348_v63, %v6351_v53  ;;  %v4693_v29 = vld [vmem:[#allocation2 + $0xe1] sm:$0xff]  ;;  %v1333_v53 = vsel %vm716_vm4, %v1325_v23, %v6268_v9  ;;  %v1337_v20 = vsel %vm716_vm4, %v1329_v27, %v6220_v19  ;;  %v4696_v19 = vld [vmem:[#allocation2 + $0xf1] sm:$0xff] }
 0x2d1   : > { %v1890_v62 = vmul.f32 0.2, %v1825_v0  ;;  %v4694_v3 = vld [vmem:[#allocation2 + $0x101] sm:$0xff]  ;;  %v1341_v14 = vsel %vm725_vm5, %v1333_v53, %v6293_v17  ;;  %v1345_v9 = vsel %vm725_vm5, %v1337_v20, %v6310_v34  ;;  %v4699_v53 = vld [vmem:[#allocation2 + $0x150] sm:$0xff] }
 0x2d2   : > { %v1353_v48 = vsel %vm734_vm6, %v1345_v9, %v6338_v47  ;;  %v4695_v63 = vld [vmem:[#allocation2 + $0x140] sm:$0xff]  ;;  %v8322_v9 = vld [vmem:[#allocation18_spill] sm:$0xff] }
 0x2d3   : > { %v1922_v55 = vmax.f32 %v1825_v0, %v1890_v62  ;;  %1488 = vrot.lane.b32.xlu1 %v4691_v1, %s4723_s28  ;;  %v1364_v0 = vsel %vm752_vm9, %v1356_v61, %v6340_v49  ;;  %v1349_v49 = vsel %vm734_vm6, %v1341_v14, %v6286_v37  ;;  %v4697_v34 = vld [vmem:[#allocation2 + $0x180] sm:$0xff] }
 0x2d4   : > { %1492 = vrot.lane.b32.xlu0 %v4693_v29, %s4723_s28  ;;  %v1357_v17 = vsel %vm743_vm7, %v1349_v49, %v6360_v6  ;;  %v1322_v37 = vsel %vm225_vm0, %v4697_v34, %v6070_v15  ;;  %v8316_v1 = vld [vmem:[#allocation4_spill] sm:$0xff] }
 0x2d5   : > { %2037 = vst.msk [vmem:[#allocation3 + $0x121] sm:$0xff] %vm225_vm0, %v1922_v55  ;;  %v1293_v25 = vpop.permute.xlu1 %1292  ;;  %1496 = vrot.lane.b32.xlu2 %v4694_v3, %s4723_s28  ;;  %v1318_v55 = vsel %vm225_vm0, %v4695_v63, %v6169_v57  ;;  %v1365_v61 = vsel %vm752_vm9, %v1357_v17, %v6407_v26  ;;  %v1330_v6 = vsel %vm707_vm3, %v1322_v37, %v6250_v51  ;;  %v8319_v3 = vld [vmem:[#allocation15_spill] sm:$0xff]  ;;  %v8326_v37 = vld [vmem:[#allocation17_spill] sm:$0xff] }
 0x2d6   : > { %v1372_v21 = vsel %vm761_vm8, %v1364_v0, %v1293_v25  ;;  %v1297_v28 = vpop.permute.xlu0 %1296  ;;  %v1326_v47 = vsel %vm707_vm3, %v1318_v55, %v6218_v7  ;;  %v1361_v57 = vsel %vm743_vm7, %v1353_v48, %v6328_v30  ;;  %v1338_v16 = vsel %vm716_vm4, %v1330_v6, %v6284_v60  ;;  %v8323_v48 = vld [vmem:[#allocation14_spill] sm:$0xff]  ;;  %v8324_v55 = vld [vmem:[#allocation39_spill] sm:$0xff] }
 0x2d7   : > { %3975 = vmatmul.msk.f32.vlgmr.msra.gmra.mxu2 %vm1661_vm10, %v1372_v21  ;;  %v6504_v62 = vpop.permute.xlu2 %1398  ;;  %v1369_v15 = vsel %vm752_vm9, %v1361_v57, %v1271_v41  ;;  %v1373_v7 = vsel %vm761_vm8, %v1365_v61, %v6379_v39  ;;  %v1334_v29 = vsel %vm716_vm4, %v1326_v47, %v6202_v10  ;;  %v1346_v39 = vsel %vm725_vm5, %v1338_v16, %v6274_v38  ;;  %v4698_v41 = vld [vmem:[#allocation2 + $0x190] sm:$0xff]  ;;  %v8328_v16 = vld [vmem:[#allocation8_spill] sm:$0xff] }
 0x2d8   : > { %v1323_v10 = vsel %vm225_vm0, %v4698_v41, %v6199_v36  ;;  %v1354_v27 = vsel %vm734_vm6, %v1346_v39, %v6346_v59  ;;  %v1319_v25 = vsel %vm225_vm0, %v4699_v53, %v6030_v56  ;;  %v8335_v53 = vld [vmem:[#allocation43_spill] sm:$0xff] }
 0x2d9   : > { %v1327_v38 = vsel %vm707_vm3, %v1319_v25, %v6232_v5  ;;  %v1331_v56 = vsel %vm707_vm3, %v1323_v10, %v6177_v18  ;;  %v1380_v10 = vld [vmem:[#allocation2 + $0x1c1] sm:$0xff] }
 0x2da   : > { %v1335_v36 = vsel %vm716_vm4, %v1327_v38, %v6272_v32 }
 0x2db   : > { %1494 = vrot.lane.b32.xlu1 %v4696_v19, %s4723_s28  ;;  %v8325_v19 = vld [vmem:[#allocation9_spill] sm:$0xff] }
 0x2dc   : > { %1498 = vrot.lane.b32.xlu0 %v8316_v1, %s4723_s28  ;;  %v8327_v1 = vld [vmem:[#allocation42_spill] sm:$0xff] }
 0x2dd   : > { %v1299_v26 = vpop.permute.xlu1 %1298  ;;  %1510 = vrot.lane.b32.xlu2 %v6183_v35, %s4724_s29  ;;  %v1342_v35 = vsel %vm725_vm5, %v1334_v29, %v6299_v54  ;;  %v1362_v54 = vsel %vm743_vm7, %v1354_v27, %v6377_v45  ;;  %v8334_v27 = vld [vmem:[#allocation37_spill] sm:$0xff] }
 0x2de   : > { %v1303_v23 = vpop.permute.xlu0 %1302  ;;  %v1350_v60 = vsel %vm734_vm6, %v1342_v35, %v6326_v50 }
 0x2df   : > { %3976 = vmatmul.msk.f32.gmra.mxu2 %vm1661_vm10, %v1373_v7  ;;  %v1377_v30 = vsel %vm761_vm8, %v1369_v15, %v1303_v23  ;;  %v6542_v51 = vpop.permute.xlu2 %1412  ;;  %v1358_v50 = vsel %vm743_vm7, %v1350_v60, %v6316_v43  ;;  %v8329_v15 = vld [vmem:[#allocation11_spill] sm:$0xff]  ;;  %v8333_v60 = vld [vmem:[#allocation41_spill] sm:$0xff] }
 0x2e0   : > { %3980 = vmatmul.msk.f32.gmra.mxu3 %vm1661_vm10, %v1377_v30  ;;  %v1366_v45 = vsel %vm752_vm9, %v1358_v50, %v6424_v2  ;;  %v8332_v30 = vld [vmem:[#allocation40_spill] sm:$0xff]  ;;  %v1381_v50 = vld [vmem:[#allocation2 + $0x1d1] sm:$0xff] }
 0x2e1   : > { %v1374_v43 = vsel %vm761_vm8, %v1366_v45, %v1297_v28  ;;  %v8321_v28 = vld [vmem:[#allocation13_spill] sm:$0xff] }
 0x2e3   : > { %1508 = vrot.lane.b32.xlu1 %v6154_v46, %s4724_s29  ;;  %v8317_v46 = vld [vmem:[#allocation12_spill] sm:$0xff] }
 0x2e4   : > { %1512 = vrot.lane.b32.xlu0 %v6204_v11, %s4724_s29  ;;  %v1339_v5 = vsel %vm716_vm4, %v1331_v56, %v8317_v46  ;;  %v8318_v11 = vld [vmem:[#allocation16_spill] sm:$0xff]  ;;  %v8337_v56 = vld [vmem:[#allocation38_spill] sm:$0xff] }
 0x2e5   : > { %v1305_v59 = vpop.permute.xlu1 %1304  ;;  %1516 = vrot.lane.b32.xlu2 %v6206_v44, %s4724_s29  ;;  %v1370_v32 = vsel %vm752_vm9, %v1362_v54, %v8318_v11  ;;  %v1347_v18 = vsel %vm725_vm5, %v1339_v5, %v8319_v3  ;;  %v8320_v44 = vld [vmem:[#allocation34_spill] sm:$0xff]  ;;  %v1382_v5 = vld [vmem:[#allocation2 + $0x1e1] sm:$0xff] }
 0x2e6   : > { %v6578_v0 = vpop.permute.xlu0 %1388  ;;  %v1378_v2 = vsel %vm761_vm8, %v1370_v32, %v1305_v59  ;;  %v1343_v21 = vsel %vm725_vm5, %v1335_v36, %v8320_v44  ;;  %v1355_v17 = vsel %vm734_vm6, %v1347_v18, %v8323_v48  ;;  %v1383_v36 = vld [vmem:[#allocation2 + $0x1f1] sm:$0xff]  ;;  %v1386_v11 = vld [vmem:[#allocation2 + $0x221] sm:$0xff] }
 0x2e7   : > { %3977 = vmatmul.msk.f32.gmra.mxu2 %vm1661_vm10, %v1374_v43  ;;  %v6586_v14 = vpop.permute.xlu2 %1418  ;;  %v1351_v20 = vsel %vm734_vm6, %v1343_v21, %v8321_v28  ;;  %v1363_v63 = vsel %vm743_vm7, %v1355_v17, %v6402_v12  ;;  %v1384_v43 = vld [vmem:[#allocation2 + $0x201] sm:$0xff]  ;;  %v1387_v44 = vld [vmem:[#allocation2 + $0x231] sm:$0xff] }
 0x2e8   : > { %3981 = vmatmul.msk.f32.gmra.mxu3 %vm1661_vm10, %v1378_v2  ;;  %v1359_v49 = vsel %vm743_vm7, %v1351_v20, %v8322_v9  ;;  %v1371_v61 = vsel %vm752_vm9, %v1363_v63, %v6474_v40  ;;  %v1385_v2 = vld [vmem:[#allocation2 + $0x211] sm:$0xff]  ;;  %v2067_v21 = vld [vmem:[#allocation3 + $0xc0] sm:$0xff] }
 0x2e9   : > { %v1367_v47 = vsel %vm752_vm9, %v1359_v49, %v8326_v37  ;;  %v1379_v40 = vsel %vm761_vm8, %v1371_v61, %v6429_v4  ;;  %v8331_v4 = vld [vmem:[#allocation31_spill] sm:$0xff]  ;;  %v4048_v28 = vpack.i.bf16 %v6449_v24, %v2067_v21  ;;  %v2065_v49 = vld [vmem:[#allocation3 + $0xa0] sm:$0xff]  ;;  %v2066_v48 = vld [vmem:[#allocation3 + $0xb0] sm:$0xff]  ;;  %v4053_v61 = vpack.i.bf16 %v6433_v8, %v6451_v22 }
 0x2ea   : > { %v1375_v6 = vsel %vm761_vm8, %v1367_v47, %v1299_v26  ;;  %v8330_v26 = vld [vmem:[#allocation36_spill] sm:$0xff] }
 0x2eb   : > { %1514 = vrot.lane.b32.xlu1 %v8324_v55, %s4724_s29  ;;  %v2073_v63 = vld [vmem:[#allocation3 + $0x1] sm:$0xff]  ;;  %v4043_v55 = vpack.i.bf16 %v2066_v48, %v2065_v49  ;;  %v6721_v48 = vld [vmem:[#allocation3 + $0xd1] sm:$0xff] }
 0x2ec   : > { %1518 = vrot.lane.b32.xlu0 %v8325_v19, %s4724_s29  ;;  %v8338_v19 = vld [vmem:[#allocation5_spill] sm:$0xff]  ;;  %8344 = vst [vmem:[#allocation46_spill] sm:$0xff] %v6721_v48 }
 0x2ed   : > { %v6605_v34 = vpop.permute.xlu1 %1390  ;;  %1522 = vrot.lane.b32.xlu2 %v8327_v1, %s4724_s29  ;;  %v4063_v37 = vpack.i.bf16 %v8338_v19, %v2073_v63 }
 0x2ee   : > { %v6612_v12 = vpop.permute.xlu0 %1394 }
 0x2ef   : > { %3978 = vmatmul.msk.f32.gmra.mxu2 %vm1661_vm10, %v1375_v6  ;;  %v6617_v57 = vpop.permute.xlu2 %1424  ;;  %v2072_v6 = vld [vmem:[#allocation3 + $0x110] sm:$0xff] }
 0x2f0   : > { %3982 = vmatmul.msk.f32.gmra.mxu3 %vm1661_vm10, %v1379_v40 }
 0x2f3   : > { %1520 = vrot.lane.b32.xlu1 %v8328_v16, %s4724_s29  ;;  %v6696_v16 = vld [vmem:[#allocation3 + $0x71] sm:$0xff] }
 0x2f4   : > { %1532 = vrot.lane.b32.xlu0 %v8329_v15, %s4725_s30  ;;  %8339 = vst [vmem:[#allocation44_spill] sm:$0xff] %v6696_v16  ;;  %v4058_v15 = vpack.i.bf16 %v2072_v6, %v6441_v13 }
 0x2f5   : > { %v6624_v7 = vpop.permute.xlu1 %1396  ;;  %1536 = vrot.lane.b32.xlu2 %v8330_v26, %s4725_s30  ;;  %v8340_v26 = vld [vmem:[#allocation27_spill] sm:$0xff] }
 0x2f6   : > { %v6628_v23 = vpop.permute.xlu0 %1400 }
 0x2f7   : > { %v6630_v29 = vpop.permute.xlu2 %1438 }
 0x2fb   : > { %1534 = vrot.lane.b32.xlu1 %v8331_v4, %s4725_s30  ;;  %v8341_v4 = vld [vmem:[#allocation30_spill] sm:$0xff] }
 0x2fc   : > { %1538 = vrot.lane.b32.xlu0 %v8332_v30, %s4725_s30  ;;  %v4068_v30 = vpack.i.bf16 %v8341_v4, %v8340_v26 }
 0x2fd   : > { %v6636_v35 = vpop.permute.xlu1 %1402  ;;  %1542 = vrot.lane.b32.xlu2 %v8333_v60, %s4725_s30  ;;  %v2079_v60 = vld [vmem:[#allocation3 + $0x61] sm:$0xff] }
 0x2fe   : > { %v6640_v39 = vpop.permute.xlu0 %1414 }
 0x2ff   : > { %v6642_v41 = vpop.permute.xlu2 %1444 }
 0x303   : > { %1540 = vrot.lane.b32.xlu1 %v8334_v27, %s4725_s30 }
 0x304   : > { %1544 = vrot.lane.b32.xlu0 %v8335_v53, %s4725_s30 }
 0x305   : > { %v6648_v25 = vpop.permute.xlu1 %1416  ;;  %1564 = vrot.lane.b32.xlu2 %v1380_v10, %s4726_s6  ;;  %v4078_v10 = vpack.i.bf16 %v6696_v16, %v2079_v60  ;;  %v2091_v60 = vld [vmem:[#allocation3 + $0x22] sm:$0xff] }
 0x306   : > { %v6651_v54 = vpop.permute.xlu0 %1420 }
 0x307   : > { %v6653_v38 = vpop.permute.xlu2 %1450 }
 0x308   : > { %8336 = vst [vmem:[#allocation33_spill] sm:$0xff] %v6653_v38 }
 0x30b   : > { %1546 = vrot.lane.b32.xlu1 %v8337_v56, %s4725_s30  ;;  %v2081_v56 = vld [vmem:[#allocation3 + $0xa1] sm:$0xff] }
 0x30c   : > { %1566 = vrot.lane.b32.xlu0 %v1381_v50, %s4726_s6  ;;  %v2078_v50 = vld [vmem:[#allocation3 + $0x51] sm:$0xff] }
 0x30d   : > { %v6658_v45 = vpop.permute.xlu1 %1422  ;;  %1570 = vrot.lane.b32.xlu2 %v1383_v36, %s4726_s6 }
 0x30e   : > { %v6661_v59 = vpop.permute.xlu0 %1426 }
 0x30f   : > { %v6663_v46 = vpop.permute.xlu2 %1464 }
 0x313   : > { %1568 = vrot.lane.b32.xlu1 %v1382_v5, %s4726_s6  ;;  %v2085_v5 = vld [vmem:[#allocation3 + $0xe1] sm:$0xff] }
 0x314   : > { %1572 = vrot.lane.b32.xlu0 %v1384_v43, %s4726_s6  ;;  %v8342_v43 = vld [vmem:[#allocation10_spill] sm:$0xff] }
 0x315   : > { %v6667_v32 = vpop.permute.xlu1 %1436  ;;  %1576 = vrot.lane.b32.xlu2 %v1386_v11, %s4726_s6  ;;  %v4073_v11 = vpack.i.bf16 %v2078_v50, %v8342_v43  ;;  %v2095_v43 = vld [vmem:[#allocation3 + $0x62] sm:$0xff] }
 0x316   : > { %v6670_v3 = vpop.permute.xlu0 %1440 }
 0x317   : > { %v6672_v18 = vpop.permute.xlu2 %1470 }
 0x31b   : > { %1574 = vrot.lane.b32.xlu1 %v1385_v2, %s4726_s6  ;;  %v4083_v2 = vpack.i.bf16 %v6381_v58, %v2081_v56 }
 0x31c   : > { %1578 = vrot.lane.b32.xlu0 %v1387_v44, %s4726_s6  ;;  %v8343_v44 = vld [vmem:[#allocation32_spill] sm:$0xff] }
 0x31d   : > { %v6677_v20 = vpop.permute.xlu1 %1442  ;;  %4049 = vrot.lane.b32.xlu2 %v4048_v28, %s4719_s20  ;;  %v4093_v21 = vpack.i.bf16 %v8343_v44, %v2085_v5  ;;  %v2089_v5 = vld [vmem:[#allocation3 + $0x2] sm:$0xff]  ;;  %v6750_v44 = vld [vmem:[#allocation3 + $0x112] sm:$0xff] }
 0x31e   : > { %v6680_v9 = vpop.permute.xlu0 %1446  ;;  %8351 = vst [vmem:[#allocation50_spill] sm:$0xff] %v6750_v44 }
 0x31f   : > { %v6682_v17 = vpop.permute.xlu2 %1484 }
 0x323   : > { %4044 = vrot.lane.b32.xlu1 %v4043_v55, %s4719_s20  ;;  %v6725_v55 = vld [vmem:[#allocation3 + $0x111] sm:$0xff] }
 0x324   : > { %4054 = vrot.lane.b32.xlu0 %v4053_v61, %s4719_s20  ;;  %8345 = vst [vmem:[#allocation47_spill] sm:$0xff] %v6725_v55  ;;  %v2092_v61 = vld [vmem:[#allocation3 + $0x32] sm:$0xff] }
 0x325   : > { %v6689_v47 = vpop.permute.xlu1 %1448  ;;  %4064 = vrot.lane.b32.xlu2 %v4063_v37, %s4720_s25  ;;  %v8346_v37 = vld [vmem:[#allocation21_spill] sm:$0xff] }
 0x326   : > { %v6692_v1 = vpop.permute.xlu0 %1460  ;;  %v4088_v6 = vpack.i.bf16 %v6721_v48, %v8346_v37  ;;  %v2097_v48 = vld [vmem:[#allocation3 + $0xa2] sm:$0xff] }
 0x327   : > { %v6694_v40 = vpop.permute.xlu2 %1490 }
 0x32b   : > { %4059 = vrot.lane.b32.xlu1 %v4058_v15, %s4719_s20  ;;  %v8347_v15 = vld [vmem:[#allocation26_spill] sm:$0xff] }
 0x32c   : > { %4069 = vrot.lane.b32.xlu0 %v4068_v30, %s4720_s25  ;;  %v4098_v30 = vpack.i.bf16 %v6725_v55, %v8347_v15  ;;  %v2093_v55 = vld [vmem:[#allocation3 + $0x42] sm:$0xff]  ;;  %v4701_v15 = vld [vmem:[#allocation2 + $0x1b0] sm:$0xff] }
 0x32d   : > { %v6704_v27 = vpop.permute.xlu1 %1462  ;;  %4079 = vrot.lane.b32.xlu2 %v4078_v10, %s4720_s25  ;;  %v4108_v10 = vpack.i.bf16 %v2092_v61, %v2091_v60  ;;  %v8349_v61 = vld [vmem:[#allocation19_spill] sm:$0xff]  ;;  %v1588_v8 = vsel %vm225_vm0, %v4701_v15, %v6578_v0 }
 0x32e   : > { %v6707_v53 = vpop.permute.xlu0 %1466 }
 0x32f   : > { %v6709_v36 = vpop.permute.xlu2 %1496 }
 0x333   : > { %4074 = vrot.lane.b32.xlu1 %v4073_v11, %s4720_s25  ;;  %v2090_v11 = vld [vmem:[#allocation3 + $0x12] sm:$0xff] }
 0x334   : > { %4084 = vrot.lane.b32.xlu0 %v4083_v2, %s4721_s26  ;;  %v4103_v58 = vpack.i.bf16 %v2090_v11, %v2089_v5 }
 0x335   : > { %v6716_v28 = vpop.permute.xlu1 %1468  ;;  %4094 = vrot.lane.b32.xlu2 %v4093_v21, %s4721_s26  ;;  %v2094_v21 = vld [vmem:[#allocation3 + $0x52] sm:$0xff] }
 0x336   : > { %v6719_v49 = vpop.permute.xlu0 %1472  ;;  %v4113_v37 = vpack.i.bf16 %v2094_v21, %v2093_v55  ;;  %v8352_v55 = vld [vmem:[#allocation23_spill] sm:$0xff]  ;;  %v6763_v21 = vld [vmem:[%s8041_s2] ss:$0 sm:$0xff] }
 0x337   : > { %v6723_v63 = vpop.permute.xlu2 %1510 }
 0x33b   : > { %4089 = vrot.lane.b32.xlu1 %v4088_v6, %s4721_s26  ;;  %v4123_v6 = vpack.i.bf16 %v8349_v61, %v2097_v48  ;;  %v4138_v48 = vpack.i.bf16 %v6750_v44, %v6445_v42  ;;  %v8354_v61 = vld [vmem:[#allocation51_spill] sm:$0xff] }
 0x33c   : > { %4099 = vrot.lane.b32.xlu0 %v4098_v30, %s4721_s26 }
 0x33d   : > { %v6733_v50 = vpop.permute.xlu1 %1474  ;;  %4109 = vrot.lane.b32.xlu2 %v4108_v10, %s4722_s27  ;;  %v2096_v10 = vld [vmem:[#allocation3 + $0x72] sm:$0xff] }
 0x33e   : > { %8348 = vst [vmem:[#allocation45_spill] sm:$0xff] %v6733_v50  ;;  %v6736_v56 = vpop.permute.xlu0 %1486  ;;  %v4118_v5 = vpack.i.bf16 %v2096_v10, %v2095_v43 }
 0x33f   : > { %v6738_v2 = vpop.permute.xlu2 %1516 }
 0x343   : > { %4104 = vrot.lane.b32.xlu1 %v4103_v58, %s4722_s27  ;;  %v4128_v58 = vpack.i.bf16 %v6464_v31, %v8352_v55 }
 0x344   : > { %4114 = vrot.lane.b32.xlu0 %v4113_v37, %s4722_s27 }
 0x345   : > { %v6743_v30 = vpop.permute.xlu1 %1488  ;;  %4124 = vrot.lane.b32.xlu2 %v4123_v6, %s4723_s28 }
 0x346   : > { %v6746_v60 = vpop.permute.xlu0 %1492 }
 0x347   : > { %v6748_v4 = vpop.permute.xlu2 %1522 }
 0x348   : > { %8350 = vst [vmem:[#allocation49_spill] sm:$0xff] %v6748_v4 }
 0x34b   : > { %4119 = vrot.lane.b32.xlu1 %v4118_v5, %s4722_s27 }
 0x34c   : > { %v1839_v37 = vpop.f32.mrf.mxu3  ;;  %4129 = vrot.lane.b32.xlu0 %v4128_v58, %s4723_s28  ;;  %v4133_v58 = vpack.i.bf16 %v8354_v61, %v6453_v52 }
 0x34d   : > { %v6758_v11 = vpop.permute.xlu1 %1494  ;;  %v1840_v43 = vadd.f32 %v6763_v21, %v1839_v37  ;;  %4139 = vrot.lane.b32.xlu2 %v4138_v48, %s4723_s28 }
 0x34e   : > { %v6767_v6 = vpop.permute.xlu0 %1498 }
 0x34f   : > { %8353 = vst [vmem:[#allocation48_spill] sm:$0xff] %v6767_v6  ;;  %v1895_v10 = vmul.f32 0.2, %v1840_v43  ;;  %v6769_v5 = vpop.permute.xlu2 %1536 }
 0x351   : > { %v1927_v44 = vmax.f32 %v1840_v43, %v1895_v10 }
 0x353   : > { %2043 = vst.msk [vmem:[#allocation3 + $0x191] sm:$0xff] %vm225_vm0, %v1927_v44  ;;  %4134 = vrot.lane.b32.xlu1 %v4133_v58, %s4723_s28  ;;  %v1596_v58 = vsel %vm707_vm3, %v1588_v8, %v6542_v51 }
 0x354   : > { %v1604_v52 = vsel %vm716_vm4, %v1596_v58, %v6667_v32  ;;  %v2106_v58 = vld [vmem:[#allocation3 + $0x140] sm:$0xff] }
 0x355   : > { %v1509_v55 = vpop.permute.xlu1 %1508 }
 0x356   : > { %v6775_v42 = vpop.permute.xlu0 %1512 }
 0x357   : > { %v6777_v31 = vpop.permute.xlu2 %1542 }
 0x35a   : > { %v1827_v37 = vpop.f32.mrf.mxu2  ;;  %v6839_v22 = vld [vmem:[#allocation3 + $0x192] sm:$0xff] }
 0x35b   : > { %v1828_v48 = vadd.f32 %v6763_v21, %v1827_v37  ;;  %v1612_v37 = vsel %vm725_vm5, %v1604_v52, %v6692_v1  ;;  %8360 = vst [vmem:[#allocation15_spill] sm:$0xff] %v6839_v22 }
 0x35d   : > { %v1891_v43 = vmul.f32 0.2, %v1828_v48  ;;  %v6782_v10 = vpop.permute.xlu1 %1514 }
 0x35e   : > { %v6784_v61 = vpop.permute.xlu0 %1518 }
 0x35f   : > { %v1923_v44 = vmax.f32 %v1828_v48, %v1891_v43  ;;  %v1565_v16 = vpop.permute.xlu2 %1564  ;;  %v1620_v48 = vsel %vm734_vm6, %v1612_v37, %v6682_v17 }
 0x360   : > { %v1628_v51 = vsel %vm743_vm7, %v1620_v48, %v1509_v55 }
 0x361   : > { %2039 = vst.msk [vmem:[#allocation3 + $0x151] sm:$0xff] %vm225_vm0, %v1923_v44 }
 0x362   : > { %v1830_v13 = vpop.f32.mrf.mxu2 }
 0x363   : > { %v1831_v0 = vadd.f32 %v6763_v21, %v1830_v13  ;;  %v1842_v15 = vpop.f32.mrf.mxu3 }
 0x364   : > { %v1843_v19 = vadd.f32 %v6763_v21, %v1842_v15 }
 0x365   : > { %v1892_v43 = vmul.f32 0.2, %v1831_v0  ;;  %v6797_v8 = vpop.permute.xlu1 %1520 }
 0x366   : > { %v1896_v32 = vmul.f32 0.2, %v1843_v19  ;;  %v1533_v44 = vpop.permute.xlu0 %1532 }
 0x367   : > { %v1924_v26 = vmax.f32 %v1831_v0, %v1892_v43  ;;  %v1636_v52 = vsel %vm752_vm9, %v1628_v51, %v1533_v44  ;;  %v6811_v15 = vpop.permute.xlu2 %1570 }
 0x368   : > { %v1928_v1 = vmax.f32 %v1843_v19, %v1896_v32  ;;  %v1644_v13 = vsel %vm761_vm8, %v1636_v52, %v1565_v16  ;;  %v6802_v24 = vld [vmem:[#allocation3 + $0x150] sm:$0xff] }
 0x369   : > { %8355 = vst [vmem:[#allocation52_spill] sm:$0xff] %v6802_v24  ;;  %3983 = vmatmul.msk.f32.gmra.mxu3 %vm1661_vm10, %v1644_v13  ;;  %v4143_v17 = vpack.i.bf16 %v6802_v24, %v2106_v58  ;;  %v6815_v32 = vld [vmem:[#allocation3 + $0x190] sm:$0xff] }
 0x36a   : > { %2040 = vst.msk [vmem:[#allocation3 + $0x161] sm:$0xff] %vm225_vm0, %v1924_v26  ;;  %v1833_v55 = vpop.f32.mrf.mxu2  ;;  %v6817_v44 = vld [vmem:[#allocation3 + $0x151] sm:$0xff] }
 0x36b   : > { %2044 = vst.msk [vmem:[#allocation3 + $0x1a1] sm:$0xff] %vm225_vm0, %v1928_v1  ;;  %v1834_v37 = vadd.f32 %v6763_v21, %v1833_v55  ;;  %4144 = vrot.lane.b32.xlu0 %v4143_v17, %s4724_s29  ;;  %v1845_v0 = vpop.f32.mrf.mxu3  ;;  %v6819_v58 = vld [vmem:[#allocation3 + $0x191] sm:$0xff] }
 0x36c   : > { %v1846_v19 = vadd.f32 %v6763_v21, %v1845_v0  ;;  %8356 = vst [vmem:[#allocation28_spill] sm:$0xff] %v6817_v44  ;;  %v6825_v17 = vld [vmem:[#allocation3 + $0x152] sm:$0xff] }
 0x36d   : > { %v1893_v16 = vmul.f32 0.2, %v1834_v37  ;;  %v1535_v48 = vpop.permute.xlu1 %1534  ;;  %8357 = vst [vmem:[#allocation4_spill] sm:$0xff] %v6819_v58 }
 0x36e   : > { %v1897_v43 = vmul.f32 0.2, %v1846_v19  ;;  %v6813_v26 = vpop.permute.xlu0 %1538  ;;  %8359 = vst [vmem:[#allocation16_spill] sm:$0xff] %v6825_v17 }
 0x36f   : > { %v1925_v51 = vmax.f32 %v1834_v37, %v1893_v16  ;;  %v6859_v50 = vpop.permute.xlu2 %1576 }
 0x370   : > { %v1929_v52 = vmax.f32 %v1846_v19, %v1897_v43  ;;  %v4702_v19 = vld [vmem:[#allocation2 + $0x1c0] sm:$0xff] }
 0x371   : > { %v6821_v1 = vld [vmem:[#allocation3 + $0x160] sm:$0xff]  ;;  %2041 = vst.msk [vmem:[#allocation3 + $0x171] sm:$0xff] %vm225_vm0, %v1925_v51 }
 0x372   : > { %v6823_v13 = vld [vmem:[#allocation3 + $0x161] sm:$0xff]  ;;  %2045 = vst.msk [vmem:[#allocation3 + $0x1b1] sm:$0xff] %vm225_vm0, %v1929_v52  ;;  %v1836_v43 = vpop.f32.mrf.mxu2 }
 0x373   : > { %8358 = vst [vmem:[#allocation12_spill] sm:$0xff] %v6823_v13  ;;  %v6828_v55 = vld [vmem:[#allocation3 + $0x1a0] sm:$0xff]  ;;  %v1837_v16 = vadd.f32 %v6763_v21, %v1836_v43  ;;  %v1848_v24 = vpop.f32.mrf.mxu3  ;;  %v1589_v13 = vsel %vm225_vm0, %v4702_v19, %v6605_v34 }
 0x374   : > { %v6830_v0 = vld [vmem:[#allocation3 + $0x1a1] sm:$0xff]  ;;  %v1849_v44 = vadd.f32 %v6763_v21, %v1848_v24  ;;  %v1597_v51 = vsel %vm707_vm3, %v1589_v13, %v6640_v39 }
 0x375   : > { %v6832_v37 = vld [vmem:[#allocation3 + $0x162] sm:$0xff]  ;;  %v1894_v38 = vmul.f32 0.2, %v1837_v16  ;;  %v6857_v6 = vpop.permute.xlu1 %1540  ;;  %v1605_v52 = vsel %vm716_vm4, %v1597_v51, %v6630_v29 }
 0x376   : > { %v6841_v4 = vld [vmem:[#allocation3 + $0x1a2] sm:$0xff]  ;;  %v1898_v58 = vmul.f32 0.2, %v1849_v44  ;;  %v6861_v43 = vpop.permute.xlu0 %1544  ;;  %v1613_v24 = vsel %vm725_vm5, %v1605_v52, %v6704_v27 }
 0x377   : > { %8361 = vst [vmem:[#allocation34_spill] sm:$0xff] %v6841_v4  ;;  %v1926_v17 = vmax.f32 %v1837_v16, %v1894_v38  ;;  %v1621_v13 = vsel %vm734_vm6, %v1613_v24, %v6736_v56  ;;  %v4703_v38 = vld [vmem:[#allocation2 + $0x1d0] sm:$0xff]  ;;  %v6893_v51 = vpop.permute.xlu2 %4049 }
 0x378   : > { %v1930_v4 = vmax.f32 %v1849_v44, %v1898_v58  ;;  %v6865_v22 = vld [vmem:[#allocation3 + $0x170] sm:$0xff]  ;;  %v1590_v27 = vsel %vm225_vm0, %v4703_v38, %v6476_v33  ;;  %v1629_v58 = vsel %vm743_vm7, %v1621_v13, %v6723_v63 }
 0x379   : > { %2042 = vst.msk [vmem:[#allocation3 + $0x181] sm:$0xff] %vm225_vm0, %v1926_v17  ;;  %v4148_v34 = vpack.i.bf16 %v6865_v22, %v6821_v1  ;;  %v6872_v39 = vld [vmem:[#allocation3 + $0x1b0] sm:$0xff]  ;;  %v1598_v44 = vsel %vm707_vm3, %v1590_v27, %v6648_v25  ;;  %v1637_v17 = vsel %vm752_vm9, %v1629_v58, %v1535_v48 }
 0x37a   : > { %2046 = vst.msk [vmem:[#allocation3 + $0x1c1] sm:$0xff] %vm225_vm0, %v1930_v4  ;;  %v4158_v29 = vpack.i.bf16 %v6872_v39, %v6828_v55  ;;  %v1606_v4 = vsel %vm716_vm4, %v1598_v44, %v6670_v3  ;;  %v6906_v48 = vld [vmem:[#allocation3 + $0x171] sm:$0xff] }
 0x37b   : > { %4149 = vrot.lane.b32.xlu1 %v4148_v34, %s4724_s29  ;;  %v1614_v63 = vsel %vm725_vm5, %v1606_v4, %v6663_v46  ;;  %v4704_v34 = vld [vmem:[#allocation2 + $0x1e0] sm:$0xff]  ;;  %v6914_v38 = vld [vmem:[#allocation3 + $0x172] sm:$0xff] }
 0x37c   : > { %4159 = vrot.lane.b32.xlu0 %v4158_v29, %s4724_s29  ;;  %v1591_v13 = vsel %vm225_vm0, %v4704_v34, %v6612_v12  ;;  %v1622_v29 = vsel %vm734_vm6, %v1614_v63, %v6743_v30 }
 0x37d   : > { %v6887_v56 = vpop.permute.xlu1 %1546  ;;  %v1630_v27 = vsel %vm743_vm7, %v1622_v29, %v6775_v42  ;;  %v1599_v58 = vsel %vm707_vm3, %v1591_v13, %v6586_v14 }
 0x37e   : > { %v1567_v16 = vpop.permute.xlu0 %1566  ;;  %v1607_v30 = vsel %vm716_vm4, %v1599_v58, %v6677_v20  ;;  %v4705_v20 = vld [vmem:[#allocation2 + $0x1f0] sm:$0xff] }
 0x37f   : > { %v1645_v19 = vsel %vm761_vm8, %v1637_v17, %v1567_v16  ;;  %v1638_v17 = vsel %vm752_vm9, %v1630_v27, %v6769_v5  ;;  %v1615_v16 = vsel %vm725_vm5, %v1607_v30, %v6707_v53  ;;  %v6935_v63 = vpop.permute.xlu2 %4064 }
 0x380   : > { %3984 = vmatmul.msk.f32.gmra.mxu3 %vm1661_vm10, %v1645_v19  ;;  %v6896_v33 = vld [vmem:[#allocation3 + $0x180] sm:$0xff]  ;;  %v1623_v19 = vsel %vm734_vm6, %v1615_v16, %v6694_v40 }
 0x381   : > { %v6898_v25 = vld [vmem:[#allocation3 + $0x181] sm:$0xff]  ;;  %v4153_v3 = vpack.i.bf16 %v6815_v32, %v6896_v33  ;;  %v1631_v14 = vsel %vm743_vm7, %v1623_v19, %v6782_v10 }
 0x382   : > { %v6900_v52 = vld [vmem:[#allocation3 + $0x182] sm:$0xff]  ;;  %v1639_v5 = vsel %vm752_vm9, %v1631_v14, %v6813_v26 }
 0x383   : > { %4154 = vrot.lane.b32.xlu2 %v4153_v3, %s4724_s29  ;;  %v1592_v3 = vsel %vm225_vm0, %v4705_v20, %v6624_v7  ;;  %v1647_v40 = vsel %vm761_vm8, %v1639_v5, %v6811_v15  ;;  %v4706_v26 = vld [vmem:[#allocation2 + $0x200] sm:$0xff] }
 0x384   : > { %v1600_v53 = vsel %vm707_vm3, %v1592_v3, %v6651_v54  ;;  %v1593_v54 = vsel %vm225_vm0, %v4706_v26, %v6504_v62  ;;  %v4708_v16 = vld [vmem:[#allocation2 + $0x220] sm:$0xff]  ;;  %v8362_v26 = vld [vmem:[#allocation33_spill] sm:$0xff] }
 0x385   : > { %v1569_v12 = vpop.permute.xlu1 %1568  ;;  %v1608_v29 = vsel %vm716_vm4, %v1600_v53, %v6642_v41  ;;  %v1601_v58 = vsel %vm707_vm3, %v1593_v54, %v6658_v45  ;;  %v6994_v5 = vld [vmem:[#allocation3 + $0x60] sm:$0xff] }
 0x386   : > { %v1573_v4 = vpop.permute.xlu0 %1572  ;;  %v1646_v42 = vsel %vm761_vm8, %v1638_v17, %v1569_v12  ;;  %v1616_v7 = vsel %vm725_vm5, %v1608_v29, %v6716_v28  ;;  %v4707_v12 = vld [vmem:[#allocation2 + $0x210] sm:$0xff]  ;;  %v1609_v28 = vsel %vm716_vm4, %v1601_v58, %v6680_v9  ;;  %v2056_v54 = vld [vmem:[#allocation3] sm:$0xff] }
 0x387   : > { %v1624_v10 = vsel %vm734_vm6, %v1616_v7, %v6746_v60  ;;  %v4080_v27 = vpop.permute.xlu2 %4079  ;;  %v1594_v30 = vsel %vm225_vm0, %v4707_v12, %v6628_v23  ;;  %v8364_v12 = vld [vmem:[#allocation48_spill] sm:$0xff] }
 0x388   : > { %3985 = vmatmul.msk.f32.gmra.mxu3 %vm1661_vm10, %v1646_v42  ;;  %v1632_v15 = vsel %vm743_vm7, %v1624_v10, %v6738_v2  ;;  %v1602_v45 = vsel %vm707_vm3, %v1594_v30, %v6617_v57  ;;  %v1617_v2 = vsel %vm725_vm5, %v1609_v28, %v6672_v18  ;;  %v1595_v42 = vsel %vm225_vm0, %v4708_v16, %v6636_v35  ;;  %v7025_v16 = vld [vmem:[#allocation3 + $0x40] sm:$0xff] }
 0x389   : > { %v1640_v60 = vsel %vm752_vm9, %v1632_v15, %v6857_v6  ;;  %v1610_v23 = vsel %vm716_vm4, %v1602_v45, %v6689_v47  ;;  %v1625_v9 = vsel %vm734_vm6, %v1617_v2, %v6758_v11  ;;  %v1603_v57 = vsel %vm707_vm3, %v1595_v42, %v6661_v59  ;;  %v6996_v59 = vld [vmem:[#allocation3 + $0x70] sm:$0xff] }
 0x38a   : > { %v1648_v62 = vsel %vm761_vm8, %v1640_v60, %v1573_v4  ;;  %v1618_v6 = vsel %vm725_vm5, %v1610_v23, %v6719_v49  ;;  %v1633_v4 = vsel %vm743_vm7, %v1625_v9, %v6784_v61  ;;  %v4082_v3 = vunpack.i.h.bf16 %v4080_v27  ;;  %v7016_v60 = vld [vmem:[#allocation3 + $0x10] sm:$0xff] }
 0x38b   : > { %v1626_v47 = vsel %vm734_vm6, %v1618_v6, %v6709_v36  ;;  %v1641_v49 = vsel %vm752_vm9, %v1633_v4, %v6777_v31  ;;  %v4081_v35 = vunpack.i.l.bf16 %v4080_v27  ;;  %v8363_v27 = vld [vmem:[#allocation45_spill] sm:$0xff]  ;;  %v4052_v28 = vunpack.i.h.bf16 %v6893_v51 }
 0x38c   : > { %v1634_v61 = vsel %vm743_vm7, %v1626_v47, %v6797_v8  ;;  %v4067_v45 = vunpack.i.h.bf16 %v6935_v63  ;;  %v4066_v2 = vunpack.i.l.bf16 %v6935_v63 }
 0x38d   : > { %v1575_v34 = vpop.permute.xlu1 %1574  ;;  %v1642_v36 = vsel %vm752_vm9, %v1634_v61, %v6861_v43 }
 0x38e   : > { %v6945_v13 = vpop.permute.xlu0 %1578  ;;  %v1649_v53 = vsel %vm761_vm8, %v1641_v49, %v1575_v34  ;;  %v1611_v34 = vsel %vm716_vm4, %v1603_v57, %v8362_v26 }
 0x38f   : > { %v4095_v19 = vpop.permute.xlu2 %4094  ;;  %v1619_v43 = vsel %vm725_vm5, %v1611_v34, %v8363_v27  ;;  %v7050_v27 = vld [vmem:[#allocation3 + $0x30] sm:$0xff] }
 0x390   : > { %3986 = vmatmul.msk.f32.gmra.mxu3 %vm1661_vm10, %v1647_v40  ;;  %v1627_v30 = vsel %vm734_vm6, %v1619_v43, %v8364_v12  ;;  %v4097_v6 = vunpack.i.h.bf16 %v4095_v19  ;;  %v4096_v4 = vunpack.i.l.bf16 %v4095_v19 }
 0x395   : > { %v4045_v41 = vpop.permute.xlu1 %4044 }
 0x396   : > { %v4055_v17 = vpop.permute.xlu0 %4054  ;;  %v4047_v8 = vunpack.i.h.bf16 %v4045_v41  ;;  %v4046_v29 = vunpack.i.l.bf16 %v4045_v41  ;;  %v4051_v41 = vunpack.i.l.bf16 %v6893_v51  ;;  %v7027_v51 = vld [vmem:[#allocation3 + $0x50] sm:$0xff] }
 0x397   : > { %v4057_v58 = vunpack.i.h.bf16 %v4055_v17  ;;  %v4056_v15 = vunpack.i.l.bf16 %v4055_v17  ;;  %v4273_v46 = vpack.i.bf16 %v6994_v5, %v7027_v51 }
 0x398   : > { %3987 = vmatmul.msk.f32.gmra.mxu3 %vm1661_vm10, %v1648_v62  ;;  %v1650_v62 = vsel %vm761_vm8, %v1642_v36, %v6859_v50  ;;  %v2832_v23 = vsel %vm225_vm0, %v7016_v60, %v4047_v8  ;;  %v2831_v17 = vsel %vm225_vm0, %v2056_v54, %v4046_v29  ;;  %v7048_v54 = vld [vmem:[#allocation3 + $0x20] sm:$0xff] }
 0x399   : > { %v2835_v50 = vsel %vm225_vm0, %v7025_v16, %v4056_v15  ;;  %v2836_v63 = vsel %vm225_vm0, %v7027_v51, %v4057_v58  ;;  %v2839_v61 = vsel %vm707_vm3, %v2831_v17, %v4066_v2  ;;  %v2833_v43 = vsel %vm225_vm0, %v7048_v54, %v4051_v41  ;;  %v8377_v51 = vld [vmem:[#allocation29_spill] sm:$0xff] }
 0x39a   : > { %v2834_v58 = vsel %vm225_vm0, %v7050_v27, %v4052_v28 }
 0x39d   : > { %v4060_v18 = vpop.permute.xlu1 %4059 }
 0x39e   : > { %v4062_v14 = vunpack.i.h.bf16 %v4060_v18  ;;  %v4061_v11 = vunpack.i.l.bf16 %v4060_v18  ;;  %v6988_v20 = vpop.permute.xlu0 %4069 }
 0x39f   : > { %v4072_v29 = vunpack.i.h.bf16 %v6988_v20  ;;  %v4071_v26 = vunpack.i.l.bf16 %v6988_v20 }
 0x3a0   : > { %v2837_v40 = vsel %vm225_vm0, %v6994_v5, %v4061_v11  ;;  %v2838_v31 = vsel %vm225_vm0, %v6996_v59, %v4062_v14  ;;  %3988 = vmatmul.msk.f32.gmra.mxu3 %vm1661_vm10, %v1649_v53  ;;  %v4110_v11 = vpop.permute.xlu2 %4109  ;;  %v8376_v5 = vld [vmem:[#allocation22_spill] sm:$0xff] }
 0x3a1   : > { %v2845_v7 = vsel %vm707_vm3, %v2837_v40, %v4081_v35  ;;  %v2846_v10 = vsel %vm707_vm3, %v2838_v31, %v4082_v3  ;;  %v2840_v3 = vsel %vm707_vm3, %v2832_v23, %v4067_v45  ;;  %v8365_v31 = vld [vmem:[#allocation49_spill] sm:$0xff]  ;;  %v2841_v23 = vsel %vm707_vm3, %v2833_v43, %v4071_v26 }
 0x3a2   : > { %v1635_v8 = vsel %vm743_vm7, %v1627_v30, %v8365_v31  ;;  %v4112_v30 = vunpack.i.h.bf16 %v4110_v11 }
 0x3a3   : > { %v1643_v34 = vsel %vm752_vm9, %v1635_v8, %v6887_v56  ;;  %v2842_v56 = vsel %vm707_vm3, %v2834_v58, %v4072_v29 }
 0x3a4   : > { %v1651_v12 = vsel %vm761_vm8, %v1643_v34, %v6945_v13 }
 0x3a5   : > { %v4075_v9 = vpop.permute.xlu1 %4074 }
 0x3a6   : > { %v4077_v42 = vunpack.i.h.bf16 %v4075_v9  ;;  %v4076_v57 = vunpack.i.l.bf16 %v4075_v9  ;;  %v4085_v18 = vpop.permute.xlu0 %4084 }
 0x3a7   : > { %v4087_v47 = vunpack.i.h.bf16 %v4085_v18  ;;  %v4086_v14 = vunpack.i.l.bf16 %v4085_v18 }
 0x3a8   : > { %v2844_v49 = vsel %vm707_vm3, %v2836_v63, %v4077_v42  ;;  %v2843_v19 = vsel %vm707_vm3, %v2835_v50, %v4076_v57  ;;  %3989 = vmatmul.msk.f32.gmra.mxu3 %vm1661_vm10, %v1650_v62  ;;  %v4111_v62 = vunpack.i.l.bf16 %v4110_v11  ;;  %v4125_v57 = vpop.permute.xlu2 %4124 }
 0x3a9   : > { %v2848_v35 = vsel %vm716_vm4, %v2840_v3, %v4087_v47  ;;  %v2847_v53 = vsel %vm716_vm4, %v2839_v61, %v4086_v14  ;;  %v2851_v36 = vsel %vm716_vm4, %v2843_v19, %v4096_v4  ;;  %v2852_v40 = vsel %vm716_vm4, %v2844_v49, %v4097_v6 }
 0x3aa   : > { %v4127_v14 = vunpack.i.h.bf16 %v4125_v57  ;;  %v4126_v11 = vunpack.i.l.bf16 %v4125_v57 }
 0x3ad   : > { %v4090_v15 = vpop.permute.xlu1 %4089 }
 0x3ae   : > { %v4092_v20 = vunpack.i.h.bf16 %v4090_v15  ;;  %v4091_v45 = vunpack.i.l.bf16 %v4090_v15  ;;  %v4100_v2 = vpop.permute.xlu0 %4099 }
 0x3af   : > { %v4102_v17 = vunpack.i.h.bf16 %v4100_v2  ;;  %v4101_v9 = vunpack.i.l.bf16 %v4100_v2 }
 0x3b0   : > { %v2849_v41 = vsel %vm716_vm4, %v2841_v23, %v4091_v45  ;;  %v2850_v6 = vsel %vm716_vm4, %v2842_v56, %v4092_v20  ;;  %3990 = vmatmul.msk.f32.gmra.mxu3 %vm1661_vm10, %v1651_v12  ;;  %v4140_v29 = vpop.permute.xlu2 %4139 }
 0x3b1   : > { %v2854_v28 = vsel %vm716_vm4, %v2846_v10, %v4102_v17  ;;  %v2853_v13 = vsel %vm716_vm4, %v2845_v7, %v4101_v9  ;;  %v2857_v4 = vsel %vm725_vm5, %v2849_v41, %v4111_v62  ;;  %v2858_v42 = vsel %vm725_vm5, %v2850_v6, %v4112_v30 }
 0x3b2   : > { %v4142_v15 = vunpack.i.h.bf16 %v4140_v29  ;;  %v4141_v12 = vunpack.i.l.bf16 %v4140_v29 }
 0x3b5   : > { %v4105_v18 = vpop.permute.xlu1 %4104 }
 0x3b6   : > { %v4107_v50 = vunpack.i.h.bf16 %v4105_v18  ;;  %v4106_v63 = vunpack.i.l.bf16 %v4105_v18  ;;  %v4115_v47 = vpop.permute.xlu0 %4114 }
 0x3b7   : > { %v4117_v49 = vunpack.i.h.bf16 %v4115_v47  ;;  %v4116_v19 = vunpack.i.l.bf16 %v4115_v47 }
 0x3b8   : > { %v2855_v61 = vsel %vm725_vm5, %v2847_v53, %v4106_v63  ;;  %v2856_v3 = vsel %vm725_vm5, %v2848_v35, %v4107_v50  ;;  %v2115_v63 = vld [vmem:[#allocation3 + $0x1e0] sm:$0xff] }
 0x3b9   : > { %v2860_v10 = vsel %vm725_vm5, %v2852_v40, %v4117_v49  ;;  %v2859_v7 = vsel %vm725_vm5, %v2851_v36, %v4116_v19  ;;  %v2863_v31 = vsel %vm734_vm6, %v2855_v61, %v4126_v11  ;;  %v2864_v8 = vsel %vm734_vm6, %v2856_v3, %v4127_v14 }
 0x3bd   : > { %v4120_v26 = vpop.permute.xlu1 %4119 }
 0x3be   : > { %v4122_v34 = vunpack.i.h.bf16 %v4120_v26  ;;  %v4121_v43 = vunpack.i.l.bf16 %v4120_v26  ;;  %v4130_v58 = vpop.permute.xlu0 %4129 }
 0x3bf   : > { %v4132_v30 = vunpack.i.h.bf16 %v4130_v58  ;;  %v4131_v62 = vunpack.i.l.bf16 %v4130_v58 }
 0x3c0   : > { %v2861_v53 = vsel %vm725_vm5, %v2853_v13, %v4121_v43  ;;  %v2862_v35 = vsel %vm725_vm5, %v2854_v28, %v4122_v34 }
 0x3c1   : > { %v7076_v40 = vsel %vm734_vm6, %v2857_v4, %v4131_v62  ;;  %v7079_v36 = vsel %vm734_vm6, %v2858_v42, %v4132_v30  ;;  %v7082_v20 = vsel %vm734_vm6, %v2861_v53, %v4141_v12  ;;  %v7085_v45 = vsel %vm734_vm6, %v2862_v35, %v4142_v15 }
 0x3c5   : > { %v4135_v2 = vpop.permute.xlu1 %4134 }
 0x3c6   : > { %v4137_v56 = vunpack.i.h.bf16 %v4135_v2  ;;  %v4136_v23 = vunpack.i.l.bf16 %v4135_v2 }
 0x3c8   : > { %v7088_v17 = vsel %vm734_vm6, %v2859_v7, %v4136_v23  ;;  %v7091_v9 = vsel %vm734_vm6, %v2860_v10, %v4137_v56  ;;  %v2123_v23 = vld [vmem:[#allocation3 + $0x141] sm:$0xff] }
 0x3dd   : > { %v4145_v41 = vpop.permute.xlu0 %4144 }
 0x3de   : > { %v4147_v6 = vunpack.i.h.bf16 %v4145_v41  ;;  %v4146_v28 = vunpack.i.l.bf16 %v4145_v41 }
 0x3e0   : > { %v7094_v13 = vsel %vm743_vm7, %v2863_v31, %v4146_v28  ;;  %v7097_v4 = vsel %vm743_vm7, %v2864_v8, %v4147_v6 }
 0x3ec   : > { %v1851_v42 = vpop.f32.mrf.mxu3 }
 0x3ed   : > { %v1852_v57 = vadd.f32 %v6763_v21, %v1851_v42 }
 0x3ef   : > { %v1899_v18 = vmul.f32 0.2, %v1852_v57 }
 0x3f1   : > { %v1931_v50 = vmax.f32 %v1852_v57, %v1899_v18 }
 0x3f3   : > { %2048 = vst.msk [vmem:[#allocation3 + $0x1f1] sm:$0xff] %vm225_vm0, %v1931_v50  ;;  %v8368_v50 = vld [vmem:[#allocation28_spill] sm:$0xff] }
 0x3fa   : > { %v7101_v47 = vld [vmem:[#allocation3 + $0x1f0] sm:$0xff] }
 0x3fb   : > { %v4163_v14 = vpack.i.bf16 %v7101_v47, %v2115_v63  ;;  %v7110_v29 = vld [vmem:[#allocation3 + $0x1f2] sm:$0xff]  ;;  %v4183_v63 = vpack.i.bf16 %v8368_v50, %v2123_v23 }
 0x3fc   : > { %8366 = vst [vmem:[#allocation13_spill] sm:$0xff] %v7110_v29 }
 0x3fd   : > { %4164 = vrot.lane.b32.xlu1 %v4163_v14, %s4725_s30 }
 0x403   : > { %v1854_v11 = vpop.f32.mrf.mxu3 }
 0x404   : > { %v1855_v49 = vadd.f32 %v6763_v21, %v1854_v11  ;;  %v7189_v11 = vld [vmem:[#allocation3 + $0x1f1] sm:$0xff] }
 0x406   : > { %v1900_v19 = vmul.f32 0.2, %v1855_v49 }
 0x408   : > { %v1932_v61 = vmax.f32 %v1855_v49, %v1900_v19  ;;  %v2131_v49 = vld [vmem:[#allocation3 + $0x1e1] sm:$0xff] }
 0x40a   : > { %2049 = vst.msk [vmem:[#allocation3 + $0x201] sm:$0xff] %vm225_vm0, %v1932_v61 }
 0x40b   : > { %v1857_v3 = vpop.f32.mrf.mxu3 }
 0x40c   : > { %v1858_v10 = vadd.f32 %v6763_v21, %v1857_v3 }
 0x40e   : > { %v1901_v7 = vmul.f32 0.2, %v1858_v10 }
 0x410   : > { %v1933_v31 = vmax.f32 %v1858_v10, %v1901_v7  ;;  %v7150_v10 = vld [vmem:[#allocation3 + $0x1b1] sm:$0xff] }
 0x411   : > { %v7108_v8 = vld [vmem:[#allocation3 + $0x200] sm:$0xff] }
 0x412   : > { %v7112_v26 = vld [vmem:[#allocation3 + $0x202] sm:$0xff]  ;;  %2050 = vst.msk [vmem:[#allocation3 + $0x211] sm:$0xff] %vm225_vm0, %v1933_v31 }
 0x413   : > { %v1860_v58 = vpop.f32.mrf.mxu3 }
 0x414   : > { %v1861_v15 = vadd.f32 %v6763_v21, %v1860_v58  ;;  %v4198_v58 = vpack.i.bf16 %v7150_v10, %v6830_v0 }
 0x416   : > { %v1902_v12 = vmul.f32 0.2, %v1861_v15 }
 0x418   : > { %v1934_v30 = vmax.f32 %v1861_v15, %v1902_v12 }
 0x419   : > { %v7120_v62 = vld [vmem:[#allocation3 + $0x210] sm:$0xff] }
 0x41a   : > { %2051 = vst.msk [vmem:[#allocation3 + $0x221] sm:$0xff] %vm225_vm0, %v1934_v30  ;;  %v7125_v53 = vpack.i.bf16 %v7120_v62, %v7108_v8  ;;  %v7130_v6 = vld [vmem:[#allocation3 + $0x211] sm:$0xff] }
 0x41b   : > { %v1863_v35 = vpop.f32.mrf.mxu3  ;;  %v7132_v28 = vld [vmem:[#allocation3 + $0x212] sm:$0xff] }
 0x41c   : > { %8367 = vst [vmem:[#allocation18_spill] sm:$0xff] %v7125_v53  ;;  %v1864_v2 = vadd.f32 %v6763_v21, %v1863_v35  ;;  %4169 = vrot.lane.b32.xlu2 %v7125_v53, %s4725_s30  ;;  %v4248_v24 = vpack.i.bf16 %v7132_v28, %v7112_v26 }
 0x41e   : > { %v1903_v56 = vmul.f32 0.2, %v1864_v2 }
 0x420   : > { %v1935_v41 = vmax.f32 %v1864_v2, %v1903_v56 }
 0x421   : > { %v7134_v42 = vld [vmem:[#allocation3 + $0x220] sm:$0xff] }
 0x422   : > { %v7136_v57 = vld [vmem:[#allocation3 + $0x221] sm:$0xff]  ;;  %2052 = vst.msk [vmem:[#allocation3 + $0x231] sm:$0xff] %vm225_vm0, %v1935_v41 }
 0x423   : > { %v7138_v18 = vld [vmem:[#allocation3 + $0x222] sm:$0xff]  ;;  %v1866_v19 = vpop.f32.mrf.mxu3 }
 0x424   : > { %v1867_v61 = vadd.f32 %v6763_v21, %v1866_v19  ;;  %4184 = vrot.lane.b32.xlu2 %v4183_v63, %s4726_s6  ;;  %v8370_v41 = vld [vmem:[#allocation12_spill] sm:$0xff] }
 0x425   : > { %v4188_v63 = vpack.i.bf16 %v6906_v48, %v8370_v41 }
 0x426   : > { %v1904_v3 = vmul.f32 0.2, %v1867_v61 }
 0x428   : > { %v1936_v7 = vmax.f32 %v1867_v61, %v1904_v3 }
 0x429   : > { %v7152_v31 = vld [vmem:[#allocation3 + $0x230] sm:$0xff] }
 0x42a   : > { %2053 = vst.msk [vmem:[#allocation3 + $0x241] sm:$0xff] %vm225_vm0, %v1936_v7  ;;  %v7159_v15 = vpack.i.bf16 %v7152_v31, %v7134_v42  ;;  %v7165_v2 = vld [vmem:[#allocation3 + $0x231] sm:$0xff] }
 0x42b   : > { %v1869_v12 = vpop.f32.mrf.mxu3  ;;  %v7167_v23 = vld [vmem:[#allocation3 + $0x232] sm:$0xff]  ;;  %v4213_v7 = vpack.i.bf16 %v7165_v2, %v7136_v57 }
 0x42c   : > { %8369 = vst [vmem:[#allocation14_spill] sm:$0xff] %v7159_v15  ;;  %v1870_v30 = vadd.f32 %v6763_v21, %v1869_v12  ;;  %4199 = vrot.lane.b32.xlu2 %v4198_v58, %s4726_s6  ;;  %4174 = vrot.lane.b32.xlu0 %v7159_v15, %s4725_s30 }
 0x42e   : > { %v1905_v35 = vmul.f32 0.2, %v1870_v30 }
 0x430   : > { %v1937_v56 = vmax.f32 %v1870_v30, %v1905_v35 }
 0x431   : > { %v7171_v19 = vld [vmem:[#allocation3 + $0x240] sm:$0xff] }
 0x432   : > { %v7173_v61 = vld [vmem:[#allocation3 + $0x241] sm:$0xff]  ;;  %2054 = vst.msk [vmem:[#allocation3 + $0x251] sm:$0xff] %vm225_vm0, %v1937_v56 }
 0x433   : > { %v7175_v3 = vld [vmem:[#allocation3 + $0x242] sm:$0xff]  ;;  %v1872_v35 = vpop.f32.mrf.mxu3 }
 0x434   : > { %v1873_v43 = vadd.f32 %v6763_v21, %v1872_v35  ;;  %4214 = vrot.lane.b32.xlu2 %v4213_v7, %s4727_s24  ;;  %4189 = vrot.lane.b32.xlu0 %v4188_v63, %s4726_s6  ;;  %v4228_v21 = vpack.i.bf16 %v6914_v38, %v6832_v37  ;;  %v4203_v35 = vpack.i.bf16 %v7189_v11, %v2131_v49 }
 0x436   : > { %v1906_v56 = vmul.f32 0.2, %v1873_v43 }
 0x438   : > { %v1938_v44 = vmax.f32 %v1873_v43, %v1906_v56  ;;  %v2147_v43 = vld [vmem:[#allocation3 + $0x1e2] sm:$0xff] }
 0x439   : > { %v7191_v14 = vld [vmem:[#allocation3 + $0x250] sm:$0xff]  ;;  %v4243_v56 = vpack.i.bf16 %v7110_v29, %v2147_v43  ;;  %v8373_v43 = vld [vmem:[#allocation15_spill] sm:$0xff] }
 0x43a   : > { %2055 = vst.msk [vmem:[#allocation3 + $0x261] sm:$0xff] %vm225_vm0, %v1938_v44  ;;  %v4178_v30 = vpack.i.bf16 %v7191_v14, %v7171_v19  ;;  %v7202_v63 = vld [vmem:[#allocation3 + $0x251] sm:$0xff]  ;;  %v8371_v44 = vld [vmem:[#allocation4_spill] sm:$0xff]  ;;  %v4233_v34 = vpack.i.bf16 %v8373_v43, %v6900_v52 }
 0x43b   : > { %v4193_v7 = vpack.i.bf16 %v8371_v44, %v6898_v25  ;;  %v4218_v12 = vpack.i.bf16 %v7202_v63, %v7173_v61  ;;  %v7212_v49 = vld [vmem:[#allocation3 + $0x252] sm:$0xff] }
 0x43c   : > { %4179 = vrot.lane.b32.xlu1 %v4178_v30, %s4725_s30  ;;  %4229 = vrot.lane.b32.xlu2 %v4228_v21, %s4728_s7  ;;  %8372 = vst [vmem:[#allocation39_spill] sm:$0xff] %v7212_v49  ;;  %v7214_v30 = vld [vmem:[#allocation3 + $0x201] sm:$0xff] }
 0x43d   : > { %4204 = vrot.lane.b32.xlu0 %v4203_v35, %s4727_s24  ;;  %v4208_v21 = vpack.i.bf16 %v7130_v6, %v7214_v30  ;;  %v4258_v35 = vpack.i.bf16 %v7212_v49, %v7175_v3  ;;  %v2163_v49 = vld [vmem:[#allocation3 + $0xb0] sm:$0xff] }
 0x444   : > { %4194 = vrot.lane.b32.xlu1 %v4193_v7, %s4726_s6  ;;  %4244 = vrot.lane.b32.xlu2 %v4243_v56, %s4729_s8  ;;  %v8374_v7 = vld [vmem:[#allocation16_spill] sm:$0xff] }
 0x445   : > { %4219 = vrot.lane.b32.xlu0 %v4218_v12, %s4727_s24  ;;  %v2139_v12 = vld [vmem:[#allocation3 + $0x142] sm:$0xff] }
 0x446   : > { %v4223_v56 = vpack.i.bf16 %v8374_v7, %v2139_v12  ;;  %v4263_v12 = vpack.i.bf16 %v7048_v54, %v7016_v60  ;;  %v8380_v60 = vld [vmem:[#allocation27_spill] sm:$0xff]  ;;  %v8381_v54 = vld [vmem:[#allocation5_spill] sm:$0xff] }
 0x44c   : > { %4209 = vrot.lane.b32.xlu1 %v4208_v21, %s4727_s24  ;;  %4259 = vrot.lane.b32.xlu2 %v4258_v35, %s4729_s8  ;;  %v7233_v21 = vld [vmem:[#allocation3 + $0x1b2] sm:$0xff] }
 0x44d   : > { %4234 = vrot.lane.b32.xlu0 %v4233_v34, %s4728_s7  ;;  %v8375_v35 = vld [vmem:[#allocation34_spill] sm:$0xff] }
 0x44e   : > { %v4238_v34 = vpack.i.bf16 %v7233_v21, %v8375_v35 }
 0x454   : > { %4224 = vrot.lane.b32.xlu1 %v4223_v56, %s4728_s7  ;;  %4274 = vrot.lane.b32.xlu2 %v4273_v46, %s4730_s9  ;;  %v8378_v56 = vpack.i.bf16 %v8376_v5, %v8377_v51  ;;  %v7245_v46 = vld [vmem:[#allocation3 + $0x80] sm:$0xff]  ;;  %v4150_v5 = vpop.permute.xlu1 %4149  ;;  %v4268_v51 = vpack.i.bf16 %v7025_v16, %v7050_v27 }
 0x455   : > { %4249 = vrot.lane.b32.xlu0 %v4248_v24, %s4729_s8  ;;  %8379 = vst [vmem:[#allocation9_spill] sm:$0xff] %v7245_v46  ;;  %v4253_v24 = vpack.i.bf16 %v7167_v23, %v7138_v18  ;;  %v4278_v58 = vpack.i.bf16 %v7245_v46, %v6996_v59  ;;  %v8384_v59 = vld [vmem:[#allocation6_spill] sm:$0xff] }
 0x45c   : > { %4239 = vrot.lane.b32.xlu1 %v4238_v34, %s4728_s7  ;;  %4289 = vrot.lane.b32.xlu2 %v8378_v56, %s4731_s10  ;;  %v8382_v34 = vpack.i.bf16 %v8380_v60, %v8381_v54  ;;  %v8383_v56 = vld [vmem:[#allocation44_spill] sm:$0xff]  ;;  %v7266_v60 = vpop.permute.xlu2 %4154 }
 0x45d   : > { %4264 = vrot.lane.b32.xlu0 %v4263_v12, %s4730_s9  ;;  %v2178_v12 = vld [vmem:[#allocation3 + $0x81] sm:$0xff] }
 0x45e   : > { %v4318_v53 = vpack.i.bf16 %v2178_v12, %v8383_v56  ;;  %v4152_v12 = vunpack.i.h.bf16 %v4150_v5  ;;  %v8388_v56 = vld [vmem:[#allocation32_spill] sm:$0xff] }
 0x464   : > { %4254 = vrot.lane.b32.xlu1 %v4253_v24, %s4729_s8  ;;  %4304 = vrot.lane.b32.xlu2 %v8382_v34, %s4732_s11  ;;  %v8385_v24 = vld [vmem:[#allocation24_spill] sm:$0xff] }
 0x465   : > { %4279 = vrot.lane.b32.xlu0 %v4278_v58, %s4730_s9  ;;  %v8386_v46 = vpack.i.bf16 %v8384_v59, %v8385_v24  ;;  %v7268_v58 = vld [vmem:[#allocation3 + $0xc0] sm:$0xff]  ;;  %v8390_v24 = vld [vmem:[#allocation10_spill] sm:$0xff] }
 0x46c   : > { %4269 = vrot.lane.b32.xlu1 %v4268_v51, %s4730_s9  ;;  %4319 = vrot.lane.b32.xlu2 %v4318_v53, %s4732_s11  ;;  %v4283_v53 = vpack.i.bf16 %v7268_v58, %v2163_v49  ;;  %v4151_v51 = vunpack.i.l.bf16 %v4150_v5  ;;  %v2874_v5 = vsel %vm743_vm7, %v7079_v36, %v4152_v12 }
 0x46d   : > { %4294 = vrot.lane.b32.xlu0 %v8386_v46, %s4731_s10  ;;  %v8387_v46 = vld [vmem:[#allocation26_spill] sm:$0xff] }
 0x46e   : > { %v8389_v59 = vpack.i.bf16 %v8387_v46, %v8388_v56  ;;  %v2873_v49 = vsel %vm743_vm7, %v7076_v40, %v4151_v51  ;;  %v7292_v56 = vld [vmem:[#allocation3 + $0x110] sm:$0xff]  ;;  %v8397_v40 = vld [vmem:[#allocation21_spill] sm:$0xff]  ;;  %v8398_v51 = vld [vmem:[#allocation20_spill] sm:$0xff] }
 0x46f   : > { %v4165_v54 = vpop.permute.xlu1 %4164  ;;  %v8399_v36 = vpack.i.bf16 %v8397_v40, %v8398_v51  ;;  %v8401_v40 = vld [vmem:[#allocation52_spill] sm:$0xff] }
 0x470   : > { %v4167_v34 = vunpack.i.h.bf16 %v4165_v54  ;;  %v4166_v15 = vunpack.i.l.bf16 %v4165_v54  ;;  %v8391_v54 = vld [vmem:[#allocation30_spill] sm:$0xff]  ;;  %v8402_v51 = vpack.i.bf16 %v6821_v1, %v8401_v40  ;;  %v8405_v1 = vld [vmem:[#allocation7_spill] sm:$0xff] }
 0x471   : > { %v8392_v29 = vpack.i.bf16 %v8390_v24, %v8391_v54  ;;  %v8395_v24 = vld [vmem:[#allocation25_spill] sm:$0xff]  ;;  %v8409_v40 = vld [vmem:[#allocation19_spill] sm:$0xff] }
 0x472   : > { %v2879_v16 = vsel %vm752_vm9, %v7094_v13, %v4166_v15  ;;  %v2880_v27 = vsel %vm752_vm9, %v7097_v4, %v4167_v34  ;;  %v7284_v34 = vld [vmem:[#allocation3 + $0x120] sm:$0xff] }
 0x473   : > { %8393 = vst [vmem:[#allocation17_spill] sm:$0xff] %v7284_v34 }
 0x474   : > { %4284 = vrot.lane.b32.xlu1 %v4283_v53, %s4731_s10  ;;  %4334 = vrot.lane.b32.xlu2 %v8389_v59, %s4733_s12  ;;  %v8394_v59 = vld [vmem:[#allocation35_spill] sm:$0xff] }
 0x475   : > { %4309 = vrot.lane.b32.xlu0 %v8392_v29, %s4732_s11  ;;  %v4298_v29 = vpack.i.bf16 %v7284_v34, %v7292_v56  ;;  %v8396_v54 = vpack.i.bf16 %v8394_v59, %v8395_v24  ;;  %v7313_v34 = vld [vmem:[#allocation3 + $0x51] sm:$0xff] }
 0x476   : > { %v4170_v13 = vpop.permute.xlu2 %4169  ;;  %v8400_v24 = vld [vmem:[#allocation47_spill] sm:$0xff] }
 0x477   : > { %v4172_v15 = vunpack.i.h.bf16 %v4170_v13  ;;  %v4171_v4 = vunpack.i.l.bf16 %v4170_v13 }
 0x479   : > { %v2881_v53 = vsel %vm752_vm9, %v2873_v49, %v4171_v4  ;;  %v2882_v46 = vsel %vm752_vm9, %v2874_v5, %v4172_v15  ;;  %v7305_v4 = vld [vmem:[#allocation3 + $0x61] sm:$0xff] }
 0x47a   : > { %v2186_v49 = vld [vmem:[#allocation3 + $0x121] sm:$0xff]  ;;  %v4313_v59 = vpack.i.bf16 %v7305_v4, %v7313_v34 }
 0x47c   : > { %4299 = vrot.lane.b32.xlu1 %v4298_v29, %s4731_s10  ;;  %4349 = vrot.lane.b32.xlu2 %v8396_v54, %s4719_s20  ;;  %v4338_v54 = vpack.i.bf16 %v2186_v49, %v8400_v24  ;;  %v8406_v49 = vld [vmem:[#allocation51_spill] sm:$0xff] }
 0x47d   : > { %4324 = vrot.lane.b32.xlu0 %v8399_v36, %s4733_s12  ;;  %v7328_v36 = vld [vmem:[#allocation3 + $0x1c0] sm:$0xff] }
 0x47e   : > { %v4185_v12 = vpop.permute.xlu2 %4184  ;;  %8403 = vst [vmem:[#allocation42_spill] sm:$0xff] %v7328_v36 }
 0x47f   : > { %v4187_v13 = vunpack.i.h.bf16 %v4185_v12  ;;  %v4186_v15 = vunpack.i.l.bf16 %v4185_v12  ;;  %v8404_v12 = vld [vmem:[#allocation46_spill] sm:$0xff] }
 0x481   : > { %v7308_v5 = vsel %vm761_vm8, %v2879_v16, %v4186_v15  ;;  %v7311_v29 = vsel %vm761_vm8, %v2880_v27, %v4187_v13  ;;  %v7326_v27 = vld [vmem:[#allocation3 + $0xe1] sm:$0xff]  ;;  %v4378_v15 = vpack.i.bf16 %v7328_v36, %v6872_v39  ;;  %v8411_v39 = vpack.i.bf16 %v7171_v19, %v7152_v31 }
 0x482   : > { %v4328_v13 = vpack.i.bf16 %v7326_v27, %v8404_v12  ;;  %v8412_v12 = vpack.i.bf16 %v6896_v33, %v6865_v22  ;;  %v4157_v36 = vunpack.i.h.bf16 %v7266_v60  ;;  %v8414_v31 = vpack.i.bf16 %v6898_v25, %v6906_v48 }
 0x483   : > { %v8415_v22 = vpack.i.bf16 %v7108_v8, %v7101_v47  ;;  %v4423_v47 = vpack.i.bf16 %v7214_v30, %v7189_v11 }
 0x484   : > { %4314 = vrot.lane.b32.xlu1 %v4313_v59, %s4732_s11  ;;  %4364 = vrot.lane.b32.xlu2 %v8402_v51, %s4720_s25  ;;  %v8407_v59 = vpack.i.bf16 %v8405_v1, %v8406_v49  ;;  %v8413_v49 = vld [vmem:[#allocation50_spill] sm:$0xff] }
 0x485   : > { %4339 = vrot.lane.b32.xlu0 %v4338_v54, %s4733_s12  ;;  %v8408_v54 = vld [vmem:[#allocation23_spill] sm:$0xff] }
 0x486   : > { %v7324_v16 = vpop.permute.xlu2 %4199  ;;  %v8410_v51 = vpack.i.bf16 %v8408_v54, %v8409_v40  ;;  %v4156_v54 = vunpack.i.l.bf16 %v7266_v60  ;;  %v2876_v60 = vsel %vm743_vm7, %v7091_v9, %v4157_v36 }
 0x48c   : > { %4329 = vrot.lane.b32.xlu1 %v4328_v13, %s4733_s12  ;;  %4379 = vrot.lane.b32.xlu2 %v4378_v15, %s4720_s25  ;;  %v4160_v13 = vpop.permute.xlu0 %4159  ;;  %v2202_v15 = vld [vmem:[#allocation3 + $0x122] sm:$0xff] }
 0x48d   : > { %4354 = vrot.lane.b32.xlu0 %v8407_v59, %s4719_s20  ;;  %v4358_v59 = vpack.i.bf16 %v2202_v15, %v8413_v49  ;;  %v2234_v49 = vld [vmem:[#allocation3 + $0x261] sm:$0xff] }
 0x48e   : > { %v7340_v24 = vpop.permute.xlu2 %4214 }
 0x494   : > { %4344 = vrot.lane.b32.xlu1 %v8410_v51, %s4719_s20  ;;  %4394 = vrot.lane.b32.xlu2 %v8411_v39, %s4721_s26  ;;  %v2875_v51 = vsel %vm743_vm7, %v7088_v17, %v4156_v54  ;;  %v7372_v39 = vld [vmem:[#allocation3 + $0x260] sm:$0xff]  ;;  %v8416_v17 = vpack.i.bf16 %v6828_v55, %v6815_v32  ;;  %v4438_v54 = vpack.i.bf16 %v2234_v49, %v7202_v63 }
 0x495   : > { %4369 = vrot.lane.b32.xlu0 %v8412_v12, %s4720_s25  ;;  %v4398_v8 = vpack.i.bf16 %v7372_v39, %v7191_v14  ;;  %v4162_v14 = vunpack.i.h.bf16 %v4160_v13  ;;  %v8417_v32 = vpack.i.bf16 %v7134_v42, %v7120_v62  ;;  %v8418_v55 = vpack.i.bf16 %v6830_v0, %v8371_v44 }
 0x496   : > { %v7354_v1 = vpop.permute.xlu2 %4229  ;;  %v4202_v62 = vunpack.i.h.bf16 %v7324_v16  ;;  %v4201_v42 = vunpack.i.l.bf16 %v7324_v16  ;;  %v8419_v16 = vpack.i.bf16 %v8370_v41, %v8368_v50  ;;  %v4217_v50 = vunpack.i.h.bf16 %v7340_v24 }
 0x497   : > { %v4216_v41 = vunpack.i.l.bf16 %v7340_v24  ;;  %v8422_v24 = vpack.i.bf16 %v7138_v18, %v7132_v28  ;;  %v2252_v18 = vld [vmem:[#allocation3 + $0x20] sm:$0xff] }
 0x49c   : > { %4359 = vrot.lane.b32.xlu1 %v4358_v59, %s4719_s20  ;;  %4409 = vrot.lane.b32.xlu2 %v8414_v31, %s4722_s27  ;;  %v4161_v31 = vunpack.i.l.bf16 %v4160_v13 }
 0x49d   : > { %4384 = vrot.lane.b32.xlu0 %v8415_v22, %s4721_s26 }
 0x49e   : > { %v4175_v33 = vpop.permute.xlu0 %4174  ;;  %v7376_v48 = vpop.permute.xlu2 %4244  ;;  %v2877_v63 = vsel %vm743_vm7, %v7082_v20, %v4161_v31 }
 0x49f   : > { %v4177_v19 = vunpack.i.h.bf16 %v4175_v33  ;;  %v4176_v40 = vunpack.i.l.bf16 %v4175_v33 }
 0x4a1   : > { %v2883_v12 = vsel %vm752_vm9, %v2875_v51, %v4176_v40  ;;  %v2884_v25 = vsel %vm752_vm9, %v2876_v60, %v4177_v19 }
 0x4a4   : > { %4374 = vrot.lane.b32.xlu1 %v8416_v17, %s4720_s25  ;;  %4424 = vrot.lane.b32.xlu2 %v4423_v47, %s4723_s28 }
 0x4a5   : > { %4399 = vrot.lane.b32.xlu0 %v4398_v8, %s4721_s26  ;;  %v8420_v8 = vpack.i.bf16 %v8375_v35, %v8373_v43 }
 0x4a6   : > { %v4190_v9 = vpop.permute.xlu0 %4189  ;;  %v7391_v22 = vpop.permute.xlu2 %4259 }
 0x4a7   : > { %v4192_v36 = vunpack.i.h.bf16 %v4190_v9  ;;  %v4191_v15 = vunpack.i.l.bf16 %v4190_v9  ;;  %v2226_v9 = vld [vmem:[#allocation3 + $0x1c1] sm:$0xff] }
 0x4a9   : > { %v2889_v59 = vsel %vm761_vm8, %v2881_v53, %v4191_v15  ;;  %v2890_v11 = vsel %vm761_vm8, %v2882_v46, %v4192_v36  ;;  %v2878_v46 = vsel %vm743_vm7, %v7085_v45, %v4162_v14 }
 0x4ac   : > { %4389 = vrot.lane.b32.xlu1 %v8417_v32, %s4721_s26  ;;  %4439 = vrot.lane.b32.xlu2 %v4438_v54, %s4723_s28 }
 0x4ad   : > { %4414 = vrot.lane.b32.xlu0 %v8418_v55, %s4722_s27 }
 0x4ae   : > { %v4180_v53 = vpop.permute.xlu1 %4179 }
 0x4af   : > { %v4182_v13 = vunpack.i.h.bf16 %v4180_v53  ;;  %v4181_v33 = vunpack.i.l.bf16 %v4180_v53  ;;  %v4205_v19 = vpop.permute.xlu0 %4204 }
 0x4b0   : > { %v4207_v40 = vunpack.i.h.bf16 %v4205_v19  ;;  %v4206_v51 = vunpack.i.l.bf16 %v4205_v19 }
 0x4b1   : > { %v2885_v60 = vsel %vm752_vm9, %v2877_v63, %v4181_v33  ;;  %v2886_v0 = vsel %vm752_vm9, %v2878_v46, %v4182_v13  ;;  %v4232_v13 = vunpack.i.h.bf16 %v7354_v1  ;;  %v4231_v33 = vunpack.i.l.bf16 %v7354_v1 }
 0x4b2   : > { %v7412_v44 = vsel %vm1661_vm10, %v7308_v5, %v4206_v51  ;;  %v7416_v20 = vsel %vm1661_vm10, %v7311_v29, %v4207_v40  ;;  %v2893_v45 = vsel %vm761_vm8, %v2885_v60, %v4201_v42  ;;  %v2894_v47 = vsel %vm761_vm8, %v2886_v0, %v4202_v62  ;;  %v7432_v29 = vpop.permute.xlu2 %4274  ;;  %v2242_v42 = vld [vmem:[#allocation3 + $0x1c2] sm:$0xff] }
 0x4b3   : > { %v8421_v5 = vpack.i.bf16 %v7136_v57, %v7130_v6  ;;  %v4418_v6 = vpack.i.bf16 %v2226_v9, %v7150_v10  ;;  %v8423_v10 = vpack.i.bf16 %v6832_v37, %v8374_v7  ;;  %v4246_v9 = vunpack.i.l.bf16 %v7376_v48 }
 0x4b4   : > { %4404 = vrot.lane.b32.xlu1 %v8419_v16, %s4722_s27  ;;  %4454 = vrot.lane.b32.xlu2 %v8420_v8, %s4724_s29 }
 0x4b5   : > { %4429 = vrot.lane.b32.xlu0 %v8421_v5, %s4723_s28 }
 0x4b6   : > { %v4195_v17 = vpop.permute.xlu1 %4194 }
 0x4b7   : > { %v4197_v36 = vunpack.i.h.bf16 %v4195_v17  ;;  %v4196_v15 = vunpack.i.l.bf16 %v4195_v17  ;;  %v4220_v49 = vpop.permute.xlu0 %4219  ;;  %v4247_v17 = vunpack.i.h.bf16 %v7376_v48 }
 0x4b8   : > { %v4222_v54 = vunpack.i.h.bf16 %v4220_v49  ;;  %v4221_v14 = vunpack.i.l.bf16 %v4220_v49 }
 0x4b9   : > { %v2891_v43 = vsel %vm761_vm8, %v2883_v12, %v4196_v15  ;;  %v2892_v35 = vsel %vm761_vm8, %v2884_v25, %v4197_v36  ;;  %v2253_v25 = vld [vmem:[#allocation3 + $0x30] sm:$0xff]  ;;  %v2269_v15 = vld [vmem:[#allocation3 + $0x21] sm:$0xff] }
 0x4ba   : > { %v7440_v57 = vsel %vm1661_vm10, %v2893_v45, %v4221_v14  ;;  %v7443_v31 = vsel %vm1661_vm10, %v2894_v47, %v4222_v54  ;;  %v2899_v32 = vsel %vm1661_vm10, %v2891_v43, %v4216_v41  ;;  %v2900_v55 = vsel %vm1661_vm10, %v2892_v35, %v4217_v50  ;;  %v7458_v19 = vpop.permute.xlu2 %4289  ;;  %v2294_v35 = vld [vmem:[#allocation3 + $0xd2] sm:$0xff] }
 0x4bb   : > { %v4483_v7 = vpack.i.bf16 %v2253_v25, %v2252_v18  ;;  %v4458_v45 = vpack.i.bf16 %v2242_v42, %v7233_v21  ;;  %v8424_v47 = vpack.i.bf16 %v7173_v61, %v7165_v2  ;;  %v2255_v25 = vld [vmem:[#allocation3 + $0x50] sm:$0xff]  ;;  %v2250_v42 = vld [vmem:[#allocation3 + $0x262] sm:$0xff] }
 0x4bc   : > { %4419 = vrot.lane.b32.xlu1 %v4418_v6, %s4722_s27  ;;  %4469 = vrot.lane.b32.xlu2 %v8422_v24, %s4725_s30  ;;  %v4262_v24 = vunpack.i.h.bf16 %v7391_v22  ;;  %s4734_s27 = smov 64  }
 0x4bd   : > { %4444 = vrot.lane.b32.xlu0 %v8423_v10, %s4724_s29  ;;  %v4261_v10 = vunpack.i.l.bf16 %v7391_v22 }
 0x4be   : > { %v4210_v12 = vpop.permute.xlu1 %4209 }
 0x4bf   : > { %v4212_v53 = vunpack.i.h.bf16 %v4210_v12  ;;  %v4211_v63 = vunpack.i.l.bf16 %v4210_v12  ;;  %v4235_v46 = vpop.permute.xlu0 %4234 }
 0x4c0   : > { %v4237_v62 = vunpack.i.h.bf16 %v4235_v46  ;;  %v4236_v28 = vunpack.i.l.bf16 %v4235_v46 }
 0x4c1   : > { %v2897_v40 = vsel %vm1661_vm10, %v2889_v59, %v4211_v63  ;;  %v2898_v37 = vsel %vm1661_vm10, %v2890_v11, %v4212_v53  ;;  %v2270_v11 = vld [vmem:[#allocation3 + $0x31] sm:$0xff] }
 0x4c2   : > { %v7463_v51 = vsel %vm2903_vm12, %v2899_v32, %v4236_v28  ;;  %v7466_v60 = vsel %vm2903_vm12, %v2900_v55, %v4237_v62  ;;  %v2906_v0 = vsel %vm2903_vm12, %v2897_v40, %v4231_v33  ;;  %v2907_v1 = vsel %vm2903_vm12, %v2898_v37, %v4232_v13  ;;  %v7483_v50 = vpop.permute.xlu2 %4304  ;;  %v2254_v13 = vld [vmem:[#allocation3 + $0x40] sm:$0xff] }
 0x4c3   : > { %v4498_v49 = vpack.i.bf16 %v2270_v11, %v2269_v15  ;;  %v4488_v62 = vpack.i.bf16 %v2255_v25, %v2254_v13  ;;  %v2263_v40 = vld [vmem:[#allocation3 + $0xe0] sm:$0xff]  ;;  %v2264_v11 = vld [vmem:[#allocation3 + $0xf0] sm:$0xff] }
 0x4c4   : > { %4434 = vrot.lane.b32.xlu1 %v8424_v47, %s4723_s28  ;;  %4484 = vrot.lane.b32.xlu2 %v4483_v7, %s4726_s6 }
 0x4c5   : > { %4459 = vrot.lane.b32.xlu0 %v4458_v45, %s4724_s29  ;;  %v4276_v45 = vunpack.i.l.bf16 %v7432_v29 }
 0x4c6   : > { %v4225_v59 = vpop.permute.xlu1 %4224 }
 0x4c7   : > { %v4227_v16 = vunpack.i.h.bf16 %v4225_v59  ;;  %v4226_v8 = vunpack.i.l.bf16 %v4225_v59  ;;  %v4250_v5 = vpop.permute.xlu0 %4249 }
 0x4c8   : > { %v4252_v21 = vunpack.i.h.bf16 %v4250_v5  ;;  %v4251_v36 = vunpack.i.l.bf16 %v4250_v5  ;;  %v8429_v5 = vld [vmem:[#allocation39_spill] sm:$0xff] }
 0x4c9   : > { %v2904_v2 = vsel %vm2903_vm12, %v7412_v44, %v4226_v8  ;;  %v2905_v61 = vsel %vm2903_vm12, %v7416_v20, %v4227_v16  ;;  %v8425_v44 = vpack.i.bf16 %v6900_v52, %v6914_v38  ;;  %v8426_v20 = vpack.i.bf16 %v7175_v3, %v7167_v23  ;;  %v2293_v38 = vld [vmem:[#allocation3 + $0xc2] sm:$0xff]  ;;  %v2278_v16 = vld [vmem:[#allocation3 + $0xd1] sm:$0xff] }
 0x4ca   : > { %v7486_v41 = vsel %vm2912_vm13, %v2906_v0, %v4251_v36  ;;  %v7489_v54 = vsel %vm2912_vm13, %v2907_v1, %v4252_v21  ;;  %v2913_v48 = vsel %vm2912_vm13, %v2904_v2, %v4246_v9  ;;  %v2914_v14 = vsel %vm2912_vm13, %v2905_v61, %v4247_v17  ;;  %v7516_v28 = vpop.permute.xlu2 %4319 }
 0x4cb   : > { %v4513_v3 = vpack.i.bf16 %v2294_v35, %v2293_v38  ;;  %v4277_v1 = vunpack.i.h.bf16 %v7432_v29  ;;  %v4478_v17 = vpack.i.bf16 %v2250_v42, %v8429_v5  ;;  %v4528_v9 = vpack.i.bf16 %v2264_v11, %v2263_v40  ;;  %v2277_v29 = vld [vmem:[#allocation3 + $0xc1] sm:$0xff] }
 0x4cc   : > { %4449 = vrot.lane.b32.xlu1 %v8425_v44, %s4724_s29  ;;  %4499 = vrot.lane.b32.xlu2 %v4498_v49, %s4728_s7  ;;  %v4503_v61 = vpack.i.bf16 %v2278_v16, %v2277_v29  ;;  %v2262_v49 = vld [vmem:[#allocation3 + $0xd0] sm:$0xff]  ;;  %v4291_v35 = vunpack.i.l.bf16 %v7458_v19  ;;  %v7574_v40 = vld [vmem:[#allocation3 + $0x22] sm:$0xff] }
 0x4cd   : > { %4474 = vrot.lane.b32.xlu0 %v8426_v20, %s4725_s30  ;;  %v2274_v16 = vld [vmem:[#allocation3 + $0x71] sm:$0xff] }
 0x4ce   : > { %v4240_v43 = vpop.permute.xlu1 %4239 }
 0x4cf   : > { %v4242_v6 = vunpack.i.h.bf16 %v4240_v43  ;;  %v4241_v32 = vunpack.i.l.bf16 %v4240_v43  ;;  %v4265_v55 = vpop.permute.xlu0 %4264  ;;  %v4292_v43 = vunpack.i.h.bf16 %v7458_v19 }
 0x4d0   : > { %v4267_v12 = vunpack.i.h.bf16 %v4265_v55  ;;  %v4266_v52 = vunpack.i.l.bf16 %v4265_v55 }
 0x4d1   : > { %v2910_v53 = vsel %vm2903_vm12, %v7440_v57, %v4241_v32  ;;  %v2911_v23 = vsel %vm2903_vm12, %v7443_v31, %v4242_v6  ;;  %v8427_v57 = vld [vmem:[#allocation13_spill] sm:$0xff] }
 0x4d2   : > { %v7509_v63 = vsel %vm2921_vm14, %v2913_v48, %v4266_v52  ;;  %v7512_v46 = vsel %vm2921_vm14, %v2914_v14, %v4267_v12  ;;  %v2919_v22 = vsel %vm2912_vm13, %v2910_v53, %v4261_v10  ;;  %v2920_v33 = vsel %vm2912_vm13, %v2911_v23, %v4262_v24  ;;  %v7544_v48 = vld [vmem:[#allocation3 + $0x52] sm:$0xff]  ;;  %v7548_v6 = vld [vmem:[#allocation3 + $0x42] sm:$0xff] }
 0x4d3   : > { %v8428_v18 = vpack.i.bf16 %v7112_v26, %v8427_v57  ;;  %v2303_v24 = vld [vmem:[#allocation3 + $0x170] sm:$0xff]  ;;  %v4493_v52 = vpack.i.bf16 %v2262_v49, %v7268_v58  ;;  %v4543_v38 = vpack.i.bf16 %v7544_v48, %v7548_v6  ;;  %v2302_v53 = vld [vmem:[#allocation3 + $0x160] sm:$0xff]  ;;  %v4306_v57 = vunpack.i.l.bf16 %v7483_v50 }
 0x4d4   : > { %4514 = vrot.lane.b32.xlu2 %v4513_v3, %s4731_s10  ;;  %v7568_v58 = vld [vmem:[#allocation3 + $0x32] sm:$0xff] }
 0x4d5   : > { %4464 = vrot.lane.b32.xlu1 %v8428_v18, %s4725_s30  ;;  %4489 = vrot.lane.b32.xlu0 %v4488_v62, %s4726_s6  ;;  %v4307_v62 = vunpack.i.h.bf16 %v7483_v50 }
 0x4d6   : > { %v4255_v31 = vpop.permute.xlu1 %4254 }
 0x4d7   : > { %v4257_v37 = vunpack.i.h.bf16 %v4255_v31  ;;  %v4256_v7 = vunpack.i.l.bf16 %v4255_v31  ;;  %v4280_v0 = vpop.permute.xlu0 %4279 }
 0x4d8   : > { %v4282_v47 = vunpack.i.h.bf16 %v4280_v0  ;;  %v4281_v59 = vunpack.i.l.bf16 %v4280_v0  ;;  %v4508_v0 = vpack.i.bf16 %v7568_v58, %v7574_v40 }
 0x4d9   : > { %v2917_v26 = vsel %vm2912_vm13, %v7463_v51, %v4256_v7  ;;  %v2918_v8 = vsel %vm2912_vm13, %v7466_v60, %v4257_v37  ;;  %v7542_v51 = vpop.permute.xlu2 %4334 }
 0x4da   : > { %v7532_v21 = vsel %vm2921_vm14, %v2919_v22, %v4281_v59  ;;  %v7535_v36 = vsel %vm2921_vm14, %v2920_v33, %v4282_v47  ;;  %v2926_v15 = vsel %vm2921_vm14, %v2917_v26, %v4276_v45  ;;  %v2927_v2 = vsel %vm2921_vm14, %v2918_v8, %v4277_v1  ;;  %v2271_v1 = vld [vmem:[#allocation3 + $0x41] sm:$0xff] }
 0x4db   : > { %v4533_v11 = vpack.i.bf16 %v7313_v34, %v2271_v1  ;;  %v2295_v34 = vld [vmem:[#allocation3 + $0xe2] sm:$0xff]  ;;  %v2282_v1 = vld [vmem:[#allocation3 + $0x111] sm:$0xff] }
 0x4dc   : > { %4529 = vrot.lane.b32.xlu2 %v4528_v9, %s4727_s24  ;;  %v4321_v9 = vunpack.i.l.bf16 %v7516_v28 }
 0x4dd   : > { %4479 = vrot.lane.b32.xlu1 %v4478_v17, %s4725_s30  ;;  %4504 = vrot.lane.b32.xlu0 %v4503_v61, %s4729_s8  ;;  %v4322_v17 = vunpack.i.h.bf16 %v7516_v28 }
 0x4de   : > { %v4270_v60 = vpop.permute.xlu1 %4269 }
 0x4df   : > { %v4272_v14 = vunpack.i.h.bf16 %v4270_v60  ;;  %v4271_v44 = vunpack.i.l.bf16 %v4270_v60  ;;  %v4295_v20 = vpop.permute.xlu0 %4294  ;;  %v4573_v60 = vpack.i.bf16 %v2274_v16, %v7305_v4 }
 0x4e0   : > { %v4297_v32 = vunpack.i.h.bf16 %v4295_v20  ;;  %v4296_v55 = vunpack.i.l.bf16 %v4295_v20 }
 0x4e1   : > { %v2924_v10 = vsel %vm2921_vm14, %v7486_v41, %v4271_v44  ;;  %v2925_v12 = vsel %vm2921_vm14, %v7489_v54, %v4272_v14  ;;  %v4518_v41 = vpack.i.bf16 %v2303_v24, %v2302_v53  ;;  %v7572_v18 = vpop.permute.xlu2 %4349  ;;  %v2296_v14 = vld [vmem:[#allocation3 + $0xf2] sm:$0xff] }
 0x4e2   : > { %v7558_v25 = vsel %vm2930_vm15, %v2926_v15, %v4296_v55  ;;  %v7561_v19 = vsel %vm2930_vm15, %v2927_v2, %v4297_v32  ;;  %v2933_v23 = vsel %vm2930_vm15, %v2924_v10, %v4291_v35  ;;  %v2934_v3 = vsel %vm2930_vm15, %v2925_v12, %v4292_v43  ;;  %v2280_v53 = vld [vmem:[#allocation3 + $0xf1] sm:$0xff] }
 0x4e3   : > { %v4548_v35 = vpack.i.bf16 %v2296_v14, %v2295_v34  ;;  %v4337_v10 = vunpack.i.h.bf16 %v7542_v51  ;;  %v4336_v12 = vunpack.i.l.bf16 %v7542_v51  ;;  %v2307_v14 = vld [vmem:[#allocation3 + $0x1b0] sm:$0xff] }
 0x4e4   : > { %4544 = vrot.lane.b32.xlu2 %v4543_v38, %s4730_s9 }
 0x4e5   : > { %4494 = vrot.lane.b32.xlu1 %v4493_v52, %s4727_s24  ;;  %4519 = vrot.lane.b32.xlu0 %v4518_v41, %s4732_s11  ;;  %v4538_v41 = vpack.i.bf16 %v2280_v53, %v7326_v27  ;;  %v2192_v53 = vld [vmem:[#allocation3 + $0x62] sm:$0xff] }
 0x4e6   : > { %v4285_v54 = vpop.permute.xlu1 %4284 }
 0x4e7   : > { %v4287_v13 = vunpack.i.h.bf16 %v4285_v54  ;;  %v4286_v22 = vunpack.i.l.bf16 %v4285_v54  ;;  %v4310_v33 = vpop.permute.xlu0 %4309 }
 0x4e8   : > { %v4312_v31 = vunpack.i.h.bf16 %v4310_v33  ;;  %v4311_v42 = vunpack.i.l.bf16 %v4310_v33  ;;  %v2256_v33 = vld [vmem:[#allocation3 + $0x60] sm:$0xff] }
 0x4e9   : > { %v2931_v37 = vsel %vm2930_vm15, %v7509_v63, %v4286_v22  ;;  %v2932_v7 = vsel %vm2930_vm15, %v7512_v46, %v4287_v13  ;;  %v8430_v63 = vld [vmem:[#allocation14_spill] sm:$0xff]  ;;  %v7602_v49 = vpop.permute.xlu2 %4364 }
 0x4ea   : > { %v2940_v45 = vsel %vm2939_vm1, %v2931_v37, %v4306_v57  ;;  %v2941_v50 = vsel %vm2939_vm1, %v2932_v7, %v4307_v62  ;;  %v7585_v47 = vsel %vm2939_vm1, %v2933_v23, %v4311_v42  ;;  %v7588_v59 = vsel %vm2939_vm1, %v2934_v3, %v4312_v31  ;;  %v2297_v23 = vld [vmem:[#allocation3 + $0x102] sm:$0xff]  ;;  %v2257_v3 = vld [vmem:[#allocation3 + $0x70] sm:$0xff] }
 0x4eb   : > { %v4563_v27 = vpack.i.bf16 %v2257_v3, %v2256_v33  ;;  %v4367_v34 = vunpack.i.h.bf16 %v7602_v49 }
 0x4ec   : > { %4559 = vrot.lane.b32.xlu2 %v8430_v63, %s4733_s12 }
 0x4ed   : > { %4509 = vrot.lane.b32.xlu1 %v4508_v0, %s4730_s9  ;;  %4534 = vrot.lane.b32.xlu0 %v4533_v11, %s4728_s7  ;;  %v2304_v0 = vld [vmem:[#allocation3 + $0x180] sm:$0xff] }
 0x4ee   : > { %v4300_v46 = vpop.permute.xlu1 %4299 }
 0x4ef   : > { %v4302_v26 = vunpack.i.h.bf16 %v4300_v46  ;;  %v4301_v8 = vunpack.i.l.bf16 %v4300_v46  ;;  %v4325_v5 = vpop.permute.xlu0 %4324  ;;  %v2281_v46 = vld [vmem:[#allocation3 + $0x101] sm:$0xff] }
 0x4f0   : > { %v4327_v29 = vunpack.i.h.bf16 %v4325_v5  ;;  %v4326_v15 = vunpack.i.l.bf16 %v4325_v5  ;;  %v4578_v16 = vpack.i.bf16 %v2282_v1, %v2281_v46 }
 0x4f1   : > { %v2937_v2 = vsel %vm2930_vm15, %v7532_v21, %v4301_v8  ;;  %v2938_v61 = vsel %vm2930_vm15, %v7535_v36, %v4302_v26  ;;  %v8431_v21 = vld [vmem:[#allocation18_spill] sm:$0xff]  ;;  %v4380_v42 = vpop.permute.xlu2 %4379  ;;  %v4352_v26 = vunpack.i.h.bf16 %v7572_v18  ;;  %v4351_v8 = vunpack.i.l.bf16 %v7572_v18 }
 0x4f2   : > { %v7605_v44 = vsel %vm2948_vm2, %v2940_v45, %v4326_v15  ;;  %v7608_v20 = vsel %vm2948_vm2, %v2941_v50, %v4327_v29  ;;  %v2946_v28 = vsel %vm2939_vm1, %v2937_v2, %v4321_v9  ;;  %v2947_v43 = vsel %vm2939_vm1, %v2938_v61, %v4322_v17  ;;  %v2298_v36 = vld [vmem:[#allocation3 + $0x112] sm:$0xff]  ;;  %v2265_v17 = vld [vmem:[#allocation3 + $0x100] sm:$0xff] }
 0x4f3   : > { %v4588_v54 = vpack.i.bf16 %v2298_v36, %v2297_v23  ;;  %v2305_v45 = vld [vmem:[#allocation3 + $0x190] sm:$0xff]  ;;  %v4568_v15 = vpack.i.bf16 %v7292_v56, %v2265_v17  ;;  %v4366_v2 = vunpack.i.l.bf16 %v7602_v49  ;;  %v3440_v18 = vsel %vm225_vm0, %v7548_v6, %v4352_v26  ;;  %v2315_v26 = vld [vmem:[#allocation3 + $0x240] sm:$0xff] }
 0x4f4   : > { %4574 = vrot.lane.b32.xlu2 %v4573_v60, %s4728_s7  ;;  %v4553_v63 = vpack.i.bf16 %v2305_v45, %v2304_v0 }
 0x4f5   : > { %4524 = vrot.lane.b32.xlu1 %v8431_v21, %s4733_s12  ;;  %4549 = vrot.lane.b32.xlu0 %v4548_v35, %s4731_s10  ;;  %v2306_v21 = vld [vmem:[#allocation3 + $0x1a0] sm:$0xff] }
 0x4f6   : > { %v4315_v4 = vpop.permute.xlu1 %4314  ;;  %v4593_v6 = vpack.i.bf16 %v2307_v14, %v2306_v21  ;;  %v2275_v21 = vld [vmem:[#allocation3 + $0x81] sm:$0xff] }
 0x4f7   : > { %v4317_v32 = vunpack.i.h.bf16 %v4315_v4  ;;  %v4316_v55 = vunpack.i.l.bf16 %v4315_v4  ;;  %v4340_v24 = vpop.permute.xlu0 %4339 }
 0x4f8   : > { %v4342_v52 = vunpack.i.h.bf16 %v4340_v24  ;;  %v4341_v38 = vunpack.i.l.bf16 %v4340_v24 }
 0x4f9   : > { %v2944_v13 = vsel %vm2939_vm1, %v7558_v25, %v4316_v55  ;;  %v2945_v22 = vsel %vm2939_vm1, %v7561_v19, %v4317_v32  ;;  %v2193_v32 = vld [vmem:[#allocation3 + $0x72] sm:$0xff] }
 0x4fa   : > { %v7624_v62 = vsel %vm2948_vm2, %v2944_v13, %v4336_v12  ;;  %v7627_v51 = vsel %vm2948_vm2, %v2945_v22, %v4337_v10  ;;  %v7630_v57 = vsel %vm2948_vm2, %v2946_v28, %v4341_v38  ;;  %v7633_v31 = vsel %vm2948_vm2, %v2947_v43, %v4342_v52  ;;  %v7680_v38 = vld [vmem:[#allocation3 + $0x82] sm:$0xff] }
 0x4fb   : > { %v3439_v28 = vsel %vm225_vm0, %v7568_v58, %v4351_v8  ;;  %v4382_v10 = vunpack.i.h.bf16 %v4380_v42  ;;  %v4381_v12 = vunpack.i.l.bf16 %v4380_v42  ;;  %v2259_v8 = vld [vmem:[#allocation3 + $0x90] sm:$0xff] }
 0x4fc   : > { %4589 = vrot.lane.b32.xlu2 %v4588_v54, %s4731_s10 }
 0x4fd   : > { %4539 = vrot.lane.b32.xlu1 %v4538_v41, %s4729_s8  ;;  %4564 = vrot.lane.b32.xlu0 %v4563_v27, %s4726_s6  ;;  %v4583_v41 = vpack.i.bf16 %v2193_v32, %v2192_v53  ;;  %v2335_v27 = vld [vmem:[#allocation3 + $0x162] sm:$0xff] }
 0x4fe   : > { %v4330_v25 = vpop.permute.xlu1 %4329 }
 0x4ff   : > { %v4332_v19 = vunpack.i.h.bf16 %v4330_v25  ;;  %v4331_v37 = vunpack.i.l.bf16 %v4330_v25  ;;  %v7638_v7 = vpop.permute.xlu0 %4354  ;;  %v2316_v25 = vld [vmem:[#allocation3 + $0x250] sm:$0xff] }
 0x500   : > { %v4357_v22 = vunpack.i.h.bf16 %v7638_v7  ;;  %v4356_v33 = vunpack.i.l.bf16 %v7638_v7 }
 0x501   : > { %v7642_v50 = vsel %vm2948_vm2, %v7585_v47, %v4331_v37  ;;  %v7646_v11 = vsel %vm2948_vm2, %v7588_v59, %v4332_v19  ;;  %v7654_v47 = vpop.permute.xlu2 %4394 }
 0x502   : > { %v4397_v19 = vunpack.i.h.bf16 %v7654_v47  ;;  %v4396_v37 = vunpack.i.l.bf16 %v7654_v47  ;;  %v3441_v46 = vsel %vm225_vm0, %v7544_v48, %v4356_v33  ;;  %v8432_v48 = vld [vmem:[#allocation9_spill] sm:$0xff] }
 0x503   : > { %v8433_v33 = vld [vmem:[#allocation17_spill] sm:$0xff] }
 0x504   : > { %3565 = vrot.lane.b32.xlu2 %v7214_v30, %s4719_s20  ;;  %v2187_v30 = vld [vmem:[#allocation3 + $0x12] sm:$0xff] }
 0x505   : > { %4554 = vrot.lane.b32.xlu1 %v4553_v63, %s4732_s11  ;;  %4579 = vrot.lane.b32.xlu0 %v4578_v16, %s4729_s8  ;;  %v3442_v63 = vsel %vm225_vm0, %v2192_v53, %v4357_v22  ;;  %v2343_v53 = vld [vmem:[#allocation3 + $0x202] sm:$0xff] }
 0x506   : > { %v4345_v5 = vpop.permute.xlu1 %4344 }
 0x507   : > { %v4347_v59 = vunpack.i.h.bf16 %v4345_v5  ;;  %v4346_v9 = vunpack.i.l.bf16 %v4345_v5  ;;  %v4370_v29 = vpop.permute.xlu0 %4369 }
 0x508   : > { %v4372_v61 = vunpack.i.h.bf16 %v4370_v29  ;;  %v4371_v60 = vunpack.i.l.bf16 %v4370_v29 }
 0x509   : > { %v3437_v43 = vsel %vm225_vm0, %v2187_v30, %v4346_v9  ;;  %v3438_v35 = vsel %vm225_vm0, %v7574_v40, %v4347_v59  ;;  %v4410_v52 = vpop.permute.xlu2 %4409  ;;  %v4598_v59 = vpack.i.bf16 %v2316_v25, %v2315_v26 }
 0x50a   : > { %v7667_v56 = vsel %vm707_vm3, %v3440_v18, %v4372_v61  ;;  %v3447_v49 = vsel %vm707_vm3, %v3439_v28, %v4371_v60  ;;  %v7671_v4 = vsel %vm707_vm3, %v3437_v43, %v4366_v2  ;;  %v7674_v36 = vsel %vm707_vm3, %v3438_v35, %v4367_v34 }
 0x50b   : > { %v4608_v2 = vpack.i.bf16 %v2259_v8, %v8432_v48  ;;  %v4412_v18 = vunpack.i.h.bf16 %v4410_v52  ;;  %v4411_v28 = vunpack.i.l.bf16 %v4410_v52 }
 0x50d   : > { %4569 = vrot.lane.b32.xlu1 %v4568_v15, %s4727_s24  ;;  %4594 = vrot.lane.b32.xlu0 %v4593_v6, %s4732_s11  ;;  %v2276_v6 = vld [vmem:[#allocation3 + $0x91] sm:$0xff] }
 0x50e   : > { %v4360_v58 = vpop.permute.xlu1 %4359 }
 0x50f   : > { %v4362_v40 = vunpack.i.h.bf16 %v4360_v58  ;;  %v4361_v55 = vunpack.i.l.bf16 %v4360_v58  ;;  %v7678_v24 = vpop.permute.xlu0 %4384 }
 0x511   : > { %v3444_v23 = vsel %vm225_vm0, %v7680_v38, %v4362_v40  ;;  %v3443_v3 = vsel %vm225_vm0, %v2193_v32, %v4361_v55  ;;  %v7698_v9 = vpop.permute.xlu2 %4424 }
 0x512   : > { %v3451_v54 = vsel %vm707_vm3, %v3443_v3, %v4381_v12  ;;  %v3452_v13 = vsel %vm707_vm3, %v3444_v23, %v4382_v10  ;;  %v4618_v23 = vpack.i.bf16 %v2276_v6, %v2275_v21 }
 0x515   : > { %4584 = vrot.lane.b32.xlu1 %v4583_v41, %s4730_s9  ;;  %3597 = vrot.lane.b32.xlu0 %v2335_v27, %s4720_s25  ;;  %v2268_v41 = vld [vmem:[#allocation3 + $0x130] sm:$0xff] }
 0x516   : > { %v4375_v42 = vpop.permute.xlu1 %4374  ;;  %v4613_v27 = vpack.i.bf16 %v2268_v41, %v8433_v33  ;;  %v2330_v41 = vld [vmem:[#allocation3 + $0x231] sm:$0xff]  ;;  %v2345_v33 = vld [vmem:[#allocation3 + $0x222] sm:$0xff] }
 0x517   : > { %v4377_v0 = vunpack.i.h.bf16 %v4375_v42  ;;  %v4376_v1 = vunpack.i.l.bf16 %v4375_v42  ;;  %v4400_v45 = vpop.permute.xlu0 %4399  ;;  %v2344_v42 = vld [vmem:[#allocation3 + $0x212] sm:$0xff] }
 0x518   : > { %v4402_v7 = vunpack.i.h.bf16 %v4400_v45  ;;  %v4401_v16 = vunpack.i.l.bf16 %v4400_v45 }
 0x519   : > { %v3449_v5 = vsel %vm707_vm3, %v3441_v46, %v4376_v1  ;;  %v3450_v17 = vsel %vm707_vm3, %v3442_v63, %v4377_v0  ;;  %v4440_v52 = vpop.permute.xlu2 %4439  ;;  %v2309_v46 = vld [vmem:[#allocation3 + $0x1d0] sm:$0xff] }
 0x51a   : > { %v3460_v47 = vsel %vm716_vm4, %v3452_v13, %v4402_v7  ;;  %v3459_v29 = vsel %vm716_vm4, %v3451_v54, %v4401_v16  ;;  %v3457_v15 = vsel %vm716_vm4, %v3449_v5, %v4396_v37  ;;  %v3458_v34 = vsel %vm716_vm4, %v3450_v17, %v4397_v19  ;;  %v2336_v5 = vld [vmem:[#allocation3 + $0x172] sm:$0xff] }
 0x51b   : > { %v4442_v45 = vunpack.i.h.bf16 %v4440_v52  ;;  %v4441_v63 = vunpack.i.l.bf16 %v4440_v52  ;;  %v8434_v17 = vld [vmem:[#allocation42_spill] sm:$0xff] }
 0x51d   : > { %4599 = vrot.lane.b32.xlu1 %v4598_v59, %s4733_s12  ;;  %4609 = vrot.lane.b32.xlu0 %v4608_v2, %s4726_s6  ;;  %v4638_v59 = vpack.i.bf16 %v2309_v46, %v8434_v17 }
 0x51e   : > { %v4390_v30 = vpop.permute.xlu1 %4389 }
 0x51f   : > { %v4392_v61 = vunpack.i.h.bf16 %v4390_v30  ;;  %v4391_v60 = vunpack.i.l.bf16 %v4390_v30  ;;  %v4415_v14 = vpop.permute.xlu0 %4414 }
 0x520   : > { %v4417_v43 = vunpack.i.h.bf16 %v4415_v14  ;;  %v4416_v35 = vunpack.i.l.bf16 %v4415_v14 }
 0x521   : > { %v3455_v58 = vsel %vm716_vm4, %v3447_v49, %v4391_v60  ;;  %v3456_v32 = vsel %vm716_vm4, %v7667_v56, %v4392_v61  ;;  %v4455_v25 = vpop.permute.xlu2 %4454 }
 0x522   : > { %v3465_v40 = vsel %vm725_vm5, %v3457_v15, %v4416_v35  ;;  %v3466_v55 = vsel %vm725_vm5, %v3458_v34, %v4417_v43  ;;  %v3463_v10 = vsel %vm725_vm5, %v3455_v58, %v4411_v28  ;;  %v3464_v12 = vsel %vm725_vm5, %v3456_v32, %v4412_v18  ;;  %v2292_v34 = vld [vmem:[#allocation3 + $0x92] sm:$0xff]  ;;  %v2337_v32 = vld [vmem:[#allocation3 + $0x182] sm:$0xff] }
 0x523   : > { %v4457_v61 = vunpack.i.h.bf16 %v4455_v25  ;;  %v4628_v43 = vpack.i.bf16 %v2292_v34, %v7680_v38  ;;  %v2318_v38 = vld [vmem:[#allocation3 + $0x270] sm:$0xff] }
 0x525   : > { %3629 = vrot.lane.b32.xlu1 %v2343_v53, %s4721_s26  ;;  %4619 = vrot.lane.b32.xlu0 %v4618_v23, %s4728_s7 }
 0x526   : > { %v7716_v3 = vpop.permute.xlu1 %4404 }
 0x527   : > { %v4430_v49 = vpop.permute.xlu0 %4429 }
 0x528   : > { %v4432_v56 = vunpack.i.h.bf16 %v4430_v49  ;;  %v4431_v54 = vunpack.i.l.bf16 %v4430_v49  ;;  %v4643_v49 = vpack.i.bf16 %v2318_v38, %v7372_v39  ;;  %v4407_v39 = vunpack.i.h.bf16 %v7716_v3 }
 0x529   : > { %v7732_v60 = vpop.permute.xlu2 %4469 }
 0x52a   : > { %v3471_v13 = vsel %vm734_vm6, %v3463_v10, %v4431_v54  ;;  %v3472_v22 = vsel %vm734_vm6, %v3464_v12, %v4432_v56 }
 0x52d   : > { %4614 = vrot.lane.b32.xlu1 %v4613_v27, %s4727_s24  ;;  %3631 = vrot.lane.b32.xlu0 %v2344_v42, %s4721_s26  ;;  %v4387_v42 = vunpack.i.h.bf16 %v7678_v24 }
 0x52e   : > { %v4420_v19 = vpop.permute.xlu1 %4419 }
 0x52f   : > { %v4422_v37 = vunpack.i.h.bf16 %v4420_v19  ;;  %v4421_v0 = vunpack.i.l.bf16 %v4420_v19  ;;  %v7723_v1 = vpop.permute.xlu0 %4444 }
 0x531   : > { %v3467_v7 = vsel %vm725_vm5, %v3459_v29, %v4421_v0  ;;  %v3468_v16 = vsel %vm725_vm5, %v3460_v47, %v4422_v37  ;;  %v4456_v29 = vunpack.i.l.bf16 %v4455_v25  ;;  %v4485_v52 = vpop.permute.xlu2 %4484  ;;  %v4406_v25 = vunpack.i.l.bf16 %v7716_v3 }
 0x532   : > { %v3475_v26 = vsel %vm734_vm6, %v3467_v7, %v4441_v63  ;;  %v3476_v8 = vsel %vm734_vm6, %v3468_v16, %v4442_v45  ;;  %v3454_v63 = vsel %vm716_vm4, %v7674_v36, %v4387_v42  ;;  %v4426_v36 = vunpack.i.l.bf16 %v7698_v9 }
 0x533   : > { %v3462_v3 = vsel %vm725_vm5, %v3454_v63, %v4407_v39  ;;  %v2332_v63 = vld [vmem:[#allocation3 + $0x251] sm:$0xff] }
 0x535   : > { %3599 = vrot.lane.b32.xlu1 %v2336_v5, %s4720_s25  ;;  %4639 = vrot.lane.b32.xlu0 %v4638_v59, %s4732_s11  ;;  %v4427_v5 = vunpack.i.h.bf16 %v7698_v9  ;;  %v2338_v59 = vld [vmem:[#allocation3 + $0x192] sm:$0xff] }
 0x536   : > { %v4435_v15 = vpop.permute.xlu1 %4434 }
 0x537   : > { %v4437_v48 = vunpack.i.h.bf16 %v4435_v15  ;;  %v4436_v2 = vunpack.i.l.bf16 %v4435_v15  ;;  %v4460_v30 = vpop.permute.xlu0 %4459  ;;  %v3470_v34 = vsel %vm734_vm6, %v3462_v3, %v4427_v5 }
 0x538   : > { %v4462_v47 = vunpack.i.h.bf16 %v4460_v30  ;;  %v4461_v14 = vunpack.i.l.bf16 %v4460_v30 }
 0x539   : > { %v3473_v18 = vsel %vm734_vm6, %v3465_v40, %v4436_v2  ;;  %v3474_v28 = vsel %vm734_vm6, %v3466_v55, %v4437_v48  ;;  %v4500_v27 = vpop.permute.xlu2 %4499 }
 0x53a   : > { %v3483_v35 = vsel %vm743_vm7, %v3475_v26, %v4461_v14  ;;  %v3484_v21 = vsel %vm743_vm7, %v3476_v8, %v4462_v47  ;;  %v7740_v6 = vsel %vm743_vm7, %v3473_v18, %v4456_v29  ;;  %v7743_v58 = vsel %vm743_vm7, %v3474_v28, %v4457_v61 }
 0x53b   : > { %v4447_v26 = vunpack.i.h.bf16 %v7723_v1  ;;  %v4446_v8 = vunpack.i.l.bf16 %v7723_v1  ;;  %v4487_v18 = vunpack.i.h.bf16 %v4485_v52  ;;  %v4486_v28 = vunpack.i.l.bf16 %v4485_v52 }
 0x53d   : > { %4629 = vrot.lane.b32.xlu1 %v4628_v43, %s4730_s9  ;;  %3601 = vrot.lane.b32.xlu0 %v2337_v32, %s4720_s25  ;;  %v3478_v30 = vsel %vm743_vm7, %v3470_v34, %v4447_v26 }
 0x53e   : > { %v4450_v40 = vpop.permute.xlu1 %4449 }
 0x53f   : > { %v4452_v10 = vunpack.i.h.bf16 %v4450_v40  ;;  %v4451_v55 = vunpack.i.l.bf16 %v4450_v40  ;;  %v7747_v12 = vpop.permute.xlu0 %4474  ;;  %v2339_v40 = vld [vmem:[#allocation3 + $0x1a2] sm:$0xff] }
 0x541   : > { %v7750_v53 = vsel %vm743_vm7, %v3471_v13, %v4451_v55  ;;  %v7753_v23 = vsel %vm743_vm7, %v3472_v22, %v4452_v10  ;;  %v2331_v13 = vld [vmem:[#allocation3 + $0x241] sm:$0xff]  ;;  %v4386_v22 = vunpack.i.l.bf16 %v7678_v24  ;;  %v4515_v48 = vpop.permute.xlu2 %4514  ;;  %v4502_v10 = vunpack.i.h.bf16 %v4500_v27 }
 0x542   : > { %v4501_v55 = vunpack.i.l.bf16 %v4500_v27 }
 0x543   : > { %v3453_v46 = vsel %vm716_vm4, %v7671_v4, %v4386_v22 }
 0x544   : > { %v3461_v16 = vsel %vm725_vm5, %v3453_v46, %v4406_v25 }
 0x545   : > { %4644 = vrot.lane.b32.xlu1 %v4643_v49, %s4733_s12  ;;  %3571 = vrot.lane.b32.xlu0 %v2330_v41, %s4719_s20  ;;  %v3469_v15 = vsel %vm734_vm6, %v3461_v16, %v4426_v36  ;;  %vm3709_vm6 = vcmask 523264  }
 0x546   : > { %v3477_v2 = vsel %vm743_vm7, %v3469_v15, %v4446_v8 }
 0x547   : > { %v4465_v56 = vpop.permute.xlu1 %4464  ;;  %v7758_v54 = vpop.permute.xlu0 %4489 }
 0x548   : > { %v4467_v17 = vunpack.i.h.bf16 %v4465_v56  ;;  %v4466_v4 = vunpack.i.l.bf16 %v4465_v56 }
 0x549   : > { %v4530_v42 = vpop.permute.xlu2 %4529 }
 0x54a   : > { %v3485_v1 = vsel %vm752_vm9, %v3477_v2, %v4466_v4  ;;  %v3486_v29 = vsel %vm752_vm9, %v3478_v30, %v4467_v17  ;;  %v4492_v4 = vunpack.i.h.bf16 %v7758_v54  ;;  %v4471_v2 = vunpack.i.l.bf16 %v7732_v60 }
 0x54b   : > { %v3493_v43 = vsel %vm761_vm8, %v3485_v1, %v4486_v28  ;;  %v4532_v28 = vunpack.i.h.bf16 %v4530_v42 }
 0x54d   : > { %3633 = vrot.lane.b32.xlu1 %v2345_v33, %s4721_s26  ;;  %3573 = vrot.lane.b32.xlu0 %v2331_v13, %s4719_s20 }
 0x54f   : > { %v4480_v19 = vpop.permute.xlu1 %4479  ;;  %v4505_v45 = vpop.permute.xlu0 %4504 }
 0x550   : > { %v4482_v37 = vunpack.i.h.bf16 %v4480_v19  ;;  %v4481_v0 = vunpack.i.l.bf16 %v4480_v19  ;;  %v4507_v56 = vunpack.i.h.bf16 %v4505_v45  ;;  %v4506_v52 = vunpack.i.l.bf16 %v4505_v45 }
 0x551   : > { %v4545_v30 = vpop.permute.xlu2 %4544 }
 0x552   : > { %v7771_v7 = vsel %vm752_vm9, %v3483_v35, %v4481_v0  ;;  %v7774_v24 = vsel %vm752_vm9, %v3484_v21, %v4482_v37  ;;  %v3494_v35 = vsel %vm761_vm8, %v3486_v29, %v4487_v18  ;;  %v4517_v37 = vunpack.i.h.bf16 %v4515_v48  ;;  %v2333_v29 = vld [vmem:[#allocation3 + $0x261] sm:$0xff] }
 0x553   : > { %v4516_v0 = vunpack.i.l.bf16 %v4515_v48  ;;  %v4472_v48 = vunpack.i.h.bf16 %v7732_v60 }
 0x555   : > { %3603 = vrot.lane.b32.xlu1 %v2338_v59, %s4720_s25  ;;  %v4491_v59 = vunpack.i.l.bf16 %v7758_v54 }
 0x557   : > { %v4495_v61 = vpop.permute.xlu1 %4494  ;;  %v4520_v14 = vpop.permute.xlu0 %4519 }
 0x558   : > { %v4497_v9 = vunpack.i.h.bf16 %v4495_v61  ;;  %v4496_v47 = vunpack.i.l.bf16 %v4495_v61  ;;  %v4522_v16 = vunpack.i.h.bf16 %v4520_v14  ;;  %v4521_v3 = vunpack.i.l.bf16 %v4520_v14 }
 0x55a   : > { %v3501_v21 = vsel %vm1661_vm10, %v3493_v43, %v4496_v47  ;;  %v3502_v32 = vsel %vm1661_vm10, %v3494_v35, %v4497_v9  ;;  %v3487_v9 = vsel %vm752_vm9, %v7750_v53, %v4471_v2  ;;  %v3488_v47 = vsel %vm752_vm9, %v7753_v23, %v4472_v48 }
 0x55b   : > { %v3509_v38 = vsel %vm2903_vm12, %v3501_v21, %v4501_v55  ;;  %v3510_v49 = vsel %vm2903_vm12, %v3502_v32, %v4502_v10  ;;  %v3495_v54 = vsel %vm761_vm8, %v3487_v9, %v4491_v59  ;;  %v3496_v14 = vsel %vm761_vm8, %v3488_v47, %v4492_v4  ;;  %v2299_v47 = vld [vmem:[#allocation3 + $0x122] sm:$0xff] }
 0x55c   : > { %v3517_v22 = vsel %vm2912_vm13, %v3509_v38, %v4506_v52  ;;  %v3518_v39 = vsel %vm2912_vm13, %v3510_v49, %v4507_v56  ;;  %v4531_v43 = vunpack.i.l.bf16 %v4530_v42  ;;  %v3504_v23 = vsel %vm1661_vm10, %v3496_v14, %v4532_v28  ;;  %v2328_v56 = vld [vmem:[#allocation3 + $0x211] sm:$0xff]  ;;  %v4560_v52 = vpop.permute.xlu2 %4559 }
 0x55d   : > { %3605 = vrot.lane.b32.xlu1 %v2339_v40, %s4720_s25  ;;  %v4547_v49 = vunpack.i.h.bf16 %v4545_v30 }
 0x55e   : > { %v3503_v53 = vsel %vm1661_vm10, %v3495_v54, %v4531_v43  ;;  %v2300_v54 = vld [vmem:[#allocation3 + $0x132] sm:$0xff] }
 0x55f   : > { %v4510_v41 = vpop.permute.xlu1 %4509  ;;  %v4535_v25 = vpop.permute.xlu0 %4534 }
 0x560   : > { %v4512_v33 = vunpack.i.h.bf16 %v4510_v41  ;;  %v4511_v13 = vunpack.i.l.bf16 %v4510_v41  ;;  %v4537_v60 = vunpack.i.h.bf16 %v4535_v25  ;;  %v4536_v18 = vunpack.i.l.bf16 %v4535_v25 }
 0x561   : > { %v4546_v41 = vunpack.i.l.bf16 %v4545_v30 }
 0x562   : > { %v3525_v19 = vsel %vm2921_vm14, %v3517_v22, %v4511_v13  ;;  %v3526_v27 = vsel %vm2921_vm14, %v3518_v39, %v4512_v33  ;;  %v3511_v40 = vsel %vm2903_vm12, %v3503_v53, %v4536_v18  ;;  %v3512_v10 = vsel %vm2903_vm12, %v3504_v23, %v4537_v60  ;;  %v3735_v33 = vld [vmem:[%s8042_s3 + $0x88] sm:$0xff] }
 0x563   : > { %v3533_v46 = vsel %vm2930_vm15, %v3525_v19, %v4516_v0  ;;  %v3534_v45 = vsel %vm2930_vm15, %v3526_v27, %v4517_v37  ;;  %3819 = vmatpush.msrb.mxu2 %v3735_v33  ;;  %v2283_v0 = vld [vmem:[#allocation3 + $0x121] sm:$0xff] }
 0x564   : > { %v3541_v36 = vsel %vm2939_vm1, %v3533_v46, %v4521_v3  ;;  %v3542_v17 = vsel %vm2939_vm1, %v3534_v45, %v4522_v16  ;;  %v4562_v46 = vunpack.i.h.bf16 %v4560_v52  ;;  %v4561_v45 = vunpack.i.l.bf16 %v4560_v52  ;;  %v4575_v48 = vpop.permute.xlu2 %4574 }
 0x565   : > { %3575 = vrot.lane.b32.xlu1 %v2332_v63, %s4719_s20  ;;  %v2284_v63 = vld [vmem:[#allocation3 + $0x131] sm:$0xff] }
 0x567   : > { %v4525_v26 = vpop.permute.xlu1 %4524  ;;  %v4550_v1 = vpop.permute.xlu0 %4549 }
 0x568   : > { %v4527_v8 = vunpack.i.h.bf16 %v4525_v26  ;;  %v4526_v5 = vunpack.i.l.bf16 %v4525_v26  ;;  %v4552_v39 = vunpack.i.h.bf16 %v4550_v1  ;;  %v4551_v25 = vunpack.i.l.bf16 %v4550_v1  ;;  %v3734_v26 = vld [vmem:[%s8042_s3 + $0x80] sm:$0xff] }
 0x569   : > { %3820 = vmatpush.msrb.mxu2 %v3734_v26 }
 0x56a   : > { %v3549_v15 = vsel %vm2948_vm2, %v3541_v36, %v4526_v5  ;;  %v3550_v34 = vsel %vm2948_vm2, %v3542_v17, %v4527_v8  ;;  %v4623_v36 = vpack.i.bf16 %v2284_v63, %v2283_v0 }
 0x56b   : > { %v4603_v61 = vpack.i.bf16 %v3550_v34, %v3549_v15  ;;  %v4477_v15 = vunpack.i.h.bf16 %v7747_v12  ;;  %v4476_v34 = vunpack.i.l.bf16 %v7747_v12  ;;  %v4633_v12 = vpack.i.bf16 %v2300_v54, %v2299_v47  ;;  %v2346_v54 = vld [vmem:[#allocation3 + $0x232] sm:$0xff] }
 0x56d   : > { %3577 = vrot.lane.b32.xlu1 %v2333_v29, %s4719_s20  ;;  %4604 = vrot.lane.b32.xlu2 %v4603_v61, %s4734_s27  ;;  %v3489_v14 = vsel %vm752_vm9, %v7740_v6, %v4476_v34  ;;  %v3490_v60 = vsel %vm752_vm9, %v7743_v58, %v4477_v15 }
 0x56f   : > { %v4540_v35 = vpop.permute.xlu1 %4539  ;;  %v4565_v22 = vpop.permute.xlu0 %4564 }
 0x570   : > { %v4542_v21 = vunpack.i.h.bf16 %v4540_v35  ;;  %v4541_v32 = vunpack.i.l.bf16 %v4540_v35  ;;  %v4567_v2 = vunpack.i.h.bf16 %v4565_v22  ;;  %v4566_v30 = vunpack.i.l.bf16 %v4565_v22 }
 0x572   : > { %v3519_v55 = vsel %vm2912_vm13, %v3511_v40, %v4541_v32  ;;  %v3520_v38 = vsel %vm2912_vm13, %v3512_v10, %v4542_v21  ;;  %v3497_v18 = vsel %vm761_vm8, %v3489_v14, %v4566_v30  ;;  %v3498_v28 = vsel %vm761_vm8, %v3490_v60, %v4567_v2  ;;  %v2319_v30 = vld [vmem:[#allocation3 + $0x161] sm:$0xff]  ;;  %v2348_v14 = vld [vmem:[#allocation3 + $0x252] sm:$0xff] }
 0x573   : > { %v3527_v13 = vsel %vm2921_vm14, %v3519_v55, %v4546_v41  ;;  %v3528_v42 = vsel %vm2921_vm14, %v3520_v38, %v4547_v49  ;;  %v4577_v21 = vunpack.i.h.bf16 %v4575_v48  ;;  %v4576_v32 = vunpack.i.l.bf16 %v4575_v48  ;;  %v4590_v38 = vpop.permute.xlu2 %4589  ;;  %v3733_v49 = vld [vmem:[%s8042_s3 + $0x78] sm:$0xff]  ;;  %v3724_v60 = vld [vmem:[%s8042_s3 + $0x30] sm:$0xff] }
 0x574   : > { %v3535_v16 = vsel %vm2930_vm15, %v3527_v13, %v4551_v25  ;;  %v3536_v3 = vsel %vm2930_vm15, %v3528_v42, %v4552_v39  ;;  %3764 = vmatpush.msrb.mxu1 %v3733_v49  ;;  %v4592_v42 = vunpack.i.h.bf16 %v4590_v38  ;;  %v4591_v22 = vunpack.i.l.bf16 %v4590_v38  ;;  %v2329_v39 = vld [vmem:[#allocation3 + $0x221] sm:$0xff]  ;;  %v3732_v25 = vld [vmem:[%s8042_s3 + $0x70] sm:$0xff]  ;;  %v3729_v48 = vld [vmem:[%s8042_s3 + $0x58] sm:$0xff] }
 0x575   : > { %3567 = vrot.lane.b32.xlu2 %v2328_v56, %s4719_s20 }
 0x576   : > { %3765 = vmatpush.msrb.mxu1 %v3732_v25 }
 0x577   : > { %v4555_v19 = vpop.permute.xlu1 %4554  ;;  %v4580_v1 = vpop.permute.xlu0 %4579 }
 0x578   : > { %v4557_v27 = vunpack.i.h.bf16 %v4555_v19  ;;  %v4556_v37 = vunpack.i.l.bf16 %v4555_v19  ;;  %v4582_v40 = vunpack.i.h.bf16 %v4580_v1  ;;  %v4581_v58 = vunpack.i.l.bf16 %v4580_v1 }
 0x57a   : > { %v3543_v8 = vsel %vm2939_vm1, %v3535_v16, %v4556_v37  ;;  %v3544_v5 = vsel %vm2939_vm1, %v3536_v3, %v4557_v27  ;;  %v3731_v16 = vld [vmem:[%s8042_s3 + $0x68] sm:$0xff]  ;;  %v3730_v3 = vld [vmem:[%s8042_s3 + $0x60] sm:$0xff] }
 0x57b   : > { %v7839_v17 = vsel %vm2948_vm2, %v3543_v8, %v4561_v45  ;;  %v7842_v4 = vsel %vm2948_vm2, %v3544_v5, %v4562_v46  ;;  %3766 = vmatpush.msrb.mxu1 %v3731_v16  ;;  %v3566_v15 = vpop.permute.xlu2 %3565 }
 0x57c   : > { %v4648_v59 = vpack.i.bf16 %v7842_v4, %v7839_v17  ;;  %v3653_v1 = vsel %vm225_vm0, %v2319_v30, %v3566_v15  ;;  %v3727_v17 = vld [vmem:[%s8042_s3 + $0x48] sm:$0xff]  ;;  %v3726_v4 = vld [vmem:[%s8042_s3 + $0x40] sm:$0xff] }
 0x57d   : > { %4624 = vrot.lane.b32.xlu2 %v4623_v36, %s4729_s8  ;;  %3767 = vmatpush.msrb.mxu1 %v3730_v3 }
 0x57f   : > { %v4570_v61 = vpop.permute.xlu1 %4569  ;;  %v4595_v41 = vpop.permute.xlu0 %4594  ;;  %3768 = vmatpush.msrb.mxu1 %v3729_v48 }
 0x580   : > { %v4572_v29 = vunpack.i.h.bf16 %v4570_v61  ;;  %v4571_v9 = vunpack.i.l.bf16 %v4570_v61  ;;  %v4597_v37 = vunpack.i.h.bf16 %v4595_v41  ;;  %v4596_v0 = vunpack.i.l.bf16 %v4595_v41  ;;  %v3728_v61 = vld [vmem:[%s8042_s3 + $0x50] sm:$0xff] }
 0x581   : > { %3769 = vmatpush.msrb.mxu1 %v3728_v61  ;;  %v2342_v41 = vld [vmem:[#allocation3 + $0x1d2] sm:$0xff] }
 0x582   : > { %v3505_v43 = vsel %vm1661_vm10, %v3497_v18, %v4571_v9  ;;  %v3506_v35 = vsel %vm1661_vm10, %v3498_v28, %v4572_v29  ;;  %v3723_v18 = vld [vmem:[%s8042_s3 + $0x28] sm:$0xff]  ;;  %v3722_v28 = vld [vmem:[%s8042_s3 + $0x20] sm:$0xff] }
 0x583   : > { %v3513_v53 = vsel %vm2903_vm12, %v3505_v43, %v4576_v32  ;;  %v3514_v6 = vsel %vm2903_vm12, %v3506_v35, %v4577_v21  ;;  %3770 = vmatpush.msrb.mxu1 %v3727_v17  ;;  %v2347_v43 = vld [vmem:[#allocation3 + $0x242] sm:$0xff]  ;;  %v3720_v21 = vld [vmem:[%s8042_s3 + $0x10] sm:$0xff] }
 0x584   : > { %v3521_v56 = vsel %vm2912_vm13, %v3513_v53, %v4581_v58  ;;  %v3522_v52 = vsel %vm2912_vm13, %v3514_v6, %v4582_v40  ;;  %v4709_v35 = vld [vmem:[#allocation3 + $0x262] sm:$0xff]  ;;  %v2340_v6 = vld [vmem:[#allocation3 + $0x1b2] sm:$0xff] }
 0x585   : > { %4634 = vrot.lane.b32.xlu2 %v4633_v12, %s4731_s10  ;;  %3771 = vmatpush.msrb.mxu1 %v3726_v4  ;;  %v3721_v12 = vld [vmem:[%s8042_s3 + $0x18] sm:$0xff]  ;;  %v3719_v32 = vld [vmem:[%s8042_s3 + $0x8] sm:$0xff]  ;;  %v3718_v53 = vld [vmem:[%s8042_s3] sm:$0xff] }
 0x586   : > { %v2334_v40 = vld [vmem:[#allocation3 + $0x271] sm:$0xff] }
 0x587   : > { %v4585_v23 = vpop.permute.xlu1 %4584  ;;  %v3598_v2 = vpop.permute.xlu0 %3597 }
 0x588   : > { %v4587_v10 = vunpack.i.h.bf16 %v4585_v23  ;;  %v4586_v55 = vunpack.i.l.bf16 %v4585_v23  ;;  %v3661_v29 = vsel %vm707_vm3, %v3653_v1, %v3598_v2  ;;  %v2341_v23 = vld [vmem:[#allocation3 + $0x1c2] sm:$0xff] }
 0x58a   : > { %v3529_v33 = vsel %vm2921_vm14, %v3521_v56, %v4586_v55  ;;  %v3530_v13 = vsel %vm2921_vm14, %v3522_v52, %v4587_v10 }
 0x58b   : > { %v3537_v19 = vsel %vm2930_vm15, %v3529_v33, %v4591_v22  ;;  %v3538_v27 = vsel %vm2930_vm15, %v3530_v13, %v4592_v42  ;;  %v2320_v13 = vld [vmem:[#allocation3 + $0x171] sm:$0xff] }
 0x58c   : > { %v3545_v26 = vsel %vm2939_vm1, %v3537_v19, %v4596_v0  ;;  %v3546_v8 = vsel %vm2939_vm1, %v3538_v27, %v4597_v37 }
 0x58d   : > { %3569 = vrot.lane.b32.xlu2 %v2329_v39, %s4719_s20 }
 0x58f   : > { %v4600_v63 = vpop.permute.xlu1 %4599  ;;  %v4610_v58 = vpop.permute.xlu0 %4609 }
 0x590   : > { %v4602_v46 = vunpack.i.h.bf16 %v4600_v63  ;;  %v4601_v45 = vunpack.i.l.bf16 %v4600_v63  ;;  %v4612_v0 = vunpack.i.h.bf16 %v4610_v58 }
 0x592   : > { %v3553_v5 = vsel %vm2948_vm2, %v3545_v26, %v4601_v45  ;;  %v3554_v36 = vsel %vm2948_vm2, %v3546_v8, %v4602_v46  ;;  %v3500_v3 = vsel %vm761_vm8, %v7774_v24, %v4612_v0  ;;  %v2323_v0 = vld [vmem:[#allocation3 + $0x1a1] sm:$0xff] }
 0x593   : > { %v4653_v34 = vpack.i.bf16 %v3554_v36, %v3553_v5 }
 0x595   : > { %4649 = vrot.lane.b32.xlu2 %v4648_v59, %s4734_s27  ;;  %4654 = vrot.lane.b32.xlu0 %v4653_v34, %s4734_s27  ;;  %v3725_v59 = vld [vmem:[%s8042_s3 + $0x38] sm:$0xff] }
 0x596   : > { %3772 = vmatpush.msrb.mxu1 %v3725_v59 }
 0x597   : > { %v3630_v9 = vpop.permute.xlu1 %3629  ;;  %v4620_v55 = vpop.permute.xlu0 %4619 }
 0x598   : > { %v3669_v47 = vsel %vm716_vm4, %v3661_v29, %v3630_v9  ;;  %3773 = vmatpush.msrb.mxu1 %v3724_v60  ;;  %v4622_v36 = vunpack.i.h.bf16 %v4620_v55  ;;  %v4621_v15 = vunpack.i.l.bf16 %v4620_v55  ;;  %v2350_v55 = vld [vmem:[#allocation3 + $0x272] sm:$0xff] }
 0x599   : > { %3991 = vmatmul.msk.f32.vlgmr.msrb.gmra.mxu2 %vm725_vm5, %v3669_v47 }
 0x59a   : > { %3774 = vmatpush.msrb.mxu1 %v3723_v18 }
 0x59c   : > { %3775 = vmatpush.msrb.mxu1 %v3722_v28 }
 0x59d   : > { %3635 = vrot.lane.b32.xlu2 %v2346_v54, %s4721_s26  ;;  %3639 = vrot.lane.b32.xlu0 %v2348_v14, %s4721_s26 }
 0x59e   : > { %3776 = vmatpush.msrb.mxu1 %v3721_v12 }
 0x59f   : > { %v4615_v10 = vpop.permute.xlu1 %4614  ;;  %v3632_v39 = vpop.permute.xlu0 %3631 }
 0x5a0   : > { %3777 = vmatpush.msrb.mxu1 %v3720_v21  ;;  %v4617_v63 = vunpack.i.h.bf16 %v4615_v10  ;;  %v4616_v46 = vunpack.i.l.bf16 %v4615_v10 }
 0x5a2   : > { %3778 = vmatpush.msrb.mxu1 %v3719_v32 }
 0x5a4   : > { %3779 = vmatpush.msrb.mxu1 %v3718_v53  ;;  %v2321_v53 = vld [vmem:[#allocation3 + $0x181] sm:$0xff] }
 0x5a5   : > { %3637 = vrot.lane.b32.xlu2 %v2347_v43, %s4721_s26  ;;  %3641 = vrot.lane.b32.xlu0 %v4709_v35, %s4721_s26 }
 0x5a7   : > { %v3600_v56 = vpop.permute.xlu1 %3599  ;;  %v4640_v34 = vpop.permute.xlu0 %4639 }
 0x5a8   : > { %v4642_v17 = vunpack.i.h.bf16 %v4640_v34  ;;  %v4641_v4 = vunpack.i.l.bf16 %v4640_v34 }
 0x5ad   : > { %3607 = vrot.lane.b32.xlu2 %v2340_v6, %s4720_s25  ;;  %3611 = vrot.lane.b32.xlu0 %v2342_v41, %s4720_s25 }
 0x5af   : > { %v4630_v37 = vpop.permute.xlu1 %4629  ;;  %v3602_v32 = vpop.permute.xlu0 %3601 }
 0x5b0   : > { %v4632_v1 = vunpack.i.h.bf16 %v4630_v37  ;;  %v4631_v24 = vunpack.i.l.bf16 %v4630_v37 }
 0x5b5   : > { %3609 = vrot.lane.b32.xlu2 %v2341_v23, %s4720_s25 }
 0x5b7   : > { %v4645_v30 = vpop.permute.xlu1 %4644  ;;  %v3572_v41 = vpop.permute.xlu0 %3571 }
 0x5b8   : > { %v4647_v14 = vunpack.i.h.bf16 %v4645_v30  ;;  %v4646_v60 = vunpack.i.l.bf16 %v4645_v30 }
 0x5bd   : > { %3579 = vrot.lane.b32.xlu2 %v2334_v40, %s4719_s20 }
 0x5bf   : > { %v3634_v23 = vpop.permute.xlu1 %3633 }
 0x5c7   : > { %v4605_v38 = vpop.permute.xlu2 %4604 }
 0x5c8   : > { %v4606_v49 = vunpack.i.l.bf16 %v4605_v38  ;;  %v4607_v33 = vunpack.i.h.bf16 %v4605_v38 }
 0x5ca   : > { %v3710_v52 = vsel %vm3709_vm6, %v7605_v44, %v4606_v49  ;;  %v3711_v19 = vsel %vm3709_vm6, %v7608_v20, %v4607_v33  ;;  %v4611_v44 = vunpack.i.l.bf16 %v4610_v58  ;;  %v3508_v20 = vsel %vm1661_vm10, %v3500_v3, %v4617_v63  ;;  %v2322_v33 = vld [vmem:[#allocation3 + $0x191] sm:$0xff] }
 0x5cb   : > { %3780 = vmatmul.f32.vlgmr.msrb.gmra.mxu1 %v3710_v52  ;;  %v3516_v2 = vsel %vm2903_vm12, %v3508_v20, %v4622_v36  ;;  %v2324_v20 = vld [vmem:[#allocation3 + $0x1b1] sm:$0xff] }
 0x5cc   : > { %v3499_v16 = vsel %vm761_vm8, %v7771_v7, %v4611_v44 }
 0x5cd   : > { %v3507_v26 = vsel %vm1661_vm10, %v3499_v16, %v4616_v46 }
 0x5ce   : > { %v3515_v48 = vsel %vm2903_vm12, %v3507_v26, %v4621_v15 }
 0x5cf   : > { %v3568_v42 = vpop.permute.xlu2 %3567 }
 0x5d0   : > { %v3654_v22 = vsel %vm225_vm0, %v2320_v13, %v3568_v42  ;;  %v3656_v13 = vsel %vm225_vm0, %v2322_v33, %v3572_v41 }
 0x5d1   : > { %v3662_v25 = vsel %vm707_vm3, %v3654_v22, %v3600_v56  ;;  %v3604_v56 = vpop.permute.xlu1 %3603 }
 0x5d2   : > { %v3670_v27 = vsel %vm716_vm4, %v3662_v25, %v3632_v39  ;;  %v3664_v22 = vsel %vm707_vm3, %v3656_v13, %v3604_v56 }
 0x5d3   : > { %3783 = vmatmul.f32.gmra.mxu1 %v3711_v19  ;;  %3992 = vmatmul.msk.f32.gmra.mxu2 %vm725_vm5, %v3670_v27  ;;  %v3574_v27 = vpop.permute.xlu0 %3573 }
 0x5d7   : > { %v4625_v45 = vpop.permute.xlu2 %4624 }
 0x5d8   : > { %v4627_v8 = vunpack.i.h.bf16 %v4625_v45  ;;  %v4626_v5 = vunpack.i.l.bf16 %v4625_v45 }
 0x5d9   : > { %v3606_v37 = vpop.permute.xlu1 %3605 }
 0x5da   : > { %v3524_v61 = vsel %vm2912_vm13, %v3516_v2, %v4627_v8  ;;  %v3523_v7 = vsel %vm2912_vm13, %v3515_v48, %v4626_v5 }
 0x5db   : > { %v3531_v59 = vsel %vm2921_vm14, %v3523_v7, %v4631_v24  ;;  %v3532_v54 = vsel %vm2921_vm14, %v3524_v61, %v4632_v1 }
 0x5df   : > { %v4635_v29 = vpop.permute.xlu2 %4634 }
 0x5e0   : > { %v4637_v9 = vunpack.i.h.bf16 %v4635_v29  ;;  %v4636_v47 = vunpack.i.l.bf16 %v4635_v29  ;;  %v7996_v29 = vld [vmem:[%s8043_s4] ss:$0 sm:$0xff] }
 0x5e1   : > { %v3576_v3 = vpop.permute.xlu1 %3575 }
 0x5e2   : > { %v3539_v18 = vsel %vm2930_vm15, %v3531_v59, %v4636_v47  ;;  %v3540_v28 = vsel %vm2930_vm15, %v3532_v54, %v4637_v9  ;;  %v3658_v8 = vsel %vm225_vm0, %v2324_v20, %v3576_v3 }
 0x5e3   : > { %v3547_v12 = vsel %vm2939_vm1, %v3539_v18, %v4641_v4  ;;  %v3548_v43 = vsel %vm2939_vm1, %v3540_v28, %v4642_v17 }
 0x5e4   : > { %v3555_v35 = vsel %vm2948_vm2, %v3547_v12, %v4646_v60  ;;  %v3556_v21 = vsel %vm2948_vm2, %v3548_v43, %v4647_v14 }
 0x5e5   : > { %3697 = vrot.lane.b32.xlu1 %v3555_v35, %s4734_s27  ;;  %3699 = vrot.lane.b32.xlu2 %v3556_v21, %s4734_s27  ;;  %v2326_v35 = vld [vmem:[#allocation3 + $0x1d1] sm:$0xff] }
 0x5e7   : > { %v3570_v6 = vpop.permute.xlu2 %3569 }
 0x5e8   : > { %v3655_v40 = vsel %vm225_vm0, %v2321_v53, %v3570_v6 }
 0x5e9   : > { %v3663_v58 = vsel %vm707_vm3, %v3655_v40, %v3602_v32  ;;  %v3578_v2 = vpop.permute.xlu1 %3577 }
 0x5ea   : > { %v3671_v10 = vsel %vm716_vm4, %v3663_v58, %v3634_v23 }
 0x5eb   : > { %3993 = vmatmul.msk.f32.gmra.mxu2 %vm725_vm5, %v3671_v10 }
 0x5ed   : > { %3643 = vrot.lane.b32.xlu1 %v2350_v55, %s4721_s26  ;;  %s4002_s26 = sshll.u32 %s8436_s19, 6 }
 0x5ee   : > { %s8003_s12 = scalar_lea.vmem %s8044_s5, %s4002_s26 }
 0x5ef   : > { %v4650_v38 = vpop.permute.xlu2 %4649 }
 0x5f0   : > { %v4651_v49 = vunpack.i.l.bf16 %v4650_v38  ;;  %v4652_v42 = vunpack.i.h.bf16 %v4650_v38 }
 0x5f2   : > { %v3712_v52 = vsel %vm3709_vm6, %v7642_v50, %v4651_v49  ;;  %v3713_v19 = vsel %vm3709_vm6, %v7646_v11, %v4652_v42  ;;  %v3657_v50 = vsel %vm225_vm0, %v2323_v0, %v3574_v27 }
 0x5f3   : > { %3786 = vmatmul.f32.gmra.mxu1 %v3712_v52  ;;  %v3665_v44 = vsel %vm707_vm3, %v3657_v50, %v3606_v37 }
 0x5f7   : > { %v3636_v39 = vpop.permute.xlu2 %3635 }
 0x5f8   : > { %v3672_v25 = vsel %vm716_vm4, %v3664_v22, %v3636_v39 }
 0x5f9   : > { %3994 = vmatmul.msk.f32.gmra.mxu2 %vm725_vm5, %v3672_v25 }
 0x5fb   : > { %3789 = vmatmul.f32.gmra.mxu1 %v3713_v19 }
 0x5ff   : > { %v3638_v63 = vpop.permute.xlu2 %3637 }
 0x600   : > { %v3673_v46 = vsel %vm716_vm4, %v3665_v44, %v3638_v63 }
 0x601   : > { %3995 = vmatmul.msk.f32.gmra.mxu2 %vm725_vm5, %v3673_v46 }
 0x607   : > { %v4655_v45 = vpop.permute.xlu0 %4654  ;;  %v3608_v26 = vpop.permute.xlu2 %3607 }
 0x608   : > { %v4656_v16 = vunpack.i.l.bf16 %v4655_v45  ;;  %v4657_v5 = vunpack.i.h.bf16 %v4655_v45  ;;  %v3666_v36 = vsel %vm707_vm3, %v3658_v8, %v3608_v26 }
 0x60a   : > { %v3714_v11 = vsel %vm3709_vm6, %v7624_v62, %v4656_v16  ;;  %v3715_v48 = vsel %vm3709_vm6, %v7627_v51, %v4657_v5  ;;  %v2325_v62 = vld [vmem:[#allocation3 + $0x1c1] sm:$0xff] }
 0x60b   : > { %3792 = vmatmul.f32.gmra.mxu1 %v3714_v11  ;;  %v3659_v61 = vsel %vm225_vm0, %v2325_v62, %v3578_v2 }
 0x60f   : > { %v3640_v15 = vpop.permute.xlu0 %3639  ;;  %v3610_v30 = vpop.permute.xlu2 %3609 }
 0x610   : > { %v3674_v34 = vsel %vm716_vm4, %v3666_v36, %v3640_v15  ;;  %v3667_v7 = vsel %vm707_vm3, %v3659_v61, %v3610_v30 }
 0x611   : > { %3996 = vmatmul.msk.f32.gmra.mxu2 %vm725_vm5, %v3674_v34 }
 0x613   : > { %3795 = vmatmul.f32.gmra.mxu1 %v3715_v48 }
 0x617   : > { %v3642_v1 = vpop.permute.xlu0 %3641  ;;  %v3580_v14 = vpop.permute.xlu2 %3579 }
 0x618   : > { %v3675_v24 = vsel %vm716_vm4, %v3667_v7, %v3642_v1  ;;  %v3660_v53 = vsel %vm225_vm0, %v2326_v35, %v3580_v14 }
 0x619   : > { %3997 = vmatmul.msk.f32.gmra.mxu2 %vm725_vm5, %v3675_v24 }
 0x61c   : > { %v3822_v47 = vpop.f32.mrf.mxu2 }
 0x61f   : > { %v3612_v6 = vpop.permute.xlu0 %3611 }
 0x620   : > { %v3668_v40 = vsel %vm707_vm3, %v3660_v53, %v3612_v6 }
 0x63f   : > { %v3700_v23 = vpop.permute.xlu2 %3699 }
 0x640   : > { %v3717_v10 = vsel %vm3709_vm6, %v7633_v31, %v3700_v23 }
 0x648   : > { %v3781_v9 = vpop.f32.mrf.mxu1 }
 0x649   : > { %v3782_v51 = vadd.f32 %v7996_v29, %v3781_v9 }
 0x64b   : > { %v3823_v17 = vadd.f32 %v3822_v47, %v3782_v51 }
 0x64d   : > { %v3846_v4 = vmul.f32 0.2, %v3823_v17 }
 0x64f   : > { %v3854_v59 = vmax.f32 %v3823_v17, %v3846_v4 }
 0x650   : > { %v3784_v54 = vpop.f32.mrf.mxu1 }
 0x651   : > { %3862 = vst.msk [vmem:[%s8003_s12] sm:$0xff] %vm707_vm3, %v3854_v59  ;;  %v3785_v60 = vadd.f32 %v7996_v29, %v3784_v54 }
 0x656   : > { %v3825_v18 = vpop.f32.mrf.mxu2 }
 0x657   : > { %v3826_v28 = vadd.f32 %v3825_v18, %v3785_v60  ;;  %v3698_v12 = vpop.permute.xlu1 %3697 }
 0x658   : > { %v3716_v43 = vsel %vm3709_vm6, %v7630_v57, %v3698_v12 }
 0x659   : > { %v3847_v21 = vmul.f32 0.2, %v3826_v28  ;;  %3798 = vmatmul.f32.gmra.mxu1 %v3716_v43 }
 0x65b   : > { %v3855_v32 = vmax.f32 %v3826_v28, %v3847_v21 }
 0x65d   : > { %3863 = vst.msk [vmem:[%s8003_s12 + $0x8] sm:$0xff] %vm707_vm3, %v3855_v32 }
 0x65f   : > { %v3644_v58 = vpop.permute.xlu1 %3643 }
 0x660   : > { %v3676_v55 = vsel %vm716_vm4, %v3668_v40, %v3644_v58 }
 0x661   : > { %3801 = vmatmul.f32.gmra.mxu1 %v3717_v10  ;;  %3998 = vmatmul.msk.f32.gmra.mxu2 %vm725_vm5, %v3676_v55 }
 0x66e   : > { %v3828_v49 = vpop.f32.mrf.mxu2 }
 0x670   : > { %v3787_v57 = vpop.f32.mrf.mxu1 }
 0x671   : > { %v3788_v38 = vadd.f32 %v7996_v29, %v3787_v57 }
 0x673   : > { %v3829_v41 = vadd.f32 %v3828_v49, %v3788_v38 }
 0x675   : > { %v3848_v56 = vmul.f32 0.2, %v3829_v41 }
 0x677   : > { %v3856_v52 = vmax.f32 %v3829_v41, %v3848_v56 }
 0x678   : > { %v3790_v33 = vpop.f32.mrf.mxu1 }
 0x679   : > { %3864 = vst.msk [vmem:[%s8003_s12 + $0x10] sm:$0xff] %vm707_vm3, %v3856_v52  ;;  %v3791_v13 = vadd.f32 %v7996_v29, %v3790_v33 }
 0x67c   : > { %v3831_v31 = vpop.f32.mrf.mxu2 }
 0x67d   : > { %v3832_v42 = vadd.f32 %v3831_v31, %v3791_v13 }
 0x67f   : > { %v3849_v22 = vmul.f32 0.2, %v3832_v42 }
 0x681   : > { %v3857_v39 = vmax.f32 %v3832_v42, %v3849_v22 }
 0x683   : > { %3865 = vst.msk [vmem:[%s8003_s12 + $0x18] sm:$0xff] %vm707_vm3, %v3857_v39 }
 0x684   : > { %v3834_v27 = vpop.f32.mrf.mxu2 }
 0x688   : > { %v3793_v25 = vpop.f32.mrf.mxu1 }
 0x689   : > { %v3794_v19 = vadd.f32 %v7996_v29, %v3793_v25 }
 0x68b   : > { %v3835_v37 = vadd.f32 %v3834_v27, %v3794_v19 }
 0x68d   : > { %v3850_v0 = vmul.f32 0.2, %v3835_v37 }
 0x68f   : > { %v3858_v50 = vmax.f32 %v3835_v37, %v3850_v0 }
 0x690   : > { %v3796_v44 = vpop.f32.mrf.mxu1 }
 0x691   : > { %3866 = vst.msk [vmem:[%s8003_s12 + $0x20] sm:$0xff] %vm707_vm3, %v3858_v50  ;;  %v3797_v63 = vadd.f32 %v7996_v29, %v3796_v44 }
 0x694   : > { %v3837_v46 = vpop.f32.mrf.mxu2 }
 0x695   : > { %v3838_v45 = vadd.f32 %v3837_v46, %v3797_v63 }
 0x697   : > { %v3851_v16 = vmul.f32 0.2, %v3838_v45 }
 0x699   : > { %v3859_v3 = vmax.f32 %v3838_v45, %v3851_v16 }
 0x69b   : > { %3867 = vst.msk [vmem:[%s8003_s12 + $0x28] sm:$0xff] %vm707_vm3, %v3859_v3 }
 0x69c   : > { %v3840_v20 = vpop.f32.mrf.mxu2 }
 0x6d6   : > { %v3799_v26 = vpop.f32.mrf.mxu1 }
 0x6d7   : > { %v3800_v11 = vadd.f32 %v7996_v29, %v3799_v26 }
 0x6d9   : > { %v3841_v8 = vadd.f32 %v3840_v20, %v3800_v11 }
 0x6db   : > { %v3852_v5 = vmul.f32 0.2, %v3841_v8 }
 0x6dd   : > { %v3860_v36 = vmax.f32 %v3841_v8, %v3852_v5 }
 0x6de   : > { %v3802_v15 = vpop.f32.mrf.mxu1 }
 0x6df   : > { %3868 = vst.msk [vmem:[%s8003_s12 + $0x30] sm:$0xff] %vm707_vm3, %v3860_v36  ;;  %v3803_v34 = vadd.f32 %v7996_v29, %v3802_v15 }
 0x6e4   : > { %v3843_v48 = vpop.f32.mrf.mxu2 }
 0x6e5   : > { %v3844_v2 = vadd.f32 %v3843_v48, %v3803_v34 }
 0x6e7   : > { %v3853_v30 = vmul.f32 0.2, %v3844_v2 }
 0x6e9   : > { %v3861_v62 = vmax.f32 %v3844_v2, %v3853_v30 }
 0x6eb   : > { %3869 = vst.msk [vmem:[%s8003_s12 + $0x38] sm:$0xff] %vm707_vm3, %v3861_v62 }
 0x6ec PF: > { %s15_s18 = sadd.s32 1, %s4716_s18  }
 0x6ed   : > { %p12_p4 = scmp.ge.s32.totalorder %s15_s18, 4  }
 0x6ef   :  { %14 = sbr.rel (!%p12_p4) target bundleno = 1 (0x1), region = 91 }

</bundles_post_ra>
